<compile_context>
chip_gen: v5e
topology: v5e:2x2
jax: 0.10.0
libtpu: 0.0.40
codegen_flags: <defaults>
</compile_context>

<pallas_src>
import functools

import jax
import jax.numpy as jnp
from jax.experimental import pallas as pl
from jax.experimental.pallas import tpu as pltpu


def _round_up(x, m):
    return (x + m - 1) // m * m


def _vmem_capacity_bytes():
    """Physical per-core VMEM; conservative (v7x-safe) fallback if the query fails."""
    try:
        info = pltpu.get_tpu_info()
        cap = getattr(info, "vmem_capacity_bytes", None)
        if cap:
            return int(cap)
    except Exception:
        pass
    return 64 * 1024 * 1024


def _estimate_vmem_bytes(th, w, cp, ebytes, single_buffer_weights):
    """Per-step VMEM estimate for the kernel below (double buffers counted)."""
    wp = w + 2
    main_in = 2 * th * wp * cp * ebytes              # main input block (x2 buffers)
    halo_in = 2 * 2 * wp * cp * ebytes               # two 1-row halo blocks (x2 buffers)
    weights = (1 if single_buffer_weights else 2) * 16 * cp * cp * ebytes
    bias = 2 * cp * 4
    out_blk = 2 * th * 2 * w * 2 * cp * ebytes       # output block (x2 buffers)
    acc = th * w * cp * 4                            # f32 scratch accumulator
    cols = 3 * th * w * cp * ebytes                  # hoisted column-shifted copies
    temps = 2 * th * w * cp * 4                      # dot results / headroom
    return main_in + halo_in + weights + bias + out_blk + acc + cols + temps


def _choose_row_tile(h, w, cp, ebytes, vmem_budget, single_buffer_weights, row_tile,
                     batch):
    """Largest divisor of h that feeds the MXU well and fits the VMEM budget."""
    divs = [d for d in range(1, h + 1) if h % d == 0]
    if row_tile is not None:
        target = row_tile
    else:
        # aim for M = th*W of a couple thousand rows per matmul, capped at 64 rows
        target = max(16, min(64, pl.cdiv(2048, max(w, 1))))
    fits = [d for d in divs
            if _estimate_vmem_bytes(d, w, cp, ebytes, single_buffer_weights)
            <= vmem_budget]
    if not fits:
        fits = [1]
    under = [d for d in fits if d <= target]
    th = max(under) if under else min(fits)
    # v7x has 2 TensorCores: keep >= 2 parallel grid tiles whenever possible.
    if batch * (h // th) < 2:
        smaller = [d for d in fits if d < th]
        if smaller:
            th = max(smaller)
    return th


def _upsample_conv_kernel(main_ref, halo0_ref, halo1_ref, w_ref, b_ref, out_ref,
                          acc_ref):
    # main_ref : (th, W+2, Cp)     padded-input rows [t*th, (t+1)*th)
    # halo0/1  : (W+2, Cp)         padded-input rows (t+1)*th and (t+1)*th + 1
    # w_ref    : (16, Cp, Cp)      subpixel weights, k = ((ph*2+pw)*2+dr)*2+dc
    # b_ref    : (1, Cp)           f32 bias
    # out_ref  : (th, 2, W, 2*Cp)  phase-separated output tile (lane-dense last dim)
    # acc_ref  : (th*W, Cp) f32    scratch accumulator, reused across the 4 phases
    th, wp, cp = main_ref.shape
    w = wp - 2

    # Hoist the three column-shifted copies of the main block once (flattened to 2-D so
    # every tap is a plain (M, Cp) x (Cp, Cp) MXU matmul).  Row shifts below are
    # leading-dim slices of these values and are cheap.
    colm = [main_ref[:, c:c + w, :].reshape(th * w, cp) for c in range(3)]
    h0 = [halo0_ref[c:c + w, :] for c in range(3)]          # (W, Cp) each
    h1 = [halo1_ref[c:c + w, :] for c in range(3)]

    bias_row = b_ref[...]                                    # (1, Cp) f32

    for ph in range(2):
        for pw in range(2):
            # bias-initialized f32 accumulator in VMEM (no live vreg chain / spills)
            acc_ref[...] = jnp.broadcast_to(bias_row, (th * w, cp))
            for dr in range(2):
                for dc in range(2):
                    s, c = ph + dr, pw + dc
                    k = ((ph * 2 + pw) * 2 + dr) * 2 + dc
                    wk = w_ref[k]                            # (Cp, Cp)
                    if th > s:
                        # output rows [0, th-s): taps entirely inside the main block
                        acc_ref[0:(th - s) * w] += jnp.dot(
                            colm[c][s * w:th * w], wk,
                            preferred_element_type=jnp.float32)
                    if 1 <= s <= th:
                        # output row th-s reads the first halo row
                        acc_ref[(th - s) * w:(th - s + 1) * w] += jnp.dot(
                            h0[c], wk, preferred_element_type=jnp.float32)
                    if s == 2:
                        # last output row reads the second halo row
                        acc_ref[(th - 1) * w:th * w] += jnp.dot(
                            h1[c], wk, preferred_element_type=jnp.float32)
            out_ref[:, ph, :, pw * cp:(pw + 1) * cp] = (
                acc_ref[...].reshape(th, w, cp).astype(out_ref.dtype))


def _subpixel_weights(weight_oihw):
    """(Cout,Cin,3,3) OIHW -> (ph, pw, dr, dc, Cin, Cout) phase-decomposed weights."""
    w = jnp.transpose(weight_oihw, (2, 3, 1, 0))             # (kh, kw, Cin, Cout)
    r0 = jnp.stack([w[0], w[1] + w[2]], axis=0)              # ph=0: (dr, kw, Ci, Co)
    r1 = jnp.stack([w[0] + w[1], w[2]], axis=0)              # ph=1
    rows = jnp.stack([r0, r1], axis=0)                       # (ph, dr, kw, Ci, Co)
    c0 = jnp.stack([rows[:, :, 0], rows[:, :, 1] + rows[:, :, 2]], axis=2)  # pw=0
    c1 = jnp.stack([rows[:, :, 0] + rows[:, :, 1], rows[:, :, 2]], axis=2)  # pw=1
    return jnp.stack([c0, c1], axis=1)                       # (ph, pw, dr, dc, Ci, Co)


@functools.partial(jax.jit,
                   static_argnames=("compute_dtype", "row_tile",
                                    "single_buffer_weights"))
def _forward_impl(x_nchw, weight_oihw, bias, *, compute_dtype, row_tile,
                  single_buffer_weights):
    B, C, H, W = x_nchw.shape
    Cp = _round_up(C, 128)                  # lane-dense channels
    ebytes = jnp.dtype(compute_dtype).itemsize

    cap = _vmem_capacity_bytes()            # 128 MiB on v5e/v6e, 64 MiB on v7x
    vmem_budget = int(0.70 * cap)
    vmem_limit = int(0.90 * cap)

    th = _choose_row_tile(H, W, Cp, ebytes, vmem_budget, single_buffer_weights,
                          row_tile, B)
    nT = H // th
    Wp = W + 2

    # ---- input layout glue: one fused XLA pass over the ORIGINAL-resolution input ----
    x = jnp.transpose(x_nchw, (0, 2, 3, 1)).astype(compute_dtype)       # NHWC
    # TODO(synk): move this pad into the kernel (pl.when boundary taps + in-VMEM channel
    # pad) to save an input-sized HBM round trip; for C << 128 the Cp pad also inflates
    # this stream.
    x_pad = jnp.pad(x, ((0, 0), (1, 1), (1, 1), (0, Cp - C)))           # (B,H+2,W+2,Cp)

    # ---- weights / bias prep (tiny) ----
    wsub = _subpixel_weights(weight_oihw).reshape(16, C, C)
    wsub = jnp.pad(wsub, ((0, 0), (0, Cp - C), (0, Cp - C))).astype(compute_dtype)
    b2d = jnp.pad(bias, (0, Cp - C)).reshape(1, Cp).astype(jnp.float32)

    # Resident (constant index-map) blocks: single-buffer them if supported.
    resident_kwargs = {}
    if single_buffer_weights:
        resident_kwargs = dict(pipeline_mode=pl.Buffered(1))
    w_spec = pl.BlockSpec((16, Cp, Cp), lambda b, t: (0, 0, 0), **resident_kwargs)
    b_spec = pl.BlockSpec((1, Cp), lambda b, t: (0, 0), **resident_kwargs)

    out4 = pl.pallas_call(
        _upsample_conv_kernel,
        out_shape=jax.ShapeDtypeStruct((B * H, 2, W, 2 * Cp), compute_dtype),
        grid_spec=pltpu.PrefetchScalarGridSpec(
            num_scalar_prefetch=0,
            grid=(B, nT),
            in_specs=[
                # main tile rows of the padded input (batch / row dims squeezed away)
                pl.BlockSpec((None, th, Wp, Cp), lambda b, t: (b, t, 0, 0)),
                # 2-row bottom halo (block size 1 => block index == row index)
                pl.BlockSpec((None, None, Wp, Cp),
                             lambda b, t: (b, (t + 1) * th, 0, 0)),
                pl.BlockSpec((None, None, Wp, Cp),
                             lambda b, t: (b, (t + 1) * th + 1, 0, 0)),
                w_spec,
                b_spec,
            ],
            out_specs=pl.BlockSpec((th, 2, W, 2 * Cp),
                                   lambda b, t: (b * nT + t, 0, 0, 0)),
            scratch_shapes=[pltpu.VMEM((th * W, Cp), jnp.float32)],
        ),
        compiler_params=pltpu.CompilerParams(
            dimension_semantics=("parallel", "parallel"),
            vmem_limit_bytes=vmem_limit),
    )(x_pad, x_pad, x_pad, wsub, b2d)

    # ---- phase recombination fused into the (required) ->NCHW output transform ----
    out = out4.reshape(B, H, 2, W, 2, Cp)
    out = jnp.transpose(out, (0, 5, 1, 2, 3, 4))                # (B, Cp, H, 2, W, 2)
    out = out.reshape(B, Cp, 2 * H, 2 * W)[:, :C]
    return out.astype(x_nchw.dtype)


_SINGLE_BUFFER_WEIGHTS = None   # resolved on first call (pl.Buffered(1) support probe)


def upsample_block_forward(x_nchw, weight_oihw, bias, *,
                           compute_dtype=jnp.bfloat16, row_tile=None):
    """UpSampleBlock forward: nearest-2x upsample + Conv2d(C, C, 3, 1, 1).

    x_nchw      : (B, C, H, W)
    weight_oihw : (C, C, 3, 3)   PyTorch Conv2d layout
    bias        : (C,)
    returns     : (B, C, 2H, 2W) in x_nchw.dtype
    """
    global _SINGLE_BUFFER_WEIGHTS
    if _SINGLE_BUFFER_WEIGHTS is None:
        try:
            out = _forward_impl(x_nchw, weight_oihw, bias,
                                compute_dtype=compute_dtype, row_tile=row_tile,
                                single_buffer_weights=True)
            jax.block_until_ready(out)
            _SINGLE_BUFFER_WEIGHTS = True
            return out
        except Exception:
            # pl.Buffered(1) (single-buffered resident weights) not supported on this
            # jax version -- fall back to default double buffering.
            _SINGLE_BUFFER_WEIGHTS = False
    return _forward_impl(x_nchw, weight_oihw, bias,
                         compute_dtype=compute_dtype, row_tile=row_tile,
                         single_buffer_weights=_SINGLE_BUFFER_WEIGHTS)


def _reference_forward(x_nchw, weight_oihw, bias):
    """Pure-JAX reference matching PyTorch semantics (nearest 2x + 3x3 conv, pad 1)."""
    x = jnp.repeat(x_nchw, 2, axis=2)
    x = jnp.repeat(x, 2, axis=3)
    out = jax.lax.conv_general_dilated(
        x, weight_oihw,
        window_strides=(1, 1),
        padding=((1, 1), (1, 1)),
        dimension_numbers=("NCHW", "OIHW", "NCHW"),
        precision=jax.lax.Precision.HIGHEST,
    )
    return out + bias[None, :, None, None]


if __name__ == "__main__":
    key = jax.random.PRNGKey(0)
    kx, kw, kb = jax.random.split(key, 3)

    B, C, H, W = 2, 4, 16, 16
    x = jax.random.normal(kx, (B, C, H, W), dtype=jnp.float32)

    # deterministic synthetic Conv2d(C, C, 3, 1, 1) parameters
    fan_in = C * 3 * 3
    bound = 1.0 / (fan_in ** 0.5)
    weight = jax.random.uniform(kw, (C, C, 3, 3), jnp.float32, -bound, bound)
    bias = jax.random.uniform(kb, (C,), jnp.float32, -bound, bound)

    ref = _reference_forward(x, weight, bias)

    # f32 compute path with a small row tile: exercises the subpixel decomposition, the
    # halo split-matmuls and the multi-tile (t > 0) indexing tightly.
    out_f32 = jax.block_until_ready(
        upsample_block_forward(x, weight, bias, compute_dtype=jnp.float32, row_tile=4))
    assert out_f32.shape == (B, C, 2 * H, 2 * W), out_f32.shape
    err_f32 = float(jnp.max(jnp.abs(out_f32 - ref)))
    assert err_f32 < 2e-2, err_f32

    # Default bf16-MXU path (auto tile / auto VMEM budget): looser tolerance.
    out_bf16 = jax.block_until_ready(upsample_block_forward(x, weight, bias))
    assert out_bf16.shape == (B, C, 2 * H, 2 * W), out_bf16.shape
    err_bf16 = float(jnp.max(jnp.abs(out_bf16 - ref)))
    assert err_bf16 < 5e-2, err_bf16

    print("KERNEL_OK")
</pallas_src>

<mosaic_0001>
module attributes {stable_mosaic.version = 11 : i64} {
  func.func @_upsample_conv_kernel(%arg0: i32, %arg1: i32, %arg2: memref<1x4x18x128xf32, #tpu.memory_space<vmem>>, %arg3: memref<1x1x18x128xf32, #tpu.memory_space<vmem>>, %arg4: memref<1x1x18x128xf32, #tpu.memory_space<vmem>>, %arg5: memref<16x128x128xf32, #tpu.memory_space<vmem>>, %arg6: memref<1x128xf32, #tpu.memory_space<vmem>>, %arg7: memref<4x2x16x256xf32, #tpu.memory_space<vmem>>, %arg8: memref<64x128xf32, #tpu.memory_space<vmem>>) attributes {dimension_semantics = [#tpu.dimension_semantics<parallel>, #tpu.dimension_semantics<parallel>], iteration_bounds = array<i64: 2, 4>, scalar_prefetch = 0 : i64, scratch_operands = 1 : i64, tpu.core_type = #tpu.core_type<tc>, window_params = [{transform_indices = @transform_0, window_bounds = array<i64: 1, 4, 18, 128>}, {transform_indices = @transform_1, window_bounds = array<i64: 1, 1, 18, 128>}, {transform_indices = @transform_2, window_bounds = array<i64: 1, 1, 18, 128>}, {pipeline_mode = #tpu.pipeline_mode<synchronous>, transform_indices = @transform_3, window_bounds = array<i64: 16, 128, 128>}, {pipeline_mode = #tpu.pipeline_mode<synchronous>, transform_indices = @transform_4, window_bounds = array<i64: 1, 128>}, {transform_indices = @transform_5, window_bounds = array<i64: 4, 2, 16, 256>}]} {
    %c0 = arith.constant 0 : index
    %c0_0 = arith.constant 0 : index
    %c0_1 = arith.constant 0 : index
    %c0_2 = arith.constant 0 : index
    %0 = vector.load %arg2[%c0, %c0_0, %c0_1, %c0_2] : memref<1x4x18x128xf32, #tpu.memory_space<vmem>>, vector<1x4x16x128xf32>
    %1 = vector.shape_cast %0 : vector<1x4x16x128xf32> to vector<4x16x128xf32>
    %2 = vector.shape_cast %1 : vector<4x16x128xf32> to vector<64x128xf32>
    %c0_3 = arith.constant 0 : index
    %c0_4 = arith.constant 0 : index
    %c1 = arith.constant 1 : index
    %c0_5 = arith.constant 0 : index
    %3 = vector.load %arg2[%c0_3, %c0_4, %c1, %c0_5] : memref<1x4x18x128xf32, #tpu.memory_space<vmem>>, vector<1x4x16x128xf32>
    %4 = vector.shape_cast %3 : vector<1x4x16x128xf32> to vector<4x16x128xf32>
    %5 = vector.shape_cast %4 : vector<4x16x128xf32> to vector<64x128xf32>
    %c0_6 = arith.constant 0 : index
    %c0_7 = arith.constant 0 : index
    %c2 = arith.constant 2 : index
    %c0_8 = arith.constant 0 : index
    %6 = vector.load %arg2[%c0_6, %c0_7, %c2, %c0_8] : memref<1x4x18x128xf32, #tpu.memory_space<vmem>>, vector<1x4x16x128xf32>
    %7 = vector.shape_cast %6 : vector<1x4x16x128xf32> to vector<4x16x128xf32>
    %8 = vector.shape_cast %7 : vector<4x16x128xf32> to vector<64x128xf32>
    %c0_9 = arith.constant 0 : index
    %c0_10 = arith.constant 0 : index
    %c0_11 = arith.constant 0 : index
    %c0_12 = arith.constant 0 : index
    %9 = vector.load %arg3[%c0_9, %c0_10, %c0_11, %c0_12] : memref<1x1x18x128xf32, #tpu.memory_space<vmem>>, vector<1x1x16x128xf32>
    %10 = vector.shape_cast %9 : vector<1x1x16x128xf32> to vector<16x128xf32>
    %c0_13 = arith.constant 0 : index
    %c0_14 = arith.constant 0 : index
    %c1_15 = arith.constant 1 : index
    %c0_16 = arith.constant 0 : index
    %11 = vector.load %arg3[%c0_13, %c0_14, %c1_15, %c0_16] : memref<1x1x18x128xf32, #tpu.memory_space<vmem>>, vector<1x1x16x128xf32>
    %12 = vector.shape_cast %11 : vector<1x1x16x128xf32> to vector<16x128xf32>
    %c0_17 = arith.constant 0 : index
    %c0_18 = arith.constant 0 : index
    %c2_19 = arith.constant 2 : index
    %c0_20 = arith.constant 0 : index
    %13 = vector.load %arg3[%c0_17, %c0_18, %c2_19, %c0_20] : memref<1x1x18x128xf32, #tpu.memory_space<vmem>>, vector<1x1x16x128xf32>
    %14 = vector.shape_cast %13 : vector<1x1x16x128xf32> to vector<16x128xf32>
    %c0_21 = arith.constant 0 : index
    %c0_22 = arith.constant 0 : index
    %c0_23 = arith.constant 0 : index
    %c0_24 = arith.constant 0 : index
    %15 = vector.load %arg4[%c0_21, %c0_22, %c0_23, %c0_24] : memref<1x1x18x128xf32, #tpu.memory_space<vmem>>, vector<1x1x16x128xf32>
    %16 = vector.shape_cast %15 : vector<1x1x16x128xf32> to vector<16x128xf32>
    %c0_25 = arith.constant 0 : index
    %c0_26 = arith.constant 0 : index
    %c1_27 = arith.constant 1 : index
    %c0_28 = arith.constant 0 : index
    %17 = vector.load %arg4[%c0_25, %c0_26, %c1_27, %c0_28] : memref<1x1x18x128xf32, #tpu.memory_space<vmem>>, vector<1x1x16x128xf32>
    %18 = vector.shape_cast %17 : vector<1x1x16x128xf32> to vector<16x128xf32>
    %c0_29 = arith.constant 0 : index
    %c0_30 = arith.constant 0 : index
    %c2_31 = arith.constant 2 : index
    %c0_32 = arith.constant 0 : index
    %19 = vector.load %arg4[%c0_29, %c0_30, %c2_31, %c0_32] : memref<1x1x18x128xf32, #tpu.memory_space<vmem>>, vector<1x1x16x128xf32>
    %20 = vector.shape_cast %19 : vector<1x1x16x128xf32> to vector<16x128xf32>
    %c0_33 = arith.constant 0 : index
    %c0_34 = arith.constant 0 : index
    %21 = vector.load %arg6[%c0_33, %c0_34] : memref<1x128xf32, #tpu.memory_space<vmem>>, vector<1x128xf32>
    %22 = vector.shape_cast %21 : vector<1x128xf32> to vector<1x128xf32>
    %23 = vector.broadcast %22 : vector<1x128xf32> to vector<64x128xf32>
    %c0_35 = arith.constant 0 : index
    %c0_36 = arith.constant 0 : index
    %24 = vector.load %arg8[%c0_35, %c0_36] : memref<64x128xf32, #tpu.memory_space<vmem>>, vector<64x128xf32>
    tpu.vector_store %arg8[%c0_35, %c0_36], %23 {strides = array<i32>} : memref<64x128xf32, #tpu.memory_space<vmem>>, vector<64x128xf32>,
    %c0_37 = arith.constant 0 : index
    %c0_38 = arith.constant 0 : index
    %c0_39 = arith.constant 0 : index
    %25 = vector.load %arg5[%c0_37, %c0_38, %c0_39] : memref<16x128x128xf32, #tpu.memory_space<vmem>>, vector<1x128x128xf32>
    %26 = vector.shape_cast %25 : vector<1x128x128xf32> to vector<128x128xf32>
    %c0_40 = arith.constant 0 : index
    %c0_41 = arith.constant 0 : index
    %27 = vector.load %arg8[%c0_40, %c0_41] : memref<64x128xf32, #tpu.memory_space<vmem>>, vector<64x128xf32>
    %cst = arith.constant dense<0.000000e+00> : vector<64x128xf32>
    %28 = tpu.matmul %2, %26, %cst {dimension_numbers = #tpu.dot_dimension_numbers<[1], [0], [0], [1], [0, 0, 1, 1], [], []>} : vector<64x128xf32>, vector<128x128xf32>, vector<64x128xf32> -> vector<64x128xf32>
    %29 = arith.addf %27, %28 : vector<64x128xf32>
    %c0_42 = arith.constant 0 : index
    %c0_43 = arith.constant 0 : index
    %30 = vector.load %arg8[%c0_42, %c0_43] : memref<64x128xf32, #tpu.memory_space<vmem>>, vector<64x128xf32>
    tpu.vector_store %arg8[%c0_42, %c0_43], %29 {strides = array<i32>} : memref<64x128xf32, #tpu.memory_space<vmem>>, vector<64x128xf32>,
    %c1_44 = arith.constant 1 : index
    %c0_45 = arith.constant 0 : index
    %c0_46 = arith.constant 0 : index
    %31 = vector.load %arg5[%c1_44, %c0_45, %c0_46] : memref<16x128x128xf32, #tpu.memory_space<vmem>>, vector<1x128x128xf32>
    %32 = vector.shape_cast %31 : vector<1x128x128xf32> to vector<128x128xf32>
    %c0_47 = arith.constant 0 : index
    %c0_48 = arith.constant 0 : index
    %33 = vector.load %arg8[%c0_47, %c0_48] : memref<64x128xf32, #tpu.memory_space<vmem>>, vector<64x128xf32>
    %cst_49 = arith.constant dense<0.000000e+00> : vector<64x128xf32>
    %34 = tpu.matmul %5, %32, %cst_49 {dimension_numbers = #tpu.dot_dimension_numbers<[1], [0], [0], [1], [0, 0, 1, 1], [], []>} : vector<64x128xf32>, vector<128x128xf32>, vector<64x128xf32> -> vector<64x128xf32>
    %35 = arith.addf %33, %34 : vector<64x128xf32>
    %c0_50 = arith.constant 0 : index
    %c0_51 = arith.constant 0 : index
    %36 = vector.load %arg8[%c0_50, %c0_51] : memref<64x128xf32, #tpu.memory_space<vmem>>, vector<64x128xf32>
    tpu.vector_store %arg8[%c0_50, %c0_51], %35 {strides = array<i32>} : memref<64x128xf32, #tpu.memory_space<vmem>>, vector<64x128xf32>,
    %c2_52 = arith.constant 2 : index
    %c0_53 = arith.constant 0 : index
    %c0_54 = arith.constant 0 : index
    %37 = vector.load %arg5[%c2_52, %c0_53, %c0_54] : memref<16x128x128xf32, #tpu.memory_space<vmem>>, vector<1x128x128xf32>
    %38 = vector.shape_cast %37 : vector<1x128x128xf32> to vector<128x128xf32>
    %c0_55 = arith.constant 0 : index
    %c0_56 = arith.constant 0 : index
    %39 = vector.load %arg8[%c0_55, %c0_56] : memref<64x128xf32, #tpu.memory_space<vmem>>, vector<48x128xf32>
    %40 = vector.extract_strided_slice %2 {offsets = [16, 0], sizes = [48, 128], strides = [1, 1]} : vector<64x128xf32> to vector<48x128xf32>
    %cst_57 = arith.constant dense<0.000000e+00> : vector<48x128xf32>
    %41 = tpu.matmul %40, %38, %cst_57 {dimension_numbers = #tpu.dot_dimension_numbers<[1], [0], [0], [1], [0, 0, 1, 1], [], []>} : vector<48x128xf32>, vector<128x128xf32>, vector<48x128xf32> -> vector<48x128xf32>
    %42 = arith.addf %39, %41 : vector<48x128xf32>
    %c0_58 = arith.constant 0 : index
    %c0_59 = arith.constant 0 : index
    %43 = vector.load %arg8[%c0_58, %c0_59] : memref<64x128xf32, #tpu.memory_space<vmem>>, vector<48x128xf32>
    tpu.vector_store %arg8[%c0_58, %c0_59], %42 {strides = array<i32>} : memref<64x128xf32, #tpu.memory_space<vmem>>, vector<48x128xf32>,
    %c48 = arith.constant 48 : index
    %c0_60 = arith.constant 0 : index
    %44 = vector.load %arg8[%c48, %c0_60] : memref<64x128xf32, #tpu.memory_space<vmem>>, vector<16x128xf32>
    %cst_61 = arith.constant dense<0.000000e+00> : vector<16x128xf32>
    %45 = tpu.matmul %10, %38, %cst_61 {dimension_numbers = #tpu.dot_dimension_numbers<[1], [0], [0], [1], [0, 0, 1, 1], [], []>} : vector<16x128xf32>, vector<128x128xf32>, vector<16x128xf32> -> vector<16x128xf32>
    %46 = arith.addf %44, %45 : vector<16x128xf32>
    %c48_62 = arith.constant 48 : index
    %c0_63 = arith.constant 0 : index
    %47 = vector.load %arg8[%c48_62, %c0_63] : memref<64x128xf32, #tpu.memory_space<vmem>>, vector<16x128xf32>
    tpu.vector_store %arg8[%c48_62, %c0_63], %46 {strides = array<i32>} : memref<64x128xf32, #tpu.memory_space<vmem>>, vector<16x128xf32>,
    %c3 = arith.constant 3 : index
    %c0_64 = arith.constant 0 : index
    %c0_65 = arith.constant 0 : index
    %48 = vector.load %arg5[%c3, %c0_64, %c0_65] : memref<16x128x128xf32, #tpu.memory_space<vmem>>, vector<1x128x128xf32>
    %49 = vector.shape_cast %48 : vector<1x128x128xf32> to vector<128x128xf32>
    %c0_66 = arith.constant 0 : index
    %c0_67 = arith.constant 0 : index
    %50 = vector.load %arg8[%c0_66, %c0_67] : memref<64x128xf32, #tpu.memory_space<vmem>>, vector<48x128xf32>
    %51 = vector.extract_strided_slice %5 {offsets = [16, 0], sizes = [48, 128], strides = [1, 1]} : vector<64x128xf32> to vector<48x128xf32>
    %cst_68 = arith.constant dense<0.000000e+00> : vector<48x128xf32>
    %52 = tpu.matmul %51, %49, %cst_68 {dimension_numbers = #tpu.dot_dimension_numbers<[1], [0], [0], [1], [0, 0, 1, 1], [], []>} : vector<48x128xf32>, vector<128x128xf32>, vector<48x128xf32> -> vector<48x128xf32>
    %53 = arith.addf %50, %52 : vector<48x128xf32>
    %c0_69 = arith.constant 0 : index
    %c0_70 = arith.constant 0 : index
    %54 = vector.load %arg8[%c0_69, %c0_70] : memref<64x128xf32, #tpu.memory_space<vmem>>, vector<48x128xf32>
    tpu.vector_store %arg8[%c0_69, %c0_70], %53 {strides = array<i32>} : memref<64x128xf32, #tpu.memory_space<vmem>>, vector<48x128xf32>,
    %c48_71 = arith.constant 48 : index
    %c0_72 = arith.constant 0 : index
    %55 = vector.load %arg8[%c48_71, %c0_72] : memref<64x128xf32, #tpu.memory_space<vmem>>, vector<16x128xf32>
    %cst_73 = arith.constant dense<0.000000e+00> : vector<16x128xf32>
    %56 = tpu.matmul %12, %49, %cst_73 {dimension_numbers = #tpu.dot_dimension_numbers<[1], [0], [0], [1], [0, 0, 1, 1], [], []>} : vector<16x128xf32>, vector<128x128xf32>, vector<16x128xf32> -> vector<16x128xf32>
    %57 = arith.addf %55, %56 : vector<16x128xf32>
    %c48_74 = arith.constant 48 : index
    %c0_75 = arith.constant 0 : index
    %58 = vector.load %arg8[%c48_74, %c0_75] : memref<64x128xf32, #tpu.memory_space<vmem>>, vector<16x128xf32>
    tpu.vector_store %arg8[%c48_74, %c0_75], %57 {strides = array<i32>} : memref<64x128xf32, #tpu.memory_space<vmem>>, vector<16x128xf32>,
    %c0_76 = arith.constant 0 : index
    %c0_77 = arith.constant 0 : index
    %59 = vector.load %arg8[%c0_76, %c0_77] : memref<64x128xf32, #tpu.memory_space<vmem>>, vector<64x128xf32>
    %60 = vector.shape_cast %59 : vector<64x128xf32> to vector<4x16x128xf32>
    %c0_78 = arith.constant 0 : index
    %c0_79 = arith.constant 0 : index
    %c0_80 = arith.constant 0 : index
    %c0_81 = arith.constant 0 : index
    %61 = vector.load %arg7[%c0_78, %c0_79, %c0_80, %c0_81] : memref<4x2x16x256xf32, #tpu.memory_space<vmem>>, vector<4x1x16x128xf32>
    %62 = vector.shape_cast %61 : vector<4x1x16x128xf32> to vector<4x16x128xf32>
    %63 = vector.shape_cast %60 : vector<4x16x128xf32> to vector<4x1x16x128xf32>
    tpu.vector_store %arg7[%c0_78, %c0_79, %c0_80, %c0_81], %63 {strides = array<i32>} : memref<4x2x16x256xf32, #tpu.memory_space<vmem>>, vector<4x1x16x128xf32>,
    %64 = vector.shape_cast %21 : vector<1x128xf32> to vector<1x128xf32>
    %65 = vector.broadcast %64 : vector<1x128xf32> to vector<64x128xf32>
    %c0_82 = arith.constant 0 : index
    %c0_83 = arith.constant 0 : index
    %66 = vector.load %arg8[%c0_82, %c0_83] : memref<64x128xf32, #tpu.memory_space<vmem>>, vector<64x128xf32>
    tpu.vector_store %arg8[%c0_82, %c0_83], %65 {strides = array<i32>} : memref<64x128xf32, #tpu.memory_space<vmem>>, vector<64x128xf32>,
    %c4 = arith.constant 4 : index
    %c0_84 = arith.constant 0 : index
    %c0_85 = arith.constant 0 : index
    %67 = vector.load %arg5[%c4, %c0_84, %c0_85] : memref<16x128x128xf32, #tpu.memory_space<vmem>>, vector<1x128x128xf32>
    %68 = vector.shape_cast %67 : vector<1x128x128xf32> to vector<128x128xf32>
    %c0_86 = arith.constant 0 : index
    %c0_87 = arith.constant 0 : index
    %69 = vector.load %arg8[%c0_86, %c0_87] : memref<64x128xf32, #tpu.memory_space<vmem>>, vector<64x128xf32>
    %cst_88 = arith.constant dense<0.000000e+00> : vector<64x128xf32>
    %70 = tpu.matmul %5, %68, %cst_88 {dimension_numbers = #tpu.dot_dimension_numbers<[1], [0], [0], [1], [0, 0, 1, 1], [], []>} : vector<64x128xf32>, vector<128x128xf32>, vector<64x128xf32> -> vector<64x128xf32>
    %71 = arith.addf %69, %70 : vector<64x128xf32>
    %c0_89 = arith.constant 0 : index
    %c0_90 = arith.constant 0 : index
    %72 = vector.load %arg8[%c0_89, %c0_90] : memref<64x128xf32, #tpu.memory_space<vmem>>, vector<64x128xf32>
    tpu.vector_store %arg8[%c0_89, %c0_90], %71 {strides = array<i32>} : memref<64x128xf32, #tpu.memory_space<vmem>>, vector<64x128xf32>,
    %c5 = arith.constant 5 : index
    %c0_91 = arith.constant 0 : index
    %c0_92 = arith.constant 0 : index
    %73 = vector.load %arg5[%c5, %c0_91, %c0_92] : memref<16x128x128xf32, #tpu.memory_space<vmem>>, vector<1x128x128xf32>
    %74 = vector.shape_cast %73 : vector<1x128x128xf32> to vector<128x128xf32>
    %c0_93 = arith.constant 0 : index
    %c0_94 = arith.constant 0 : index
    %75 = vector.load %arg8[%c0_93, %c0_94] : memref<64x128xf32, #tpu.memory_space<vmem>>, vector<64x128xf32>
    %cst_95 = arith.constant dense<0.000000e+00> : vector<64x128xf32>
    %76 = tpu.matmul %8, %74, %cst_95 {dimension_numbers = #tpu.dot_dimension_numbers<[1], [0], [0], [1], [0, 0, 1, 1], [], []>} : vector<64x128xf32>, vector<128x128xf32>, vector<64x128xf32> -> vector<64x128xf32>
    %77 = arith.addf %75, %76 : vector<64x128xf32>
    %c0_96 = arith.constant 0 : index
    %c0_97 = arith.constant 0 : index
    %78 = vector.load %arg8[%c0_96, %c0_97] : memref<64x128xf32, #tpu.memory_space<vmem>>, vector<64x128xf32>
    tpu.vector_store %arg8[%c0_96, %c0_97], %77 {strides = array<i32>} : memref<64x128xf32, #tpu.memory_space<vmem>>, vector<64x128xf32>,
    %c6 = arith.constant 6 : index
    %c0_98 = arith.constant 0 : index
    %c0_99 = arith.constant 0 : index
    %79 = vector.load %arg5[%c6, %c0_98, %c0_99] : memref<16x128x128xf32, #tpu.memory_space<vmem>>, vector<1x128x128xf32>
    %80 = vector.shape_cast %79 : vector<1x128x128xf32> to vector<128x128xf32>
    %c0_100 = arith.constant 0 : index
    %c0_101 = arith.constant 0 : index
    %81 = vector.load %arg8[%c0_100, %c0_101] : memref<64x128xf32, #tpu.memory_space<vmem>>, vector<48x128xf32>
    %82 = vector.extract_strided_slice %5 {offsets = [16, 0], sizes = [48, 128], strides = [1, 1]} : vector<64x128xf32> to vector<48x128xf32>
    %cst_102 = arith.constant dense<0.000000e+00> : vector<48x128xf32>
    %83 = tpu.matmul %82, %80, %cst_102 {dimension_numbers = #tpu.dot_dimension_numbers<[1], [0], [0], [1], [0, 0, 1, 1], [], []>} : vector<48x128xf32>, vector<128x128xf32>, vector<48x128xf32> -> vector<48x128xf32>
    %84 = arith.addf %81, %83 : vector<48x128xf32>
    %c0_103 = arith.constant 0 : index
    %c0_104 = arith.constant 0 : index
    %85 = vector.load %arg8[%c0_103, %c0_104] : memref<64x128xf32, #tpu.memory_space<vmem>>, vector<48x128xf32>
    tpu.vector_store %arg8[%c0_103, %c0_104], %84 {strides = array<i32>} : memref<64x128xf32, #tpu.memory_space<vmem>>, vector<48x128xf32>,
    %c48_105 = arith.constant 48 : index
    %c0_106 = arith.constant 0 : index
    %86 = vector.load %arg8[%c48_105, %c0_106] : memref<64x128xf32, #tpu.memory_space<vmem>>, vector<16x128xf32>
    %cst_107 = arith.constant dense<0.000000e+00> : vector<16x128xf32>
    %87 = tpu.matmul %12, %80, %cst_107 {dimension_numbers = #tpu.dot_dimension_numbers<[1], [0], [0], [1], [0, 0, 1, 1], [], []>} : vector<16x128xf32>, vector<128x128xf32>, vector<16x128xf32> -> vector<16x128xf32>
    %88 = arith.addf %86, %87 : vector<16x128xf32>
    %c48_108 = arith.constant 48 : index
    %c0_109 = arith.constant 0 : index
    %89 = vector.load %arg8[%c48_108, %c0_109] : memref<64x128xf32, #tpu.memory_space<vmem>>, vector<16x128xf32>
    tpu.vector_store %arg8[%c48_108, %c0_109], %88 {strides = array<i32>} : memref<64x128xf32, #tpu.memory_space<vmem>>, vector<16x128xf32>,
    %c7 = arith.constant 7 : index
    %c0_110 = arith.constant 0 : index
    %c0_111 = arith.constant 0 : index
    %90 = vector.load %arg5[%c7, %c0_110, %c0_111] : memref<16x128x128xf32, #tpu.memory_space<vmem>>, vector<1x128x128xf32>
    %91 = vector.shape_cast %90 : vector<1x128x128xf32> to vector<128x128xf32>
    %c0_112 = arith.constant 0 : index
    %c0_113 = arith.constant 0 : index
    %92 = vector.load %arg8[%c0_112, %c0_113] : memref<64x128xf32, #tpu.memory_space<vmem>>, vector<48x128xf32>
    %93 = vector.extract_strided_slice %8 {offsets = [16, 0], sizes = [48, 128], strides = [1, 1]} : vector<64x128xf32> to vector<48x128xf32>
    %cst_114 = arith.constant dense<0.000000e+00> : vector<48x128xf32>
    %94 = tpu.matmul %93, %91, %cst_114 {dimension_numbers = #tpu.dot_dimension_numbers<[1], [0], [0], [1], [0, 0, 1, 1], [], []>} : vector<48x128xf32>, vector<128x128xf32>, vector<48x128xf32> -> vector<48x128xf32>
    %95 = arith.addf %92, %94 : vector<48x128xf32>
    %c0_115 = arith.constant 0 : index
    %c0_116 = arith.constant 0 : index
    %96 = vector.load %arg8[%c0_115, %c0_116] : memref<64x128xf32, #tpu.memory_space<vmem>>, vector<48x128xf32>
    tpu.vector_store %arg8[%c0_115, %c0_116], %95 {strides = array<i32>} : memref<64x128xf32, #tpu.memory_space<vmem>>, vector<48x128xf32>,
    %c48_117 = arith.constant 48 : index
    %c0_118 = arith.constant 0 : index
    %97 = vector.load %arg8[%c48_117, %c0_118] : memref<64x128xf32, #tpu.memory_space<vmem>>, vector<16x128xf32>
    %cst_119 = arith.constant dense<0.000000e+00> : vector<16x128xf32>
    %98 = tpu.matmul %14, %91, %cst_119 {dimension_numbers = #tpu.dot_dimension_numbers<[1], [0], [0], [1], [0, 0, 1, 1], [], []>} : vector<16x128xf32>, vector<128x128xf32>, vector<16x128xf32> -> vector<16x128xf32>
    %99 = arith.addf %97, %98 : vector<16x128xf32>
    %c48_120 = arith.constant 48 : index
    %c0_121 = arith.constant 0 : index
    %100 = vector.load %arg8[%c48_120, %c0_121] : memref<64x128xf32, #tpu.memory_space<vmem>>, vector<16x128xf32>
    tpu.vector_store %arg8[%c48_120, %c0_121], %99 {strides = array<i32>} : memref<64x128xf32, #tpu.memory_space<vmem>>, vector<16x128xf32>,
    %c0_122 = arith.constant 0 : index
    %c0_123 = arith.constant 0 : index
    %101 = vector.load %arg8[%c0_122, %c0_123] : memref<64x128xf32, #tpu.memory_space<vmem>>, vector<64x128xf32>
    %102 = vector.shape_cast %101 : vector<64x128xf32> to vector<4x16x128xf32>
    %c0_124 = arith.constant 0 : index
    %c0_125 = arith.constant 0 : index
    %c0_126 = arith.constant 0 : index
    %c128 = arith.constant 128 : index
    %103 = vector.load %arg7[%c0_124, %c0_125, %c0_126, %c128] : memref<4x2x16x256xf32, #tpu.memory_space<vmem>>, vector<4x1x16x128xf32>
    %104 = vector.shape_cast %103 : vector<4x1x16x128xf32> to vector<4x16x128xf32>
    %105 = vector.shape_cast %102 : vector<4x16x128xf32> to vector<4x1x16x128xf32>
    tpu.vector_store %arg7[%c0_124, %c0_125, %c0_126, %c128], %105 {strides = array<i32>} : memref<4x2x16x256xf32, #tpu.memory_space<vmem>>, vector<4x1x16x128xf32>,
    %106 = vector.shape_cast %21 : vector<1x128xf32> to vector<1x128xf32>
    %107 = vector.broadcast %106 : vector<1x128xf32> to vector<64x128xf32>
    %c0_127 = arith.constant 0 : index
    %c0_128 = arith.constant 0 : index
    %108 = vector.load %arg8[%c0_127, %c0_128] : memref<64x128xf32, #tpu.memory_space<vmem>>, vector<64x128xf32>
    tpu.vector_store %arg8[%c0_127, %c0_128], %107 {strides = array<i32>} : memref<64x128xf32, #tpu.memory_space<vmem>>, vector<64x128xf32>,
    %c8 = arith.constant 8 : index
    %c0_129 = arith.constant 0 : index
    %c0_130 = arith.constant 0 : index
    %109 = vector.load %arg5[%c8, %c0_129, %c0_130] : memref<16x128x128xf32, #tpu.memory_space<vmem>>, vector<1x128x128xf32>
    %110 = vector.shape_cast %109 : vector<1x128x128xf32> to vector<128x128xf32>
    %c0_131 = arith.constant 0 : index
    %c0_132 = arith.constant 0 : index
    %111 = vector.load %arg8[%c0_131, %c0_132] : memref<64x128xf32, #tpu.memory_space<vmem>>, vector<48x128xf32>
    %112 = vector.extract_strided_slice %2 {offsets = [16, 0], sizes = [48, 128], strides = [1, 1]} : vector<64x128xf32> to vector<48x128xf32>
    %cst_133 = arith.constant dense<0.000000e+00> : vector<48x128xf32>
    %113 = tpu.matmul %112, %110, %cst_133 {dimension_numbers = #tpu.dot_dimension_numbers<[1], [0], [0], [1], [0, 0, 1, 1], [], []>} : vector<48x128xf32>, vector<128x128xf32>, vector<48x128xf32> -> vector<48x128xf32>
    %114 = arith.addf %111, %113 : vector<48x128xf32>
    %c0_134 = arith.constant 0 : index
    %c0_135 = arith.constant 0 : index
    %115 = vector.load %arg8[%c0_134, %c0_135] : memref<64x128xf32, #tpu.memory_space<vmem>>, vector<48x128xf32>
    tpu.vector_store %arg8[%c0_134, %c0_135], %114 {strides = array<i32>} : memref<64x128xf32, #tpu.memory_space<vmem>>, vector<48x128xf32>,
    %c48_136 = arith.constant 48 : index
    %c0_137 = arith.constant 0 : index
    %116 = vector.load %arg8[%c48_136, %c0_137] : memref<64x128xf32, #tpu.memory_space<vmem>>, vector<16x128xf32>
    %cst_138 = arith.constant dense<0.000000e+00> : vector<16x128xf32>
    %117 = tpu.matmul %10, %110, %cst_138 {dimension_numbers = #tpu.dot_dimension_numbers<[1], [0], [0], [1], [0, 0, 1, 1], [], []>} : vector<16x128xf32>, vector<128x128xf32>, vector<16x128xf32> -> vector<16x128xf32>
    %118 = arith.addf %116, %117 : vector<16x128xf32>
    %c48_139 = arith.constant 48 : index
    %c0_140 = arith.constant 0 : index
    %119 = vector.load %arg8[%c48_139, %c0_140] : memref<64x128xf32, #tpu.memory_space<vmem>>, vector<16x128xf32>
    tpu.vector_store %arg8[%c48_139, %c0_140], %118 {strides = array<i32>} : memref<64x128xf32, #tpu.memory_space<vmem>>, vector<16x128xf32>,
    %c9 = arith.constant 9 : index
    %c0_141 = arith.constant 0 : index
    %c0_142 = arith.constant 0 : index
    %120 = vector.load %arg5[%c9, %c0_141, %c0_142] : memref<16x128x128xf32, #tpu.memory_space<vmem>>, vector<1x128x128xf32>
    %121 = vector.shape_cast %120 : vector<1x128x128xf32> to vector<128x128xf32>
    %c0_143 = arith.constant 0 : index
    %c0_144 = arith.constant 0 : index
    %122 = vector.load %arg8[%c0_143, %c0_144] : memref<64x128xf32, #tpu.memory_space<vmem>>, vector<48x128xf32>
    %123 = vector.extract_strided_slice %5 {offsets = [16, 0], sizes = [48, 128], strides = [1, 1]} : vector<64x128xf32> to vector<48x128xf32>
    %cst_145 = arith.constant dense<0.000000e+00> : vector<48x128xf32>
    %124 = tpu.matmul %123, %121, %cst_145 {dimension_numbers = #tpu.dot_dimension_numbers<[1], [0], [0], [1], [0, 0, 1, 1], [], []>} : vector<48x128xf32>, vector<128x128xf32>, vector<48x128xf32> -> vector<48x128xf32>
    %125 = arith.addf %122, %124 : vector<48x128xf32>
    %c0_146 = arith.constant 0 : index
    %c0_147 = arith.constant 0 : index
    %126 = vector.load %arg8[%c0_146, %c0_147] : memref<64x128xf32, #tpu.memory_space<vmem>>, vector<48x128xf32>
    tpu.vector_store %arg8[%c0_146, %c0_147], %125 {strides = array<i32>} : memref<64x128xf32, #tpu.memory_space<vmem>>, vector<48x128xf32>,
    %c48_148 = arith.constant 48 : index
    %c0_149 = arith.constant 0 : index
    %127 = vector.load %arg8[%c48_148, %c0_149] : memref<64x128xf32, #tpu.memory_space<vmem>>, vector<16x128xf32>
    %cst_150 = arith.constant dense<0.000000e+00> : vector<16x128xf32>
    %128 = tpu.matmul %12, %121, %cst_150 {dimension_numbers = #tpu.dot_dimension_numbers<[1], [0], [0], [1], [0, 0, 1, 1], [], []>} : vector<16x128xf32>, vector<128x128xf32>, vector<16x128xf32> -> vector<16x128xf32>
    %129 = arith.addf %127, %128 : vector<16x128xf32>
    %c48_151 = arith.constant 48 : index
    %c0_152 = arith.constant 0 : index
    %130 = vector.load %arg8[%c48_151, %c0_152] : memref<64x128xf32, #tpu.memory_space<vmem>>, vector<16x128xf32>
    tpu.vector_store %arg8[%c48_151, %c0_152], %129 {strides = array<i32>} : memref<64x128xf32, #tpu.memory_space<vmem>>, vector<16x128xf32>,
    %c10 = arith.constant 10 : index
    %c0_153 = arith.constant 0 : index
    %c0_154 = arith.constant 0 : index
    %131 = vector.load %arg5[%c10, %c0_153, %c0_154] : memref<16x128x128xf32, #tpu.memory_space<vmem>>, vector<1x128x128xf32>
    %132 = vector.shape_cast %131 : vector<1x128x128xf32> to vector<128x128xf32>
    %c0_155 = arith.constant 0 : index
    %c0_156 = arith.constant 0 : index
    %133 = vector.load %arg8[%c0_155, %c0_156] : memref<64x128xf32, #tpu.memory_space<vmem>>, vector<32x128xf32>
    %134 = vector.extract_strided_slice %2 {offsets = [32, 0], sizes = [32, 128], strides = [1, 1]} : vector<64x128xf32> to vector<32x128xf32>
    %cst_157 = arith.constant dense<0.000000e+00> : vector<32x128xf32>
    %135 = tpu.matmul %134, %132, %cst_157 {dimension_numbers = #tpu.dot_dimension_numbers<[1], [0], [0], [1], [0, 0, 1, 1], [], []>} : vector<32x128xf32>, vector<128x128xf32>, vector<32x128xf32> -> vector<32x128xf32>
    %136 = arith.addf %133, %135 : vector<32x128xf32>
    %c0_158 = arith.constant 0 : index
    %c0_159 = arith.constant 0 : index
    %137 = vector.load %arg8[%c0_158, %c0_159] : memref<64x128xf32, #tpu.memory_space<vmem>>, vector<32x128xf32>
    tpu.vector_store %arg8[%c0_158, %c0_159], %136 {strides = array<i32>} : memref<64x128xf32, #tpu.memory_space<vmem>>, vector<32x128xf32>,
    %c32 = arith.constant 32 : index
    %c0_160 = arith.constant 0 : index
    %138 = vector.load %arg8[%c32, %c0_160] : memref<64x128xf32, #tpu.memory_space<vmem>>, vector<16x128xf32>
    %cst_161 = arith.constant dense<0.000000e+00> : vector<16x128xf32>
    %139 = tpu.matmul %10, %132, %cst_161 {dimension_numbers = #tpu.dot_dimension_numbers<[1], [0], [0], [1], [0, 0, 1, 1], [], []>} : vector<16x128xf32>, vector<128x128xf32>, vector<16x128xf32> -> vector<16x128xf32>
    %140 = arith.addf %138, %139 : vector<16x128xf32>
    %c32_162 = arith.constant 32 : index
    %c0_163 = arith.constant 0 : index
    %141 = vector.load %arg8[%c32_162, %c0_163] : memref<64x128xf32, #tpu.memory_space<vmem>>, vector<16x128xf32>
    tpu.vector_store %arg8[%c32_162, %c0_163], %140 {strides = array<i32>} : memref<64x128xf32, #tpu.memory_space<vmem>>, vector<16x128xf32>,
    %c48_164 = arith.constant 48 : index
    %c0_165 = arith.constant 0 : index
    %142 = vector.load %arg8[%c48_164, %c0_165] : memref<64x128xf32, #tpu.memory_space<vmem>>, vector<16x128xf32>
    %cst_166 = arith.constant dense<0.000000e+00> : vector<16x128xf32>
    %143 = tpu.matmul %16, %132, %cst_166 {dimension_numbers = #tpu.dot_dimension_numbers<[1], [0], [0], [1], [0, 0, 1, 1], [], []>} : vector<16x128xf32>, vector<128x128xf32>, vector<16x128xf32> -> vector<16x128xf32>
    %144 = arith.addf %142, %143 : vector<16x128xf32>
    %c48_167 = arith.constant 48 : index
    %c0_168 = arith.constant 0 : index
    %145 = vector.load %arg8[%c48_167, %c0_168] : memref<64x128xf32, #tpu.memory_space<vmem>>, vector<16x128xf32>
    tpu.vector_store %arg8[%c48_167, %c0_168], %144 {strides = array<i32>} : memref<64x128xf32, #tpu.memory_space<vmem>>, vector<16x128xf32>,
    %c11 = arith.constant 11 : index
    %c0_169 = arith.constant 0 : index
    %c0_170 = arith.constant 0 : index
    %146 = vector.load %arg5[%c11, %c0_169, %c0_170] : memref<16x128x128xf32, #tpu.memory_space<vmem>>, vector<1x128x128xf32>
    %147 = vector.shape_cast %146 : vector<1x128x128xf32> to vector<128x128xf32>
    %c0_171 = arith.constant 0 : index
    %c0_172 = arith.constant 0 : index
    %148 = vector.load %arg8[%c0_171, %c0_172] : memref<64x128xf32, #tpu.memory_space<vmem>>, vector<32x128xf32>
    %149 = vector.extract_strided_slice %5 {offsets = [32, 0], sizes = [32, 128], strides = [1, 1]} : vector<64x128xf32> to vector<32x128xf32>
    %cst_173 = arith.constant dense<0.000000e+00> : vector<32x128xf32>
    %150 = tpu.matmul %149, %147, %cst_173 {dimension_numbers = #tpu.dot_dimension_numbers<[1], [0], [0], [1], [0, 0, 1, 1], [], []>} : vector<32x128xf32>, vector<128x128xf32>, vector<32x128xf32> -> vector<32x128xf32>
    %151 = arith.addf %148, %150 : vector<32x128xf32>
    %c0_174 = arith.constant 0 : index
    %c0_175 = arith.constant 0 : index
    %152 = vector.load %arg8[%c0_174, %c0_175] : memref<64x128xf32, #tpu.memory_space<vmem>>, vector<32x128xf32>
    tpu.vector_store %arg8[%c0_174, %c0_175], %151 {strides = array<i32>} : memref<64x128xf32, #tpu.memory_space<vmem>>, vector<32x128xf32>,
    %c32_176 = arith.constant 32 : index
    %c0_177 = arith.constant 0 : index
    %153 = vector.load %arg8[%c32_176, %c0_177] : memref<64x128xf32, #tpu.memory_space<vmem>>, vector<16x128xf32>
    %cst_178 = arith.constant dense<0.000000e+00> : vector<16x128xf32>
    %154 = tpu.matmul %12, %147, %cst_178 {dimension_numbers = #tpu.dot_dimension_numbers<[1], [0], [0], [1], [0, 0, 1, 1], [], []>} : vector<16x128xf32>, vector<128x128xf32>, vector<16x128xf32> -> vector<16x128xf32>
    %155 = arith.addf %153, %154 : vector<16x128xf32>
    %c32_179 = arith.constant 32 : index
    %c0_180 = arith.constant 0 : index
    %156 = vector.load %arg8[%c32_179, %c0_180] : memref<64x128xf32, #tpu.memory_space<vmem>>, vector<16x128xf32>
    tpu.vector_store %arg8[%c32_179, %c0_180], %155 {strides = array<i32>} : memref<64x128xf32, #tpu.memory_space<vmem>>, vector<16x128xf32>,
    %c48_181 = arith.constant 48 : index
    %c0_182 = arith.constant 0 : index
    %157 = vector.load %arg8[%c48_181, %c0_182] : memref<64x128xf32, #tpu.memory_space<vmem>>, vector<16x128xf32>
    %cst_183 = arith.constant dense<0.000000e+00> : vector<16x128xf32>
    %158 = tpu.matmul %18, %147, %cst_183 {dimension_numbers = #tpu.dot_dimension_numbers<[1], [0], [0], [1], [0, 0, 1, 1], [], []>} : vector<16x128xf32>, vector<128x128xf32>, vector<16x128xf32> -> vector<16x128xf32>
    %159 = arith.addf %157, %158 : vector<16x128xf32>
    %c48_184 = arith.constant 48 : index
    %c0_185 = arith.constant 0 : index
    %160 = vector.load %arg8[%c48_184, %c0_185] : memref<64x128xf32, #tpu.memory_space<vmem>>, vector<16x128xf32>
    tpu.vector_store %arg8[%c48_184, %c0_185], %159 {strides = array<i32>} : memref<64x128xf32, #tpu.memory_space<vmem>>, vector<16x128xf32>,
    %c0_186 = arith.constant 0 : index
    %c0_187 = arith.constant 0 : index
    %161 = vector.load %arg8[%c0_186, %c0_187] : memref<64x128xf32, #tpu.memory_space<vmem>>, vector<64x128xf32>
    %162 = vector.shape_cast %161 : vector<64x128xf32> to vector<4x16x128xf32>
    %c0_188 = arith.constant 0 : index
    %c1_189 = arith.constant 1 : index
    %c0_190 = arith.constant 0 : index
    %c0_191 = arith.constant 0 : index
    %163 = vector.load %arg7[%c0_188, %c1_189, %c0_190, %c0_191] : memref<4x2x16x256xf32, #tpu.memory_space<vmem>>, vector<4x1x16x128xf32>
    %164 = vector.shape_cast %163 : vector<4x1x16x128xf32> to vector<4x16x128xf32>
    %165 = vector.shape_cast %162 : vector<4x16x128xf32> to vector<4x1x16x128xf32>
    tpu.vector_store %arg7[%c0_188, %c1_189, %c0_190, %c0_191], %165 {strides = array<i32>} : memref<4x2x16x256xf32, #tpu.memory_space<vmem>>, vector<4x1x16x128xf32>,
    %166 = vector.shape_cast %21 : vector<1x128xf32> to vector<1x128xf32>
    %167 = vector.broadcast %166 : vector<1x128xf32> to vector<64x128xf32>
    %c0_192 = arith.constant 0 : index
    %c0_193 = arith.constant 0 : index
    %168 = vector.load %arg8[%c0_192, %c0_193] : memref<64x128xf32, #tpu.memory_space<vmem>>, vector<64x128xf32>
    tpu.vector_store %arg8[%c0_192, %c0_193], %167 {strides = array<i32>} : memref<64x128xf32, #tpu.memory_space<vmem>>, vector<64x128xf32>,
    %c12 = arith.constant 12 : index
    %c0_194 = arith.constant 0 : index
    %c0_195 = arith.constant 0 : index
    %169 = vector.load %arg5[%c12, %c0_194, %c0_195] : memref<16x128x128xf32, #tpu.memory_space<vmem>>, vector<1x128x128xf32>
    %170 = vector.shape_cast %169 : vector<1x128x128xf32> to vector<128x128xf32>
    %c0_196 = arith.constant 0 : index
    %c0_197 = arith.constant 0 : index
    %171 = vector.load %arg8[%c0_196, %c0_197] : memref<64x128xf32, #tpu.memory_space<vmem>>, vector<48x128xf32>
    %172 = vector.extract_strided_slice %5 {offsets = [16, 0], sizes = [48, 128], strides = [1, 1]} : vector<64x128xf32> to vector<48x128xf32>
    %cst_198 = arith.constant dense<0.000000e+00> : vector<48x128xf32>
    %173 = tpu.matmul %172, %170, %cst_198 {dimension_numbers = #tpu.dot_dimension_numbers<[1], [0], [0], [1], [0, 0, 1, 1], [], []>} : vector<48x128xf32>, vector<128x128xf32>, vector<48x128xf32> -> vector<48x128xf32>
    %174 = arith.addf %171, %173 : vector<48x128xf32>
    %c0_199 = arith.constant 0 : index
    %c0_200 = arith.constant 0 : index
    %175 = vector.load %arg8[%c0_199, %c0_200] : memref<64x128xf32, #tpu.memory_space<vmem>>, vector<48x128xf32>
    tpu.vector_store %arg8[%c0_199, %c0_200], %174 {strides = array<i32>} : memref<64x128xf32, #tpu.memory_space<vmem>>, vector<48x128xf32>,
    %c48_201 = arith.constant 48 : index
    %c0_202 = arith.constant 0 : index
    %176 = vector.load %arg8[%c48_201, %c0_202] : memref<64x128xf32, #tpu.memory_space<vmem>>, vector<16x128xf32>
    %cst_203 = arith.constant dense<0.000000e+00> : vector<16x128xf32>
    %177 = tpu.matmul %12, %170, %cst_203 {dimension_numbers = #tpu.dot_dimension_numbers<[1], [0], [0], [1], [0, 0, 1, 1], [], []>} : vector<16x128xf32>, vector<128x128xf32>, vector<16x128xf32> -> vector<16x128xf32>
    %178 = arith.addf %176, %177 : vector<16x128xf32>
    %c48_204 = arith.constant 48 : index
    %c0_205 = arith.constant 0 : index
    %179 = vector.load %arg8[%c48_204, %c0_205] : memref<64x128xf32, #tpu.memory_space<vmem>>, vector<16x128xf32>
    tpu.vector_store %arg8[%c48_204, %c0_205], %178 {strides = array<i32>} : memref<64x128xf32, #tpu.memory_space<vmem>>, vector<16x128xf32>,
    %c13 = arith.constant 13 : index
    %c0_206 = arith.constant 0 : index
    %c0_207 = arith.constant 0 : index
    %180 = vector.load %arg5[%c13, %c0_206, %c0_207] : memref<16x128x128xf32, #tpu.memory_space<vmem>>, vector<1x128x128xf32>
    %181 = vector.shape_cast %180 : vector<1x128x128xf32> to vector<128x128xf32>
    %c0_208 = arith.constant 0 : index
    %c0_209 = arith.constant 0 : index
    %182 = vector.load %arg8[%c0_208, %c0_209] : memref<64x128xf32, #tpu.memory_space<vmem>>, vector<48x128xf32>
    %183 = vector.extract_strided_slice %8 {offsets = [16, 0], sizes = [48, 128], strides = [1, 1]} : vector<64x128xf32> to vector<48x128xf32>
    %cst_210 = arith.constant dense<0.000000e+00> : vector<48x128xf32>
    %184 = tpu.matmul %183, %181, %cst_210 {dimension_numbers = #tpu.dot_dimension_numbers<[1], [0], [0], [1], [0, 0, 1, 1], [], []>} : vector<48x128xf32>, vector<128x128xf32>, vector<48x128xf32> -> vector<48x128xf32>
    %185 = arith.addf %182, %184 : vector<48x128xf32>
    %c0_211 = arith.constant 0 : index
    %c0_212 = arith.constant 0 : index
    %186 = vector.load %arg8[%c0_211, %c0_212] : memref<64x128xf32, #tpu.memory_space<vmem>>, vector<48x128xf32>
    tpu.vector_store %arg8[%c0_211, %c0_212], %185 {strides = array<i32>} : memref<64x128xf32, #tpu.memory_space<vmem>>, vector<48x128xf32>,
    %c48_213 = arith.constant 48 : index
    %c0_214 = arith.constant 0 : index
    %187 = vector.load %arg8[%c48_213, %c0_214] : memref<64x128xf32, #tpu.memory_space<vmem>>, vector<16x128xf32>
    %cst_215 = arith.constant dense<0.000000e+00> : vector<16x128xf32>
    %188 = tpu.matmul %14, %181, %cst_215 {dimension_numbers = #tpu.dot_dimension_numbers<[1], [0], [0], [1], [0, 0, 1, 1], [], []>} : vector<16x128xf32>, vector<128x128xf32>, vector<16x128xf32> -> vector<16x128xf32>
    %189 = arith.addf %187, %188 : vector<16x128xf32>
    %c48_216 = arith.constant 48 : index
    %c0_217 = arith.constant 0 : index
    %190 = vector.load %arg8[%c48_216, %c0_217] : memref<64x128xf32, #tpu.memory_space<vmem>>, vector<16x128xf32>
    tpu.vector_store %arg8[%c48_216, %c0_217], %189 {strides = array<i32>} : memref<64x128xf32, #tpu.memory_space<vmem>>, vector<16x128xf32>,
    %c14 = arith.constant 14 : index
    %c0_218 = arith.constant 0 : index
    %c0_219 = arith.constant 0 : index
    %191 = vector.load %arg5[%c14, %c0_218, %c0_219] : memref<16x128x128xf32, #tpu.memory_space<vmem>>, vector<1x128x128xf32>
    %192 = vector.shape_cast %191 : vector<1x128x128xf32> to vector<128x128xf32>
    %c0_220 = arith.constant 0 : index
    %c0_221 = arith.constant 0 : index
    %193 = vector.load %arg8[%c0_220, %c0_221] : memref<64x128xf32, #tpu.memory_space<vmem>>, vector<32x128xf32>
    %194 = vector.extract_strided_slice %5 {offsets = [32, 0], sizes = [32, 128], strides = [1, 1]} : vector<64x128xf32> to vector<32x128xf32>
    %cst_222 = arith.constant dense<0.000000e+00> : vector<32x128xf32>
    %195 = tpu.matmul %194, %192, %cst_222 {dimension_numbers = #tpu.dot_dimension_numbers<[1], [0], [0], [1], [0, 0, 1, 1], [], []>} : vector<32x128xf32>, vector<128x128xf32>, vector<32x128xf32> -> vector<32x128xf32>
    %196 = arith.addf %193, %195 : vector<32x128xf32>
    %c0_223 = arith.constant 0 : index
    %c0_224 = arith.constant 0 : index
    %197 = vector.load %arg8[%c0_223, %c0_224] : memref<64x128xf32, #tpu.memory_space<vmem>>, vector<32x128xf32>
    tpu.vector_store %arg8[%c0_223, %c0_224], %196 {strides = array<i32>} : memref<64x128xf32, #tpu.memory_space<vmem>>, vector<32x128xf32>,
    %c32_225 = arith.constant 32 : index
    %c0_226 = arith.constant 0 : index
    %198 = vector.load %arg8[%c32_225, %c0_226] : memref<64x128xf32, #tpu.memory_space<vmem>>, vector<16x128xf32>
    %cst_227 = arith.constant dense<0.000000e+00> : vector<16x128xf32>
    %199 = tpu.matmul %12, %192, %cst_227 {dimension_numbers = #tpu.dot_dimension_numbers<[1], [0], [0], [1], [0, 0, 1, 1], [], []>} : vector<16x128xf32>, vector<128x128xf32>, vector<16x128xf32> -> vector<16x128xf32>
    %200 = arith.addf %198, %199 : vector<16x128xf32>
    %c32_228 = arith.constant 32 : index
    %c0_229 = arith.constant 0 : index
    %201 = vector.load %arg8[%c32_228, %c0_229] : memref<64x128xf32, #tpu.memory_space<vmem>>, vector<16x128xf32>
    tpu.vector_store %arg8[%c32_228, %c0_229], %200 {strides = array<i32>} : memref<64x128xf32, #tpu.memory_space<vmem>>, vector<16x128xf32>,
    %c48_230 = arith.constant 48 : index
    %c0_231 = arith.constant 0 : index
    %202 = vector.load %arg8[%c48_230, %c0_231] : memref<64x128xf32, #tpu.memory_space<vmem>>, vector<16x128xf32>
    %cst_232 = arith.constant dense<0.000000e+00> : vector<16x128xf32>
    %203 = tpu.matmul %18, %192, %cst_232 {dimension_numbers = #tpu.dot_dimension_numbers<[1], [0], [0], [1], [0, 0, 1, 1], [], []>} : vector<16x128xf32>, vector<128x128xf32>, vector<16x128xf32> -> vector<16x128xf32>
    %204 = arith.addf %202, %203 : vector<16x128xf32>
    %c48_233 = arith.constant 48 : index
    %c0_234 = arith.constant 0 : index
    %205 = vector.load %arg8[%c48_233, %c0_234] : memref<64x128xf32, #tpu.memory_space<vmem>>, vector<16x128xf32>
    tpu.vector_store %arg8[%c48_233, %c0_234], %204 {strides = array<i32>} : memref<64x128xf32, #tpu.memory_space<vmem>>, vector<16x128xf32>,
    %c15 = arith.constant 15 : index
    %c0_235 = arith.constant 0 : index
    %c0_236 = arith.constant 0 : index
    %206 = vector.load %arg5[%c15, %c0_235, %c0_236] : memref<16x128x128xf32, #tpu.memory_space<vmem>>, vector<1x128x128xf32>
    %207 = vector.shape_cast %206 : vector<1x128x128xf32> to vector<128x128xf32>
    %c0_237 = arith.constant 0 : index
    %c0_238 = arith.constant 0 : index
    %208 = vector.load %arg8[%c0_237, %c0_238] : memref<64x128xf32, #tpu.memory_space<vmem>>, vector<32x128xf32>
    %209 = vector.extract_strided_slice %8 {offsets = [32, 0], sizes = [32, 128], strides = [1, 1]} : vector<64x128xf32> to vector<32x128xf32>
    %cst_239 = arith.constant dense<0.000000e+00> : vector<32x128xf32>
    %210 = tpu.matmul %209, %207, %cst_239 {dimension_numbers = #tpu.dot_dimension_numbers<[1], [0], [0], [1], [0, 0, 1, 1], [], []>} : vector<32x128xf32>, vector<128x128xf32>, vector<32x128xf32> -> vector<32x128xf32>
    %211 = arith.addf %208, %210 : vector<32x128xf32>
    %c0_240 = arith.constant 0 : index
    %c0_241 = arith.constant 0 : index
    %212 = vector.load %arg8[%c0_240, %c0_241] : memref<64x128xf32, #tpu.memory_space<vmem>>, vector<32x128xf32>
    tpu.vector_store %arg8[%c0_240, %c0_241], %211 {strides = array<i32>} : memref<64x128xf32, #tpu.memory_space<vmem>>, vector<32x128xf32>,
    %c32_242 = arith.constant 32 : index
    %c0_243 = arith.constant 0 : index
    %213 = vector.load %arg8[%c32_242, %c0_243] : memref<64x128xf32, #tpu.memory_space<vmem>>, vector<16x128xf32>
    %cst_244 = arith.constant dense<0.000000e+00> : vector<16x128xf32>
    %214 = tpu.matmul %14, %207, %cst_244 {dimension_numbers = #tpu.dot_dimension_numbers<[1], [0], [0], [1], [0, 0, 1, 1], [], []>} : vector<16x128xf32>, vector<128x128xf32>, vector<16x128xf32> -> vector<16x128xf32>
    %215 = arith.addf %213, %214 : vector<16x128xf32>
    %c32_245 = arith.constant 32 : index
    %c0_246 = arith.constant 0 : index
    %216 = vector.load %arg8[%c32_245, %c0_246] : memref<64x128xf32, #tpu.memory_space<vmem>>, vector<16x128xf32>
    tpu.vector_store %arg8[%c32_245, %c0_246], %215 {strides = array<i32>} : memref<64x128xf32, #tpu.memory_space<vmem>>, vector<16x128xf32>,
    %c48_247 = arith.constant 48 : index
    %c0_248 = arith.constant 0 : index
    %217 = vector.load %arg8[%c48_247, %c0_248] : memref<64x128xf32, #tpu.memory_space<vmem>>, vector<16x128xf32>
    %cst_249 = arith.constant dense<0.000000e+00> : vector<16x128xf32>
    %218 = tpu.matmul %20, %207, %cst_249 {dimension_numbers = #tpu.dot_dimension_numbers<[1], [0], [0], [1], [0, 0, 1, 1], [], []>} : vector<16x128xf32>, vector<128x128xf32>, vector<16x128xf32> -> vector<16x128xf32>
    %219 = arith.addf %217, %218 : vector<16x128xf32>
    %c48_250 = arith.constant 48 : index
    %c0_251 = arith.constant 0 : index
    %220 = vector.load %arg8[%c48_250, %c0_251] : memref<64x128xf32, #tpu.memory_space<vmem>>, vector<16x128xf32>
    tpu.vector_store %arg8[%c48_250, %c0_251], %219 {strides = array<i32>} : memref<64x128xf32, #tpu.memory_space<vmem>>, vector<16x128xf32>,
    %c0_252 = arith.constant 0 : index
    %c0_253 = arith.constant 0 : index
    %221 = vector.load %arg8[%c0_252, %c0_253] : memref<64x128xf32, #tpu.memory_space<vmem>>, vector<64x128xf32>
    %222 = vector.shape_cast %221 : vector<64x128xf32> to vector<4x16x128xf32>
    %c0_254 = arith.constant 0 : index
    %c1_255 = arith.constant 1 : index
    %c0_256 = arith.constant 0 : index
    %c128_257 = arith.constant 128 : index
    %223 = vector.load %arg7[%c0_254, %c1_255, %c0_256, %c128_257] : memref<4x2x16x256xf32, #tpu.memory_space<vmem>>, vector<4x1x16x128xf32>
    %224 = vector.shape_cast %223 : vector<4x1x16x128xf32> to vector<4x16x128xf32>
    %225 = vector.shape_cast %222 : vector<4x16x128xf32> to vector<4x1x16x128xf32>
    tpu.vector_store %arg7[%c0_254, %c1_255, %c0_256, %c128_257], %225 {strides = array<i32>} : memref<4x2x16x256xf32, #tpu.memory_space<vmem>>, vector<4x1x16x128xf32>,
    return
  }
  func.func @transform_0(%arg0: i32, %arg1: i32) -> (i32, i32, i32, i32) {
    %c0_i32 = arith.constant 0 : i32
    %c0_i32_0 = arith.constant 0 : i32
    %c0_i32_1 = arith.constant 0 : i32
    return %arg0, %arg1, %c0_i32, %c0_i32_0 : i32, i32, i32, i32
  }
  func.func @transform_1(%arg0: i32, %arg1: i32) -> (i32, i32, i32, i32) {
    %c1_i32 = arith.constant 1 : i32
    %0 = arith.addi %arg1, %c1_i32 : i32
    %c4_i32 = arith.constant 4 : i32
    %1 = arith.muli %0, %c4_i32 : i32
    %c0_i32 = arith.constant 0 : i32
    %c0_i32_0 = arith.constant 0 : i32
    %c0_i32_1 = arith.constant 0 : i32
    return %arg0, %1, %c0_i32, %c0_i32_0 : i32, i32, i32, i32
  }
  func.func @transform_2(%arg0: i32, %arg1: i32) -> (i32, i32, i32, i32) {
    %c1_i32 = arith.constant 1 : i32
    %0 = arith.addi %arg1, %c1_i32 : i32
    %c4_i32 = arith.constant 4 : i32
    %1 = arith.muli %0, %c4_i32 : i32
    %c1_i32_0 = arith.constant 1 : i32
    %2 = arith.addi %1, %c1_i32_0 : i32
    %c0_i32 = arith.constant 0 : i32
    %c0_i32_1 = arith.constant 0 : i32
    %c0_i32_2 = arith.constant 0 : i32
    return %arg0, %2, %c0_i32, %c0_i32_1 : i32, i32, i32, i32
  }
  func.func @transform_3(%arg0: i32, %arg1: i32) -> (i32, i32, i32) {
    %c0_i32 = arith.constant 0 : i32
    %c0_i32_0 = arith.constant 0 : i32
    %c0_i32_1 = arith.constant 0 : i32
    %c0_i32_2 = arith.constant 0 : i32
    return %c0_i32, %c0_i32_0, %c0_i32_1 : i32, i32, i32
  }
  func.func @transform_4(%arg0: i32, %arg1: i32) -> (i32, i32) {
    %c0_i32 = arith.constant 0 : i32
    %c0_i32_0 = arith.constant 0 : i32
    %c0_i32_1 = arith.constant 0 : i32
    return %c0_i32, %c0_i32_0 : i32, i32
  }
  func.func @transform_5(%arg0: i32, %arg1: i32) -> (i32, i32, i32, i32) {
    %c4_i32 = arith.constant 4 : i32
    %0 = arith.muli %arg0, %c4_i32 : i32
    %1 = arith.addi %0, %arg1 : i32
    %c0_i32 = arith.constant 0 : i32
    %c0_i32_0 = arith.constant 0 : i32
    %c0_i32_1 = arith.constant 0 : i32
    %c0_i32_2 = arith.constant 0 : i32
    return %1, %c0_i32, %c0_i32_0, %c0_i32_1 : i32, i32, i32, i32
  }
}

module attributes {stable_mosaic.version = 11 : i64} {
  func.func @_upsample_conv_kernel(%arg0: i32, %arg1: i32, %arg2: memref<1x4x18x128xf32, #tpu.memory_space<vmem>>, %arg3: memref<1x1x18x128xf32, #tpu.memory_space<vmem>>, %arg4: memref<1x1x18x128xf32, #tpu.memory_space<vmem>>, %arg5: memref<16x128x128xf32, #tpu.memory_space<vmem>>, %arg6: memref<1x128xf32, #tpu.memory_space<vmem>>, %arg7: memref<4x2x16x256xf32, #tpu.memory_space<vmem>>, %arg8: memref<64x128xf32, #tpu.memory_space<vmem>>) attributes {dimension_semantics = [#tpu.dimension_semantics<parallel>, #tpu.dimension_semantics<parallel>], iteration_bounds = array<i64: 2, 4>, scalar_prefetch = 0 : i64, scratch_operands = 1 : i64, tpu.core_type = #tpu.core_type<tc>, window_params = [{transform_indices = @transform_0, window_bounds = array<i64: 1, 4, 18, 128>}, {transform_indices = @transform_1, window_bounds = array<i64: 1, 1, 18, 128>}, {transform_indices = @transform_2, window_bounds = array<i64: 1, 1, 18, 128>}, {pipeline_mode = #tpu.pipeline_mode<synchronous>, transform_indices = @transform_3, window_bounds = array<i64: 16, 128, 128>}, {pipeline_mode = #tpu.pipeline_mode<synchronous>, transform_indices = @transform_4, window_bounds = array<i64: 1, 128>}, {transform_indices = @transform_5, window_bounds = array<i64: 4, 2, 16, 256>}]} {
    %c0 = arith.constant 0 : index
    %c0_0 = arith.constant 0 : index
    %c0_1 = arith.constant 0 : index
    %c0_2 = arith.constant 0 : index
    %0 = vector.load %arg2[%c0, %c0_0, %c0_1, %c0_2] : memref<1x4x18x128xf32, #tpu.memory_space<vmem>>, vector<1x4x16x128xf32>
    %1 = vector.shape_cast %0 : vector<1x4x16x128xf32> to vector<4x16x128xf32>
    %2 = vector.shape_cast %1 : vector<4x16x128xf32> to vector<64x128xf32>
    %c0_3 = arith.constant 0 : index
    %c0_4 = arith.constant 0 : index
    %c1 = arith.constant 1 : index
    %c0_5 = arith.constant 0 : index
    %3 = vector.load %arg2[%c0_3, %c0_4, %c1, %c0_5] : memref<1x4x18x128xf32, #tpu.memory_space<vmem>>, vector<1x4x16x128xf32>
    %4 = vector.shape_cast %3 : vector<1x4x16x128xf32> to vector<4x16x128xf32>
    %5 = vector.shape_cast %4 : vector<4x16x128xf32> to vector<64x128xf32>
    %c0_6 = arith.constant 0 : index
    %c0_7 = arith.constant 0 : index
    %c2 = arith.constant 2 : index
    %c0_8 = arith.constant 0 : index
    %6 = vector.load %arg2[%c0_6, %c0_7, %c2, %c0_8] : memref<1x4x18x128xf32, #tpu.memory_space<vmem>>, vector<1x4x16x128xf32>
    %7 = vector.shape_cast %6 : vector<1x4x16x128xf32> to vector<4x16x128xf32>
    %8 = vector.shape_cast %7 : vector<4x16x128xf32> to vector<64x128xf32>
    %c0_9 = arith.constant 0 : index
    %c0_10 = arith.constant 0 : index
    %c0_11 = arith.constant 0 : index
    %c0_12 = arith.constant 0 : index
    %9 = vector.load %arg3[%c0_9, %c0_10, %c0_11, %c0_12] : memref<1x1x18x128xf32, #tpu.memory_space<vmem>>, vector<1x1x16x128xf32>
    %10 = vector.shape_cast %9 : vector<1x1x16x128xf32> to vector<16x128xf32>
    %c0_13 = arith.constant 0 : index
    %c0_14 = arith.constant 0 : index
    %c1_15 = arith.constant 1 : index
    %c0_16 = arith.constant 0 : index
    %11 = vector.load %arg3[%c0_13, %c0_14, %c1_15, %c0_16] : memref<1x1x18x128xf32, #tpu.memory_space<vmem>>, vector<1x1x16x128xf32>
    %12 = vector.shape_cast %11 : vector<1x1x16x128xf32> to vector<16x128xf32>
    %c0_17 = arith.constant 0 : index
    %c0_18 = arith.constant 0 : index
    %c2_19 = arith.constant 2 : index
    %c0_20 = arith.constant 0 : index
    %13 = vector.load %arg3[%c0_17, %c0_18, %c2_19, %c0_20] : memref<1x1x18x128xf32, #tpu.memory_space<vmem>>, vector<1x1x16x128xf32>
    %14 = vector.shape_cast %13 : vector<1x1x16x128xf32> to vector<16x128xf32>
    %c0_21 = arith.constant 0 : index
    %c0_22 = arith.constant 0 : index
    %c0_23 = arith.constant 0 : index
    %c0_24 = arith.constant 0 : index
    %15 = vector.load %arg4[%c0_21, %c0_22, %c0_23, %c0_24] : memref<1x1x18x128xf32, #tpu.memory_space<vmem>>, vector<1x1x16x128xf32>
    %16 = vector.shape_cast %15 : vector<1x1x16x128xf32> to vector<16x128xf32>
    %c0_25 = arith.constant 0 : index
    %c0_26 = arith.constant 0 : index
    %c1_27 = arith.constant 1 : index
    %c0_28 = arith.constant 0 : index
    %17 = vector.load %arg4[%c0_25, %c0_26, %c1_27, %c0_28] : memref<1x1x18x128xf32, #tpu.memory_space<vmem>>, vector<1x1x16x128xf32>
    %18 = vector.shape_cast %17 : vector<1x1x16x128xf32> to vector<16x128xf32>
    %c0_29 = arith.constant 0 : index
    %c0_30 = arith.constant 0 : index
    %c2_31 = arith.constant 2 : index
    %c0_32 = arith.constant 0 : index
    %19 = vector.load %arg4[%c0_29, %c0_30, %c2_31, %c0_32] : memref<1x1x18x128xf32, #tpu.memory_space<vmem>>, vector<1x1x16x128xf32>
    %20 = vector.shape_cast %19 : vector<1x1x16x128xf32> to vector<16x128xf32>
    %c0_33 = arith.constant 0 : index
    %c0_34 = arith.constant 0 : index
    %21 = vector.load %arg6[%c0_33, %c0_34] : memref<1x128xf32, #tpu.memory_space<vmem>>, vector<1x128xf32>
    %22 = vector.shape_cast %21 : vector<1x128xf32> to vector<1x128xf32>
    %23 = vector.broadcast %22 : vector<1x128xf32> to vector<64x128xf32>
    %c0_35 = arith.constant 0 : index
    %c0_36 = arith.constant 0 : index
    %24 = vector.load %arg8[%c0_35, %c0_36] : memref<64x128xf32, #tpu.memory_space<vmem>>, vector<64x128xf32>
    tpu.vector_store %arg8[%c0_35, %c0_36], %23 {strides = array<i32>} : memref<64x128xf32, #tpu.memory_space<vmem>>, vector<64x128xf32>,
    %c0_37 = arith.constant 0 : index
    %c0_38 = arith.constant 0 : index
    %c0_39 = arith.constant 0 : index
    %25 = vector.load %arg5[%c0_37, %c0_38, %c0_39] : memref<16x128x128xf32, #tpu.memory_space<vmem>>, vector<1x128x128xf32>
    %26 = vector.shape_cast %25 : vector<1x128x128xf32> to vector<128x128xf32>
    %c0_40 = arith.constant 0 : index
    %c0_41 = arith.constant 0 : index
    %27 = vector.load %arg8[%c0_40, %c0_41] : memref<64x128xf32, #tpu.memory_space<vmem>>, vector<64x128xf32>
    %cst = arith.constant dense<0.000000e+00> : vector<64x128xf32>
    %28 = tpu.matmul %2, %26, %cst {dimension_numbers = #tpu.dot_dimension_numbers<[1], [0], [0], [1], [0, 0, 1, 1], [], []>} : vector<64x128xf32>, vector<128x128xf32>, vector<64x128xf32> -> vector<64x128xf32>
    %29 = arith.addf %27, %28 : vector<64x128xf32>
    %c0_42 = arith.constant 0 : index
    %c0_43 = arith.constant 0 : index
    %30 = vector.load %arg8[%c0_42, %c0_43] : memref<64x128xf32, #tpu.memory_space<vmem>>, vector<64x128xf32>
    tpu.vector_store %arg8[%c0_42, %c0_43], %29 {strides = array<i32>} : memref<64x128xf32, #tpu.memory_space<vmem>>, vector<64x128xf32>,
    %c1_44 = arith.constant 1 : index
    %c0_45 = arith.constant 0 : index
    %c0_46 = arith.constant 0 : index
    %31 = vector.load %arg5[%c1_44, %c0_45, %c0_46] : memref<16x128x128xf32, #tpu.memory_space<vmem>>, vector<1x128x128xf32>
    %32 = vector.shape_cast %31 : vector<1x128x128xf32> to vector<128x128xf32>
    %c0_47 = arith.constant 0 : index
    %c0_48 = arith.constant 0 : index
    %33 = vector.load %arg8[%c0_47, %c0_48] : memref<64x128xf32, #tpu.memory_space<vmem>>, vector<64x128xf32>
    %cst_49 = arith.constant dense<0.000000e+00> : vector<64x128xf32>
    %34 = tpu.matmul %5, %32, %cst_49 {dimension_numbers = #tpu.dot_dimension_numbers<[1], [0], [0], [1], [0, 0, 1, 1], [], []>} : vector<64x128xf32>, vector<128x128xf32>, vector<64x128xf32> -> vector<64x128xf32>
    %35 = arith.addf %33, %34 : vector<64x128xf32>
    %c0_50 = arith.constant 0 : index
    %c0_51 = arith.constant 0 : index
    %36 = vector.load %arg8[%c0_50, %c0_51] : memref<64x128xf32, #tpu.memory_space<vmem>>, vector<64x128xf32>
    tpu.vector_store %arg8[%c0_50, %c0_51], %35 {strides = array<i32>} : memref<64x128xf32, #tpu.memory_space<vmem>>, vector<64x128xf32>,
    %c2_52 = arith.constant 2 : index
    %c0_53 = arith.constant 0 : index
    %c0_54 = arith.constant 0 : index
    %37 = vector.load %arg5[%c2_52, %c0_53, %c0_54] : memref<16x128x128xf32, #tpu.memory_space<vmem>>, vector<1x128x128xf32>
    %38 = vector.shape_cast %37 : vector<1x128x128xf32> to vector<128x128xf32>
    %c0_55 = arith.constant 0 : index
    %c0_56 = arith.constant 0 : index
    %39 = vector.load %arg8[%c0_55, %c0_56] : memref<64x128xf32, #tpu.memory_space<vmem>>, vector<48x128xf32>
    %40 = vector.extract_strided_slice %2 {offsets = [16, 0], sizes = [48, 128], strides = [1, 1]} : vector<64x128xf32> to vector<48x128xf32>
    %cst_57 = arith.constant dense<0.000000e+00> : vector<48x128xf32>
    %41 = tpu.matmul %40, %38, %cst_57 {dimension_numbers = #tpu.dot_dimension_numbers<[1], [0], [0], [1], [0, 0, 1, 1], [], []>} : vector<48x128xf32>, vector<128x128xf32>, vector<48x128xf32> -> vector<48x128xf32>
    %42 = arith.addf %39, %41 : vector<48x128xf32>
    %c0_58 = arith.constant 0 : index
    %c0_59 = arith.constant 0 : index
    %43 = vector.load %arg8[%c0_58, %c0_59] : memref<64x128xf32, #tpu.memory_space<vmem>>, vector<48x128xf32>
    tpu.vector_store %arg8[%c0_58, %c0_59], %42 {strides = array<i32>} : memref<64x128xf32, #tpu.memory_space<vmem>>, vector<48x128xf32>,
    %c48 = arith.constant 48 : index
    %c0_60 = arith.constant 0 : index
    %44 = vector.load %arg8[%c48, %c0_60] : memref<64x128xf32, #tpu.memory_space<vmem>>, vector<16x128xf32>
    %cst_61 = arith.constant dense<0.000000e+00> : vector<16x128xf32>
    %45 = tpu.matmul %10, %38, %cst_61 {dimension_numbers = #tpu.dot_dimension_numbers<[1], [0], [0], [1], [0, 0, 1, 1], [], []>} : vector<16x128xf32>, vector<128x128xf32>, vector<16x128xf32> -> vector<16x128xf32>
    %46 = arith.addf %44, %45 : vector<16x128xf32>
    %c48_62 = arith.constant 48 : index
    %c0_63 = arith.constant 0 : index
    %47 = vector.load %arg8[%c48_62, %c0_63] : memref<64x128xf32, #tpu.memory_space<vmem>>, vector<16x128xf32>
    tpu.vector_store %arg8[%c48_62, %c0_63], %46 {strides = array<i32>} : memref<64x128xf32, #tpu.memory_space<vmem>>, vector<16x128xf32>,
    %c3 = arith.constant 3 : index
    %c0_64 = arith.constant 0 : index
    %c0_65 = arith.constant 0 : index
    %48 = vector.load %arg5[%c3, %c0_64, %c0_65] : memref<16x128x128xf32, #tpu.memory_space<vmem>>, vector<1x128x128xf32>
    %49 = vector.shape_cast %48 : vector<1x128x128xf32> to vector<128x128xf32>
    %c0_66 = arith.constant 0 : index
    %c0_67 = arith.constant 0 : index
    %50 = vector.load %arg8[%c0_66, %c0_67] : memref<64x128xf32, #tpu.memory_space<vmem>>, vector<48x128xf32>
    %51 = vector.extract_strided_slice %5 {offsets = [16, 0], sizes = [48, 128], strides = [1, 1]} : vector<64x128xf32> to vector<48x128xf32>
    %cst_68 = arith.constant dense<0.000000e+00> : vector<48x128xf32>
    %52 = tpu.matmul %51, %49, %cst_68 {dimension_numbers = #tpu.dot_dimension_numbers<[1], [0], [0], [1], [0, 0, 1, 1], [], []>} : vector<48x128xf32>, vector<128x128xf32>, vector<48x128xf32> -> vector<48x128xf32>
    %53 = arith.addf %50, %52 : vector<48x128xf32>
    %c0_69 = arith.constant 0 : index
    %c0_70 = arith.constant 0 : index
    %54 = vector.load %arg8[%c0_69, %c0_70] : memref<64x128xf32, #tpu.memory_space<vmem>>, vector<48x128xf32>
    tpu.vector_store %arg8[%c0_69, %c0_70], %53 {strides = array<i32>} : memref<64x128xf32, #tpu.memory_space<vmem>>, vector<48x128xf32>,
    %c48_71 = arith.constant 48 : index
    %c0_72 = arith.constant 0 : index
    %55 = vector.load %arg8[%c48_71, %c0_72] : memref<64x128xf32, #tpu.memory_space<vmem>>, vector<16x128xf32>
    %cst_73 = arith.constant dense<0.000000e+00> : vector<16x128xf32>
    %56 = tpu.matmul %12, %49, %cst_73 {dimension_numbers = #tpu.dot_dimension_numbers<[1], [0], [0], [1], [0, 0, 1, 1], [], []>} : vector<16x128xf32>, vector<128x128xf32>, vector<16x128xf32> -> vector<16x128xf32>
    %57 = arith.addf %55, %56 : vector<16x128xf32>
    %c48_74 = arith.constant 48 : index
    %c0_75 = arith.constant 0 : index
    %58 = vector.load %arg8[%c48_74, %c0_75] : memref<64x128xf32, #tpu.memory_space<vmem>>, vector<16x128xf32>
    tpu.vector_store %arg8[%c48_74, %c0_75], %57 {strides = array<i32>} : memref<64x128xf32, #tpu.memory_space<vmem>>, vector<16x128xf32>,
    %c0_76 = arith.constant 0 : index
    %c0_77 = arith.constant 0 : index
    %59 = vector.load %arg8[%c0_76, %c0_77] : memref<64x128xf32, #tpu.memory_space<vmem>>, vector<64x128xf32>
    %60 = vector.shape_cast %59 : vector<64x128xf32> to vector<4x16x128xf32>
    %c0_78 = arith.constant 0 : index
    %c0_79 = arith.constant 0 : index
    %c0_80 = arith.constant 0 : index
    %c0_81 = arith.constant 0 : index
    %61 = vector.load %arg7[%c0_78, %c0_79, %c0_80, %c0_81] : memref<4x2x16x256xf32, #tpu.memory_space<vmem>>, vector<4x1x16x128xf32>
    %62 = vector.shape_cast %61 : vector<4x1x16x128xf32> to vector<4x16x128xf32>
    %63 = vector.shape_cast %60 : vector<4x16x128xf32> to vector<4x1x16x128xf32>
    tpu.vector_store %arg7[%c0_78, %c0_79, %c0_80, %c0_81], %63 {strides = array<i32>} : memref<4x2x16x256xf32, #tpu.memory_space<vmem>>, vector<4x1x16x128xf32>,
    %64 = vector.shape_cast %21 : vector<1x128xf32> to vector<1x128xf32>
    %65 = vector.broadcast %64 : vector<1x128xf32> to vector<64x128xf32>
    %c0_82 = arith.constant 0 : index
    %c0_83 = arith.constant 0 : index
    %66 = vector.load %arg8[%c0_82, %c0_83] : memref<64x128xf32, #tpu.memory_space<vmem>>, vector<64x128xf32>
    tpu.vector_store %arg8[%c0_82, %c0_83], %65 {strides = array<i32>} : memref<64x128xf32, #tpu.memory_space<vmem>>, vector<64x128xf32>,
    %c4 = arith.constant 4 : index
    %c0_84 = arith.constant 0 : index
    %c0_85 = arith.constant 0 : index
    %67 = vector.load %arg5[%c4, %c0_84, %c0_85] : memref<16x128x128xf32, #tpu.memory_space<vmem>>, vector<1x128x128xf32>
    %68 = vector.shape_cast %67 : vector<1x128x128xf32> to vector<128x128xf32>
    %c0_86 = arith.constant 0 : index
    %c0_87 = arith.constant 0 : index
    %69 = vector.load %arg8[%c0_86, %c0_87] : memref<64x128xf32, #tpu.memory_space<vmem>>, vector<64x128xf32>
    %cst_88 = arith.constant dense<0.000000e+00> : vector<64x128xf32>
    %70 = tpu.matmul %5, %68, %cst_88 {dimension_numbers = #tpu.dot_dimension_numbers<[1], [0], [0], [1], [0, 0, 1, 1], [], []>} : vector<64x128xf32>, vector<128x128xf32>, vector<64x128xf32> -> vector<64x128xf32>
    %71 = arith.addf %69, %70 : vector<64x128xf32>
    %c0_89 = arith.constant 0 : index
    %c0_90 = arith.constant 0 : index
    %72 = vector.load %arg8[%c0_89, %c0_90] : memref<64x128xf32, #tpu.memory_space<vmem>>, vector<64x128xf32>
    tpu.vector_store %arg8[%c0_89, %c0_90], %71 {strides = array<i32>} : memref<64x128xf32, #tpu.memory_space<vmem>>, vector<64x128xf32>,
    %c5 = arith.constant 5 : index
    %c0_91 = arith.constant 0 : index
    %c0_92 = arith.constant 0 : index
    %73 = vector.load %arg5[%c5, %c0_91, %c0_92] : memref<16x128x128xf32, #tpu.memory_space<vmem>>, vector<1x128x128xf32>
    %74 = vector.shape_cast %73 : vector<1x128x128xf32> to vector<128x128xf32>
    %c0_93 = arith.constant 0 : index
    %c0_94 = arith.constant 0 : index
    %75 = vector.load %arg8[%c0_93, %c0_94] : memref<64x128xf32, #tpu.memory_space<vmem>>, vector<64x128xf32>
    %cst_95 = arith.constant dense<0.000000e+00> : vector<64x128xf32>
    %76 = tpu.matmul %8, %74, %cst_95 {dimension_numbers = #tpu.dot_dimension_numbers<[1], [0], [0], [1], [0, 0, 1, 1], [], []>} : vector<64x128xf32>, vector<128x128xf32>, vector<64x128xf32> -> vector<64x128xf32>
    %77 = arith.addf %75, %76 : vector<64x128xf32>
    %c0_96 = arith.constant 0 : index
    %c0_97 = arith.constant 0 : index
    %78 = vector.load %arg8[%c0_96, %c0_97] : memref<64x128xf32, #tpu.memory_space<vmem>>, vector<64x128xf32>
    tpu.vector_store %arg8[%c0_96, %c0_97], %77 {strides = array<i32>} : memref<64x128xf32, #tpu.memory_space<vmem>>, vector<64x128xf32>,
    %c6 = arith.constant 6 : index
    %c0_98 = arith.constant 0 : index
    %c0_99 = arith.constant 0 : index
    %79 = vector.load %arg5[%c6, %c0_98, %c0_99] : memref<16x128x128xf32, #tpu.memory_space<vmem>>, vector<1x128x128xf32>
    %80 = vector.shape_cast %79 : vector<1x128x128xf32> to vector<128x128xf32>
    %c0_100 = arith.constant 0 : index
    %c0_101 = arith.constant 0 : index
    %81 = vector.load %arg8[%c0_100, %c0_101] : memref<64x128xf32, #tpu.memory_space<vmem>>, vector<48x128xf32>
    %82 = vector.extract_strided_slice %5 {offsets = [16, 0], sizes = [48, 128], strides = [1, 1]} : vector<64x128xf32> to vector<48x128xf32>
    %cst_102 = arith.constant dense<0.000000e+00> : vector<48x128xf32>
    %83 = tpu.matmul %82, %80, %cst_102 {dimension_numbers = #tpu.dot_dimension_numbers<[1], [0], [0], [1], [0, 0, 1, 1], [], []>} : vector<48x128xf32>, vector<128x128xf32>, vector<48x128xf32> -> vector<48x128xf32>
    %84 = arith.addf %81, %83 : vector<48x128xf32>
    %c0_103 = arith.constant 0 : index
    %c0_104 = arith.constant 0 : index
    %85 = vector.load %arg8[%c0_103, %c0_104] : memref<64x128xf32, #tpu.memory_space<vmem>>, vector<48x128xf32>
    tpu.vector_store %arg8[%c0_103, %c0_104], %84 {strides = array<i32>} : memref<64x128xf32, #tpu.memory_space<vmem>>, vector<48x128xf32>,
    %c48_105 = arith.constant 48 : index
    %c0_106 = arith.constant 0 : index
    %86 = vector.load %arg8[%c48_105, %c0_106] : memref<64x128xf32, #tpu.memory_space<vmem>>, vector<16x128xf32>
    %cst_107 = arith.constant dense<0.000000e+00> : vector<16x128xf32>
    %87 = tpu.matmul %12, %80, %cst_107 {dimension_numbers = #tpu.dot_dimension_numbers<[1], [0], [0], [1], [0, 0, 1, 1], [], []>} : vector<16x128xf32>, vector<128x128xf32>, vector<16x128xf32> -> vector<16x128xf32>
    %88 = arith.addf %86, %87 : vector<16x128xf32>
    %c48_108 = arith.constant 48 : index
    %c0_109 = arith.constant 0 : index
    %89 = vector.load %arg8[%c48_108, %c0_109] : memref<64x128xf32, #tpu.memory_space<vmem>>, vector<16x128xf32>
    tpu.vector_store %arg8[%c48_108, %c0_109], %88 {strides = array<i32>} : memref<64x128xf32, #tpu.memory_space<vmem>>, vector<16x128xf32>,
    %c7 = arith.constant 7 : index
    %c0_110 = arith.constant 0 : index
    %c0_111 = arith.constant 0 : index
    %90 = vector.load %arg5[%c7, %c0_110, %c0_111] : memref<16x128x128xf32, #tpu.memory_space<vmem>>, vector<1x128x128xf32>
    %91 = vector.shape_cast %90 : vector<1x128x128xf32> to vector<128x128xf32>
    %c0_112 = arith.constant 0 : index
    %c0_113 = arith.constant 0 : index
    %92 = vector.load %arg8[%c0_112, %c0_113] : memref<64x128xf32, #tpu.memory_space<vmem>>, vector<48x128xf32>
    %93 = vector.extract_strided_slice %8 {offsets = [16, 0], sizes = [48, 128], strides = [1, 1]} : vector<64x128xf32> to vector<48x128xf32>
    %cst_114 = arith.constant dense<0.000000e+00> : vector<48x128xf32>
    %94 = tpu.matmul %93, %91, %cst_114 {dimension_numbers = #tpu.dot_dimension_numbers<[1], [0], [0], [1], [0, 0, 1, 1], [], []>} : vector<48x128xf32>, vector<128x128xf32>, vector<48x128xf32> -> vector<48x128xf32>
    %95 = arith.addf %92, %94 : vector<48x128xf32>
    %c0_115 = arith.constant 0 : index
    %c0_116 = arith.constant 0 : index
    %96 = vector.load %arg8[%c0_115, %c0_116] : memref<64x128xf32, #tpu.memory_space<vmem>>, vector<48x128xf32>
    tpu.vector_store %arg8[%c0_115, %c0_116], %95 {strides = array<i32>} : memref<64x128xf32, #tpu.memory_space<vmem>>, vector<48x128xf32>,
    %c48_117 = arith.constant 48 : index
    %c0_118 = arith.constant 0 : index
    %97 = vector.load %arg8[%c48_117, %c0_118] : memref<64x128xf32, #tpu.memory_space<vmem>>, vector<16x128xf32>
    %cst_119 = arith.constant dense<0.000000e+00> : vector<16x128xf32>
    %98 = tpu.matmul %14, %91, %cst_119 {dimension_numbers = #tpu.dot_dimension_numbers<[1], [0], [0], [1], [0, 0, 1, 1], [], []>} : vector<16x128xf32>, vector<128x128xf32>, vector<16x128xf32> -> vector<16x128xf32>
    %99 = arith.addf %97, %98 : vector<16x128xf32>
    %c48_120 = arith.constant 48 : index
    %c0_121 = arith.constant 0 : index
    %100 = vector.load %arg8[%c48_120, %c0_121] : memref<64x128xf32, #tpu.memory_space<vmem>>, vector<16x128xf32>
    tpu.vector_store %arg8[%c48_120, %c0_121], %99 {strides = array<i32>} : memref<64x128xf32, #tpu.memory_space<vmem>>, vector<16x128xf32>,
    %c0_122 = arith.constant 0 : index
    %c0_123 = arith.constant 0 : index
    %101 = vector.load %arg8[%c0_122, %c0_123] : memref<64x128xf32, #tpu.memory_space<vmem>>, vector<64x128xf32>
    %102 = vector.shape_cast %101 : vector<64x128xf32> to vector<4x16x128xf32>
    %c0_124 = arith.constant 0 : index
    %c0_125 = arith.constant 0 : index
    %c0_126 = arith.constant 0 : index
    %c128 = arith.constant 128 : index
    %103 = vector.load %arg7[%c0_124, %c0_125, %c0_126, %c128] : memref<4x2x16x256xf32, #tpu.memory_space<vmem>>, vector<4x1x16x128xf32>
    %104 = vector.shape_cast %103 : vector<4x1x16x128xf32> to vector<4x16x128xf32>
    %105 = vector.shape_cast %102 : vector<4x16x128xf32> to vector<4x1x16x128xf32>
    tpu.vector_store %arg7[%c0_124, %c0_125, %c0_126, %c128], %105 {strides = array<i32>} : memref<4x2x16x256xf32, #tpu.memory_space<vmem>>, vector<4x1x16x128xf32>,
    %106 = vector.shape_cast %21 : vector<1x128xf32> to vector<1x128xf32>
    %107 = vector.broadcast %106 : vector<1x128xf32> to vector<64x128xf32>
    %c0_127 = arith.constant 0 : index
    %c0_128 = arith.constant 0 : index
    %108 = vector.load %arg8[%c0_127, %c0_128] : memref<64x128xf32, #tpu.memory_space<vmem>>, vector<64x128xf32>
    tpu.vector_store %arg8[%c0_127, %c0_128], %107 {strides = array<i32>} : memref<64x128xf32, #tpu.memory_space<vmem>>, vector<64x128xf32>,
    %c8 = arith.constant 8 : index
    %c0_129 = arith.constant 0 : index
    %c0_130 = arith.constant 0 : index
    %109 = vector.load %arg5[%c8, %c0_129, %c0_130] : memref<16x128x128xf32, #tpu.memory_space<vmem>>, vector<1x128x128xf32>
    %110 = vector.shape_cast %109 : vector<1x128x128xf32> to vector<128x128xf32>
    %c0_131 = arith.constant 0 : index
    %c0_132 = arith.constant 0 : index
    %111 = vector.load %arg8[%c0_131, %c0_132] : memref<64x128xf32, #tpu.memory_space<vmem>>, vector<48x128xf32>
    %112 = vector.extract_strided_slice %2 {offsets = [16, 0], sizes = [48, 128], strides = [1, 1]} : vector<64x128xf32> to vector<48x128xf32>
    %cst_133 = arith.constant dense<0.000000e+00> : vector<48x128xf32>
    %113 = tpu.matmul %112, %110, %cst_133 {dimension_numbers = #tpu.dot_dimension_numbers<[1], [0], [0], [1], [0, 0, 1, 1], [], []>} : vector<48x128xf32>, vector<128x128xf32>, vector<48x128xf32> -> vector<48x128xf32>
    %114 = arith.addf %111, %113 : vector<48x128xf32>
    %c0_134 = arith.constant 0 : index
    %c0_135 = arith.constant 0 : index
    %115 = vector.load %arg8[%c0_134, %c0_135] : memref<64x128xf32, #tpu.memory_space<vmem>>, vector<48x128xf32>
    tpu.vector_store %arg8[%c0_134, %c0_135], %114 {strides = array<i32>} : memref<64x128xf32, #tpu.memory_space<vmem>>, vector<48x128xf32>,
    %c48_136 = arith.constant 48 : index
    %c0_137 = arith.constant 0 : index
    %116 = vector.load %arg8[%c48_136, %c0_137] : memref<64x128xf32, #tpu.memory_space<vmem>>, vector<16x128xf32>
    %cst_138 = arith.constant dense<0.000000e+00> : vector<16x128xf32>
    %117 = tpu.matmul %10, %110, %cst_138 {dimension_numbers = #tpu.dot_dimension_numbers<[1], [0], [0], [1], [0, 0, 1, 1], [], []>} : vector<16x128xf32>, vector<128x128xf32>, vector<16x128xf32> -> vector<16x128xf32>
    %118 = arith.addf %116, %117 : vector<16x128xf32>
    %c48_139 = arith.constant 48 : index
    %c0_140 = arith.constant 0 : index
    %119 = vector.load %arg8[%c48_139, %c0_140] : memref<64x128xf32, #tpu.memory_space<vmem>>, vector<16x128xf32>
    tpu.vector_store %arg8[%c48_139, %c0_140], %118 {strides = array<i32>} : memref<64x128xf32, #tpu.memory_space<vmem>>, vector<16x128xf32>,
    %c9 = arith.constant 9 : index
    %c0_141 = arith.constant 0 : index
    %c0_142 = arith.constant 0 : index
    %120 = vector.load %arg5[%c9, %c0_141, %c0_142] : memref<16x128x128xf32, #tpu.memory_space<vmem>>, vector<1x128x128xf32>
    %121 = vector.shape_cast %120 : vector<1x128x128xf32> to vector<128x128xf32>
    %c0_143 = arith.constant 0 : index
    %c0_144 = arith.constant 0 : index
    %122 = vector.load %arg8[%c0_143, %c0_144] : memref<64x128xf32, #tpu.memory_space<vmem>>, vector<48x128xf32>
    %123 = vector.extract_strided_slice %5 {offsets = [16, 0], sizes = [48, 128], strides = [1, 1]} : vector<64x128xf32> to vector<48x128xf32>
    %cst_145 = arith.constant dense<0.000000e+00> : vector<48x128xf32>
    %124 = tpu.matmul %123, %121, %cst_145 {dimension_numbers = #tpu.dot_dimension_numbers<[1], [0], [0], [1], [0, 0, 1, 1], [], []>} : vector<48x128xf32>, vector<128x128xf32>, vector<48x128xf32> -> vector<48x128xf32>
    %125 = arith.addf %122, %124 : vector<48x128xf32>
    %c0_146 = arith.constant 0 : index
    %c0_147 = arith.constant 0 : index
    %126 = vector.load %arg8[%c0_146, %c0_147] : memref<64x128xf32, #tpu.memory_space<vmem>>, vector<48x128xf32>
    tpu.vector_store %arg8[%c0_146, %c0_147], %125 {strides = array<i32>} : memref<64x128xf32, #tpu.memory_space<vmem>>, vector<48x128xf32>,
    %c48_148 = arith.constant 48 : index
    %c0_149 = arith.constant 0 : index
    %127 = vector.load %arg8[%c48_148, %c0_149] : memref<64x128xf32, #tpu.memory_space<vmem>>, vector<16x128xf32>
    %cst_150 = arith.constant dense<0.000000e+00> : vector<16x128xf32>
    %128 = tpu.matmul %12, %121, %cst_150 {dimension_numbers = #tpu.dot_dimension_numbers<[1], [0], [0], [1], [0, 0, 1, 1], [], []>} : vector<16x128xf32>, vector<128x128xf32>, vector<16x128xf32> -> vector<16x128xf32>
    %129 = arith.addf %127, %128 : vector<16x128xf32>
    %c48_151 = arith.constant 48 : index
    %c0_152 = arith.constant 0 : index
    %130 = vector.load %arg8[%c48_151, %c0_152] : memref<64x128xf32, #tpu.memory_space<vmem>>, vector<16x128xf32>
    tpu.vector_store %arg8[%c48_151, %c0_152], %129 {strides = array<i32>} : memref<64x128xf32, #tpu.memory_space<vmem>>, vector<16x128xf32>,
    %c10 = arith.constant 10 : index
    %c0_153 = arith.constant 0 : index
    %c0_154 = arith.constant 0 : index
    %131 = vector.load %arg5[%c10, %c0_153, %c0_154] : memref<16x128x128xf32, #tpu.memory_space<vmem>>, vector<1x128x128xf32>
    %132 = vector.shape_cast %131 : vector<1x128x128xf32> to vector<128x128xf32>
    %c0_155 = arith.constant 0 : index
    %c0_156 = arith.constant 0 : index
    %133 = vector.load %arg8[%c0_155, %c0_156] : memref<64x128xf32, #tpu.memory_space<vmem>>, vector<32x128xf32>
    %134 = vector.extract_strided_slice %2 {offsets = [32, 0], sizes = [32, 128], strides = [1, 1]} : vector<64x128xf32> to vector<32x128xf32>
    %cst_157 = arith.constant dense<0.000000e+00> : vector<32x128xf32>
    %135 = tpu.matmul %134, %132, %cst_157 {dimension_numbers = #tpu.dot_dimension_numbers<[1], [0], [0], [1], [0, 0, 1, 1], [], []>} : vector<32x128xf32>, vector<128x128xf32>, vector<32x128xf32> -> vector<32x128xf32>
    %136 = arith.addf %133, %135 : vector<32x128xf32>
    %c0_158 = arith.constant 0 : index
    %c0_159 = arith.constant 0 : index
    %137 = vector.load %arg8[%c0_158, %c0_159] : memref<64x128xf32, #tpu.memory_space<vmem>>, vector<32x128xf32>
    tpu.vector_store %arg8[%c0_158, %c0_159], %136 {strides = array<i32>} : memref<64x128xf32, #tpu.memory_space<vmem>>, vector<32x128xf32>,
    %c32 = arith.constant 32 : index
    %c0_160 = arith.constant 0 : index
    %138 = vector.load %arg8[%c32, %c0_160] : memref<64x128xf32, #tpu.memory_space<vmem>>, vector<16x128xf32>
    %cst_161 = arith.constant dense<0.000000e+00> : vector<16x128xf32>
    %139 = tpu.matmul %10, %132, %cst_161 {dimension_numbers = #tpu.dot_dimension_numbers<[1], [0], [0], [1], [0, 0, 1, 1], [], []>} : vector<16x128xf32>, vector<128x128xf32>, vector<16x128xf32> -> vector<16x128xf32>
    %140 = arith.addf %138, %139 : vector<16x128xf32>
    %c32_162 = arith.constant 32 : index
    %c0_163 = arith.constant 0 : index
    %141 = vector.load %arg8[%c32_162, %c0_163] : memref<64x128xf32, #tpu.memory_space<vmem>>, vector<16x128xf32>
    tpu.vector_store %arg8[%c32_162, %c0_163], %140 {strides = array<i32>} : memref<64x128xf32, #tpu.memory_space<vmem>>, vector<16x128xf32>,
    %c48_164 = arith.constant 48 : index
    %c0_165 = arith.constant 0 : index
    %142 = vector.load %arg8[%c48_164, %c0_165] : memref<64x128xf32, #tpu.memory_space<vmem>>, vector<16x128xf32>
    %cst_166 = arith.constant dense<0.000000e+00> : vector<16x128xf32>
    %143 = tpu.matmul %16, %132, %cst_166 {dimension_numbers = #tpu.dot_dimension_numbers<[1], [0], [0], [1], [0, 0, 1, 1], [], []>} : vector<16x128xf32>, vector<128x128xf32>, vector<16x128xf32> -> vector<16x128xf32>
    %144 = arith.addf %142, %143 : vector<16x128xf32>
    %c48_167 = arith.constant 48 : index
    %c0_168 = arith.constant 0 : index
    %145 = vector.load %arg8[%c48_167, %c0_168] : memref<64x128xf32, #tpu.memory_space<vmem>>, vector<16x128xf32>
    tpu.vector_store %arg8[%c48_167, %c0_168], %144 {strides = array<i32>} : memref<64x128xf32, #tpu.memory_space<vmem>>, vector<16x128xf32>,
    %c11 = arith.constant 11 : index
    %c0_169 = arith.constant 0 : index
    %c0_170 = arith.constant 0 : index
    %146 = vector.load %arg5[%c11, %c0_169, %c0_170] : memref<16x128x128xf32, #tpu.memory_space<vmem>>, vector<1x128x128xf32>
    %147 = vector.shape_cast %146 : vector<1x128x128xf32> to vector<128x128xf32>
    %c0_171 = arith.constant 0 : index
    %c0_172 = arith.constant 0 : index
    %148 = vector.load %arg8[%c0_171, %c0_172] : memref<64x128xf32, #tpu.memory_space<vmem>>, vector<32x128xf32>
    %149 = vector.extract_strided_slice %5 {offsets = [32, 0], sizes = [32, 128], strides = [1, 1]} : vector<64x128xf32> to vector<32x128xf32>
    %cst_173 = arith.constant dense<0.000000e+00> : vector<32x128xf32>
    %150 = tpu.matmul %149, %147, %cst_173 {dimension_numbers = #tpu.dot_dimension_numbers<[1], [0], [0], [1], [0, 0, 1, 1], [], []>} : vector<32x128xf32>, vector<128x128xf32>, vector<32x128xf32> -> vector<32x128xf32>
    %151 = arith.addf %148, %150 : vector<32x128xf32>
    %c0_174 = arith.constant 0 : index
    %c0_175 = arith.constant 0 : index
    %152 = vector.load %arg8[%c0_174, %c0_175] : memref<64x128xf32, #tpu.memory_space<vmem>>, vector<32x128xf32>
    tpu.vector_store %arg8[%c0_174, %c0_175], %151 {strides = array<i32>} : memref<64x128xf32, #tpu.memory_space<vmem>>, vector<32x128xf32>,
    %c32_176 = arith.constant 32 : index
    %c0_177 = arith.constant 0 : index
    %153 = vector.load %arg8[%c32_176, %c0_177] : memref<64x128xf32, #tpu.memory_space<vmem>>, vector<16x128xf32>
    %cst_178 = arith.constant dense<0.000000e+00> : vector<16x128xf32>
    %154 = tpu.matmul %12, %147, %cst_178 {dimension_numbers = #tpu.dot_dimension_numbers<[1], [0], [0], [1], [0, 0, 1, 1], [], []>} : vector<16x128xf32>, vector<128x128xf32>, vector<16x128xf32> -> vector<16x128xf32>
    %155 = arith.addf %153, %154 : vector<16x128xf32>
    %c32_179 = arith.constant 32 : index
    %c0_180 = arith.constant 0 : index
    %156 = vector.load %arg8[%c32_179, %c0_180] : memref<64x128xf32, #tpu.memory_space<vmem>>, vector<16x128xf32>
    tpu.vector_store %arg8[%c32_179, %c0_180], %155 {strides = array<i32>} : memref<64x128xf32, #tpu.memory_space<vmem>>, vector<16x128xf32>,
    %c48_181 = arith.constant 48 : index
    %c0_182 = arith.constant 0 : index
    %157 = vector.load %arg8[%c48_181, %c0_182] : memref<64x128xf32, #tpu.memory_space<vmem>>, vector<16x128xf32>
    %cst_183 = arith.constant dense<0.000000e+00> : vector<16x128xf32>
    %158 = tpu.matmul %18, %147, %cst_183 {dimension_numbers = #tpu.dot_dimension_numbers<[1], [0], [0], [1], [0, 0, 1, 1], [], []>} : vector<16x128xf32>, vector<128x128xf32>, vector<16x128xf32> -> vector<16x128xf32>
    %159 = arith.addf %157, %158 : vector<16x128xf32>
    %c48_184 = arith.constant 48 : index
    %c0_185 = arith.constant 0 : index
    %160 = vector.load %arg8[%c48_184, %c0_185] : memref<64x128xf32, #tpu.memory_space<vmem>>, vector<16x128xf32>
    tpu.vector_store %arg8[%c48_184, %c0_185], %159 {strides = array<i32>} : memref<64x128xf32, #tpu.memory_space<vmem>>, vector<16x128xf32>,
    %c0_186 = arith.constant 0 : index
    %c0_187 = arith.constant 0 : index
    %161 = vector.load %arg8[%c0_186, %c0_187] : memref<64x128xf32, #tpu.memory_space<vmem>>, vector<64x128xf32>
    %162 = vector.shape_cast %161 : vector<64x128xf32> to vector<4x16x128xf32>
    %c0_188 = arith.constant 0 : index
    %c1_189 = arith.constant 1 : index
    %c0_190 = arith.constant 0 : index
    %c0_191 = arith.constant 0 : index
    %163 = vector.load %arg7[%c0_188, %c1_189, %c0_190, %c0_191] : memref<4x2x16x256xf32, #tpu.memory_space<vmem>>, vector<4x1x16x128xf32>
    %164 = vector.shape_cast %163 : vector<4x1x16x128xf32> to vector<4x16x128xf32>
    %165 = vector.shape_cast %162 : vector<4x16x128xf32> to vector<4x1x16x128xf32>
    tpu.vector_store %arg7[%c0_188, %c1_189, %c0_190, %c0_191], %165 {strides = array<i32>} : memref<4x2x16x256xf32, #tpu.memory_space<vmem>>, vector<4x1x16x128xf32>,
    %166 = vector.shape_cast %21 : vector<1x128xf32> to vector<1x128xf32>
    %167 = vector.broadcast %166 : vector<1x128xf32> to vector<64x128xf32>
    %c0_192 = arith.constant 0 : index
    %c0_193 = arith.constant 0 : index
    %168 = vector.load %arg8[%c0_192, %c0_193] : memref<64x128xf32, #tpu.memory_space<vmem>>, vector<64x128xf32>
    tpu.vector_store %arg8[%c0_192, %c0_193], %167 {strides = array<i32>} : memref<64x128xf32, #tpu.memory_space<vmem>>, vector<64x128xf32>,
    %c12 = arith.constant 12 : index
    %c0_194 = arith.constant 0 : index
    %c0_195 = arith.constant 0 : index
    %169 = vector.load %arg5[%c12, %c0_194, %c0_195] : memref<16x128x128xf32, #tpu.memory_space<vmem>>, vector<1x128x128xf32>
    %170 = vector.shape_cast %169 : vector<1x128x128xf32> to vector<128x128xf32>
    %c0_196 = arith.constant 0 : index
    %c0_197 = arith.constant 0 : index
    %171 = vector.load %arg8[%c0_196, %c0_197] : memref<64x128xf32, #tpu.memory_space<vmem>>, vector<48x128xf32>
    %172 = vector.extract_strided_slice %5 {offsets = [16, 0], sizes = [48, 128], strides = [1, 1]} : vector<64x128xf32> to vector<48x128xf32>
    %cst_198 = arith.constant dense<0.000000e+00> : vector<48x128xf32>
    %173 = tpu.matmul %172, %170, %cst_198 {dimension_numbers = #tpu.dot_dimension_numbers<[1], [0], [0], [1], [0, 0, 1, 1], [], []>} : vector<48x128xf32>, vector<128x128xf32>, vector<48x128xf32> -> vector<48x128xf32>
    %174 = arith.addf %171, %173 : vector<48x128xf32>
    %c0_199 = arith.constant 0 : index
    %c0_200 = arith.constant 0 : index
    %175 = vector.load %arg8[%c0_199, %c0_200] : memref<64x128xf32, #tpu.memory_space<vmem>>, vector<48x128xf32>
    tpu.vector_store %arg8[%c0_199, %c0_200], %174 {strides = array<i32>} : memref<64x128xf32, #tpu.memory_space<vmem>>, vector<48x128xf32>,
    %c48_201 = arith.constant 48 : index
    %c0_202 = arith.constant 0 : index
    %176 = vector.load %arg8[%c48_201, %c0_202] : memref<64x128xf32, #tpu.memory_space<vmem>>, vector<16x128xf32>
    %cst_203 = arith.constant dense<0.000000e+00> : vector<16x128xf32>
    %177 = tpu.matmul %12, %170, %cst_203 {dimension_numbers = #tpu.dot_dimension_numbers<[1], [0], [0], [1], [0, 0, 1, 1], [], []>} : vector<16x128xf32>, vector<128x128xf32>, vector<16x128xf32> -> vector<16x128xf32>
    %178 = arith.addf %176, %177 : vector<16x128xf32>
    %c48_204 = arith.constant 48 : index
    %c0_205 = arith.constant 0 : index
    %179 = vector.load %arg8[%c48_204, %c0_205] : memref<64x128xf32, #tpu.memory_space<vmem>>, vector<16x128xf32>
    tpu.vector_store %arg8[%c48_204, %c0_205], %178 {strides = array<i32>} : memref<64x128xf32, #tpu.memory_space<vmem>>, vector<16x128xf32>,
    %c13 = arith.constant 13 : index
    %c0_206 = arith.constant 0 : index
    %c0_207 = arith.constant 0 : index
    %180 = vector.load %arg5[%c13, %c0_206, %c0_207] : memref<16x128x128xf32, #tpu.memory_space<vmem>>, vector<1x128x128xf32>
    %181 = vector.shape_cast %180 : vector<1x128x128xf32> to vector<128x128xf32>
    %c0_208 = arith.constant 0 : index
    %c0_209 = arith.constant 0 : index
    %182 = vector.load %arg8[%c0_208, %c0_209] : memref<64x128xf32, #tpu.memory_space<vmem>>, vector<48x128xf32>
    %183 = vector.extract_strided_slice %8 {offsets = [16, 0], sizes = [48, 128], strides = [1, 1]} : vector<64x128xf32> to vector<48x128xf32>
    %cst_210 = arith.constant dense<0.000000e+00> : vector<48x128xf32>
    %184 = tpu.matmul %183, %181, %cst_210 {dimension_numbers = #tpu.dot_dimension_numbers<[1], [0], [0], [1], [0, 0, 1, 1], [], []>} : vector<48x128xf32>, vector<128x128xf32>, vector<48x128xf32> -> vector<48x128xf32>
    %185 = arith.addf %182, %184 : vector<48x128xf32>
    %c0_211 = arith.constant 0 : index
    %c0_212 = arith.constant 0 : index
    %186 = vector.load %arg8[%c0_211, %c0_212] : memref<64x128xf32, #tpu.memory_space<vmem>>, vector<48x128xf32>
    tpu.vector_store %arg8[%c0_211, %c0_212], %185 {strides = array<i32>} : memref<64x128xf32, #tpu.memory_space<vmem>>, vector<48x128xf32>,
    %c48_213 = arith.constant 48 : index
    %c0_214 = arith.constant 0 : index
    %187 = vector.load %arg8[%c48_213, %c0_214] : memref<64x128xf32, #tpu.memory_space<vmem>>, vector<16x128xf32>
    %cst_215 = arith.constant dense<0.000000e+00> : vector<16x128xf32>
    %188 = tpu.matmul %14, %181, %cst_215 {dimension_numbers = #tpu.dot_dimension_numbers<[1], [0], [0], [1], [0, 0, 1, 1], [], []>} : vector<16x128xf32>, vector<128x128xf32>, vector<16x128xf32> -> vector<16x128xf32>
    %189 = arith.addf %187, %188 : vector<16x128xf32>
    %c48_216 = arith.constant 48 : index
    %c0_217 = arith.constant 0 : index
    %190 = vector.load %arg8[%c48_216, %c0_217] : memref<64x128xf32, #tpu.memory_space<vmem>>, vector<16x128xf32>
    tpu.vector_store %arg8[%c48_216, %c0_217], %189 {strides = array<i32>} : memref<64x128xf32, #tpu.memory_space<vmem>>, vector<16x128xf32>,
    %c14 = arith.constant 14 : index
    %c0_218 = arith.constant 0 : index
    %c0_219 = arith.constant 0 : index
    %191 = vector.load %arg5[%c14, %c0_218, %c0_219] : memref<16x128x128xf32, #tpu.memory_space<vmem>>, vector<1x128x128xf32>
    %192 = vector.shape_cast %191 : vector<1x128x128xf32> to vector<128x128xf32>
    %c0_220 = arith.constant 0 : index
    %c0_221 = arith.constant 0 : index
    %193 = vector.load %arg8[%c0_220, %c0_221] : memref<64x128xf32, #tpu.memory_space<vmem>>, vector<32x128xf32>
    %194 = vector.extract_strided_slice %5 {offsets = [32, 0], sizes = [32, 128], strides = [1, 1]} : vector<64x128xf32> to vector<32x128xf32>
    %cst_222 = arith.constant dense<0.000000e+00> : vector<32x128xf32>
    %195 = tpu.matmul %194, %192, %cst_222 {dimension_numbers = #tpu.dot_dimension_numbers<[1], [0], [0], [1], [0, 0, 1, 1], [], []>} : vector<32x128xf32>, vector<128x128xf32>, vector<32x128xf32> -> vector<32x128xf32>
    %196 = arith.addf %193, %195 : vector<32x128xf32>
    %c0_223 = arith.constant 0 : index
    %c0_224 = arith.constant 0 : index
    %197 = vector.load %arg8[%c0_223, %c0_224] : memref<64x128xf32, #tpu.memory_space<vmem>>, vector<32x128xf32>
    tpu.vector_store %arg8[%c0_223, %c0_224], %196 {strides = array<i32>} : memref<64x128xf32, #tpu.memory_space<vmem>>, vector<32x128xf32>,
    %c32_225 = arith.constant 32 : index
    %c0_226 = arith.constant 0 : index
    %198 = vector.load %arg8[%c32_225, %c0_226] : memref<64x128xf32, #tpu.memory_space<vmem>>, vector<16x128xf32>
    %cst_227 = arith.constant dense<0.000000e+00> : vector<16x128xf32>
    %199 = tpu.matmul %12, %192, %cst_227 {dimension_numbers = #tpu.dot_dimension_numbers<[1], [0], [0], [1], [0, 0, 1, 1], [], []>} : vector<16x128xf32>, vector<128x128xf32>, vector<16x128xf32> -> vector<16x128xf32>
    %200 = arith.addf %198, %199 : vector<16x128xf32>
    %c32_228 = arith.constant 32 : index
    %c0_229 = arith.constant 0 : index
    %201 = vector.load %arg8[%c32_228, %c0_229] : memref<64x128xf32, #tpu.memory_space<vmem>>, vector<16x128xf32>
    tpu.vector_store %arg8[%c32_228, %c0_229], %200 {strides = array<i32>} : memref<64x128xf32, #tpu.memory_space<vmem>>, vector<16x128xf32>,
    %c48_230 = arith.constant 48 : index
    %c0_231 = arith.constant 0 : index
    %202 = vector.load %arg8[%c48_230, %c0_231] : memref<64x128xf32, #tpu.memory_space<vmem>>, vector<16x128xf32>
    %cst_232 = arith.constant dense<0.000000e+00> : vector<16x128xf32>
    %203 = tpu.matmul %18, %192, %cst_232 {dimension_numbers = #tpu.dot_dimension_numbers<[1], [0], [0], [1], [0, 0, 1, 1], [], []>} : vector<16x128xf32>, vector<128x128xf32>, vector<16x128xf32> -> vector<16x128xf32>
    %204 = arith.addf %202, %203 : vector<16x128xf32>
    %c48_233 = arith.constant 48 : index
    %c0_234 = arith.constant 0 : index
    %205 = vector.load %arg8[%c48_233, %c0_234] : memref<64x128xf32, #tpu.memory_space<vmem>>, vector<16x128xf32>
    tpu.vector_store %arg8[%c48_233, %c0_234], %204 {strides = array<i32>} : memref<64x128xf32, #tpu.memory_space<vmem>>, vector<16x128xf32>,
    %c15 = arith.constant 15 : index
    %c0_235 = arith.constant 0 : index
    %c0_236 = arith.constant 0 : index
    %206 = vector.load %arg5[%c15, %c0_235, %c0_236] : memref<16x128x128xf32, #tpu.memory_space<vmem>>, vector<1x128x128xf32>
    %207 = vector.shape_cast %206 : vector<1x128x128xf32> to vector<128x128xf32>
    %c0_237 = arith.constant 0 : index
    %c0_238 = arith.constant 0 : index
    %208 = vector.load %arg8[%c0_237, %c0_238] : memref<64x128xf32, #tpu.memory_space<vmem>>, vector<32x128xf32>
    %209 = vector.extract_strided_slice %8 {offsets = [32, 0], sizes = [32, 128], strides = [1, 1]} : vector<64x128xf32> to vector<32x128xf32>
    %cst_239 = arith.constant dense<0.000000e+00> : vector<32x128xf32>
    %210 = tpu.matmul %209, %207, %cst_239 {dimension_numbers = #tpu.dot_dimension_numbers<[1], [0], [0], [1], [0, 0, 1, 1], [], []>} : vector<32x128xf32>, vector<128x128xf32>, vector<32x128xf32> -> vector<32x128xf32>
    %211 = arith.addf %208, %210 : vector<32x128xf32>
    %c0_240 = arith.constant 0 : index
    %c0_241 = arith.constant 0 : index
    %212 = vector.load %arg8[%c0_240, %c0_241] : memref<64x128xf32, #tpu.memory_space<vmem>>, vector<32x128xf32>
    tpu.vector_store %arg8[%c0_240, %c0_241], %211 {strides = array<i32>} : memref<64x128xf32, #tpu.memory_space<vmem>>, vector<32x128xf32>,
    %c32_242 = arith.constant 32 : index
    %c0_243 = arith.constant 0 : index
    %213 = vector.load %arg8[%c32_242, %c0_243] : memref<64x128xf32, #tpu.memory_space<vmem>>, vector<16x128xf32>
    %cst_244 = arith.constant dense<0.000000e+00> : vector<16x128xf32>
    %214 = tpu.matmul %14, %207, %cst_244 {dimension_numbers = #tpu.dot_dimension_numbers<[1], [0], [0], [1], [0, 0, 1, 1], [], []>} : vector<16x128xf32>, vector<128x128xf32>, vector<16x128xf32> -> vector<16x128xf32>
    %215 = arith.addf %213, %214 : vector<16x128xf32>
    %c32_245 = arith.constant 32 : index
    %c0_246 = arith.constant 0 : index
    %216 = vector.load %arg8[%c32_245, %c0_246] : memref<64x128xf32, #tpu.memory_space<vmem>>, vector<16x128xf32>
    tpu.vector_store %arg8[%c32_245, %c0_246], %215 {strides = array<i32>} : memref<64x128xf32, #tpu.memory_space<vmem>>, vector<16x128xf32>,
    %c48_247 = arith.constant 48 : index
    %c0_248 = arith.constant 0 : index
    %217 = vector.load %arg8[%c48_247, %c0_248] : memref<64x128xf32, #tpu.memory_space<vmem>>, vector<16x128xf32>
    %cst_249 = arith.constant dense<0.000000e+00> : vector<16x128xf32>
    %218 = tpu.matmul %20, %207, %cst_249 {dimension_numbers = #tpu.dot_dimension_numbers<[1], [0], [0], [1], [0, 0, 1, 1], [], []>} : vector<16x128xf32>, vector<128x128xf32>, vector<16x128xf32> -> vector<16x128xf32>
    %219 = arith.addf %217, %218 : vector<16x128xf32>
    %c48_250 = arith.constant 48 : index
    %c0_251 = arith.constant 0 : index
    %220 = vector.load %arg8[%c48_250, %c0_251] : memref<64x128xf32, #tpu.memory_space<vmem>>, vector<16x128xf32>
    tpu.vector_store %arg8[%c48_250, %c0_251], %219 {strides = array<i32>} : memref<64x128xf32, #tpu.memory_space<vmem>>, vector<16x128xf32>,
    %c0_252 = arith.constant 0 : index
    %c0_253 = arith.constant 0 : index
    %221 = vector.load %arg8[%c0_252, %c0_253] : memref<64x128xf32, #tpu.memory_space<vmem>>, vector<64x128xf32>
    %222 = vector.shape_cast %221 : vector<64x128xf32> to vector<4x16x128xf32>
    %c0_254 = arith.constant 0 : index
    %c1_255 = arith.constant 1 : index
    %c0_256 = arith.constant 0 : index
    %c128_257 = arith.constant 128 : index
    %223 = vector.load %arg7[%c0_254, %c1_255, %c0_256, %c128_257] : memref<4x2x16x256xf32, #tpu.memory_space<vmem>>, vector<4x1x16x128xf32>
    %224 = vector.shape_cast %223 : vector<4x1x16x128xf32> to vector<4x16x128xf32>
    %225 = vector.shape_cast %222 : vector<4x16x128xf32> to vector<4x1x16x128xf32>
    tpu.vector_store %arg7[%c0_254, %c1_255, %c0_256, %c128_257], %225 {strides = array<i32>} : memref<4x2x16x256xf32, #tpu.memory_space<vmem>>, vector<4x1x16x128xf32>,
    return
  }
  func.func @transform_0(%arg0: i32, %arg1: i32) -> (i32, i32, i32, i32) {
    %c0_i32 = arith.constant 0 : i32
    %c0_i32_0 = arith.constant 0 : i32
    %c0_i32_1 = arith.constant 0 : i32
    return %arg0, %arg1, %c0_i32, %c0_i32_0 : i32, i32, i32, i32
  }
  func.func @transform_1(%arg0: i32, %arg1: i32) -> (i32, i32, i32, i32) {
    %c1_i32 = arith.constant 1 : i32
    %0 = arith.addi %arg1, %c1_i32 : i32
    %c4_i32 = arith.constant 4 : i32
    %1 = arith.muli %0, %c4_i32 : i32
    %c0_i32 = arith.constant 0 : i32
    %c0_i32_0 = arith.constant 0 : i32
    %c0_i32_1 = arith.constant 0 : i32
    return %arg0, %1, %c0_i32, %c0_i32_0 : i32, i32, i32, i32
  }
  func.func @transform_2(%arg0: i32, %arg1: i32) -> (i32, i32, i32, i32) {
    %c1_i32 = arith.constant 1 : i32
    %0 = arith.addi %arg1, %c1_i32 : i32
    %c4_i32 = arith.constant 4 : i32
    %1 = arith.muli %0, %c4_i32 : i32
    %c1_i32_0 = arith.constant 1 : i32
    %2 = arith.addi %1, %c1_i32_0 : i32
    %c0_i32 = arith.constant 0 : i32
    %c0_i32_1 = arith.constant 0 : i32
    %c0_i32_2 = arith.constant 0 : i32
    return %arg0, %2, %c0_i32, %c0_i32_1 : i32, i32, i32, i32
  }
  func.func @transform_3(%arg0: i32, %arg1: i32) -> (i32, i32, i32) {
    %c0_i32 = arith.constant 0 : i32
    %c0_i32_0 = arith.constant 0 : i32
    %c0_i32_1 = arith.constant 0 : i32
    %c0_i32_2 = arith.constant 0 : i32
    return %c0_i32, %c0_i32_0, %c0_i32_1 : i32, i32, i32
  }
  func.func @transform_4(%arg0: i32, %arg1: i32) -> (i32, i32) {
    %c0_i32 = arith.constant 0 : i32
    %c0_i32_0 = arith.constant 0 : i32
    %c0_i32_1 = arith.constant 0 : i32
    return %c0_i32, %c0_i32_0 : i32, i32
  }
  func.func @transform_5(%arg0: i32, %arg1: i32) -> (i32, i32, i32, i32) {
    %c4_i32 = arith.constant 4 : i32
    %0 = arith.muli %arg0, %c4_i32 : i32
    %1 = arith.addi %0, %arg1 : i32
    %c0_i32 = arith.constant 0 : i32
    %c0_i32_0 = arith.constant 0 : i32
    %c0_i32_1 = arith.constant 0 : i32
    %c0_i32_2 = arith.constant 0 : i32
    return %1, %c0_i32, %c0_i32_0, %c0_i32_1 : i32, i32, i32, i32
  }
}

</mosaic_0001>

<bundles_post_ra>
// kernel: _forward_impl.1
= control target key start
LH: loop header
LB: loop body
LE: loop exit
PB: predicated region body
PF: predicated region fallthrough
CT: control target
= control target key end

     0   :  { %s2686_s18 = smov 0   ;;  %s2688_s19 = smov 0   ;;  %s4319_s0 = inlined_call_operand.vmem [shape: f32[2,18,18,128], index: 0, kind: input, shape index: {}, may-alias: {0,1,2}]   ;;  %s4320_s1 = inlined_call_operand.vmem [shape: f32[2,18,18,128], index: 1, kind: input, shape index: {}, may-alias: {0,1,2}]   ;;  %s4321_s2 = inlined_call_operand.vmem [shape: f32[2,18,18,128], index: 2, kind: input, shape index: {}, may-alias: {0,1,2}]   ;;  %s4322_s3 = inlined_call_operand.vmem [shape: f32[16,128,128], index: 3, kind: input, shape index: {}]   ;;  %s4323_s4 = inlined_call_operand.vmem [shape: f32[1,128], index: 4, kind: input, shape index: {}]   ;;  %s4324_s5 = inlined_call_operand.vmem [shape: f32[32,2,16,256], index: 5, kind: output, shape index: {}]  }
   0x1   :  { %s2690_s20 = smov 0   ;;  %s2692_s21 = smov 0  }
   0x2   :  { %s2694_s22 = smov 0  }
   0x3 LB: > { %s24_s23 = sadd.s32 1, %s2646_s20  ;;  %s27_s24 = sadd.s32 1, %s2650_s21  ;;  %s2654_s22 = sphi %s2694_s22, %s15_s22   ;;  %s2650_s21 = sphi %s2692_s21, %s4329_s21   ;;  %s2646_s20 = sphi %s2690_s20, %s4328_s20   ;;  %s2642_s19 = sphi %s2688_s19, %s4327_s19   ;;  %s2638_s18 = sphi %s2686_s18, %s4326_s18  }
   0x4   : > { %p25_p0 = scmp.ge.s32.totalorder %s24_s23, 4  ;;  %p2254_p1 = scmp.ge.s32.totalorder %s2654_s22, 1 }
   0x5   : > { %p273_p2 = scmp.lt.s32.totalorder %s2654_s22, 9 }
   0x6   : > { %s4331_s23 = smov (%p25_p0, %s24_s23), 0  ;;  %s4333_s24 = smov (!%p25_p0, %s27_s24), %s2650_s21 }
   0x7   : > { %p274_p3 = pnand %p2254_p1, %p273_p2  ;;  %p29_p4 = scmp.ge.s32.totalorder %s4333_s24, 2 }
   0x8   : > { %s2763_s10 = sshll.u32 (!%p274_p3), %s2638_s18, 2  ;;  %p343_p5 = scmp.lt.s32.totalorder (!%p274_p3), %s2642_s19, 1 }
   0x9   : > { %s4335_s24 = smov (%p29_p4, %s4333_s24), 0  ;;  %277 = sbr.rel (%p274_p3) target bundleno = 489 (0x1e9), region = 40 }
   0xa   : > { %p345_p6 = scmp.lt.s32.totalorder (!%p274_p3), %s2763_s10, 17  ;;  %s2823_s9 = sadd.s32 (!%p274_p3), 4, %s2763_s10 }
   0xb   : > { %p362_p7 = scmp.lt.s32.totalorder (!%p274_p3), %s2823_s9, 17  ;;  %s373_s27 = sadd.s32 (!%p274_p3), 1, %s2823_s9 }
   0xc   : > { %p376_p8 = scmp.lt.s32.totalorder (!%p274_p3), %s373_s27, 17  ;;  %s2261_s17 = sshll.u32 (!%p274_p3), %s2642_s19, 2 }
   0xd   : > { %s3570_s26 = sadd.s32 (!%p274_p3), %s2638_s18, %s2261_s17 }
   0xe   : > { %v460_v0 = vld [vmem:[%s4322_s3 + $0x78] sm:$0xff]  ;;  %v459_v3 = vld [vmem:[%s4322_s3 + $0x70] sm:$0xff]  ;;  %v458_v6 = vld [vmem:[%s4322_s3 + $0x68] sm:$0xff]  ;;  %s344_s12 = scalar_select %p343_p5, %s2642_s19, 1 }
   0xf   : > { %v2280_v1 = vld [vmem:[%s4322_s3 + $0xf8] sm:$0xff]  ;;  %469 = vmatpush.msra.mxu0 %v460_v0  ;;  %v2279_v4 = vld [vmem:[%s4322_s3 + $0xf0] sm:$0xff]  ;;  %v2278_v7 = vld [vmem:[%s4322_s3 + $0xe8] sm:$0xff]  ;;  %s2803_s15 = scalar_select %p345_p6, %s2763_s10, 17 }
  0x10   : > { %v2296_v2 = vld [vmem:[%s4322_s3 + $0x178] sm:$0xff]  ;;  %551 = vmatpush.msra.mxu1 %v2280_v1  ;;  %v2295_v5 = vld [vmem:[%s4322_s3 + $0x170] sm:$0xff]  ;;  %v2294_v8 = vld [vmem:[%s4322_s3 + $0x168] sm:$0xff]  ;;  %s2820_s8 = smul.u32 54, %s344_s12  ;;  %s4337_s27 = smov (!%p376_p8, %s373_s27), 17 }
  0x11   : > { %631 = vmatpush.msra.mxu2 %v2296_v2  ;;  %680 = vmatpush.msra.mxu3 %v2296_v2  ;;  %v457_v9 = vld [vmem:[%s4322_s3 + $0x60] sm:$0xff]  ;;  %v456_v12 = vld [vmem:[%s4322_s3 + $0x58] sm:$0xff]  ;;  %v455_v15 = vld [vmem:[%s4322_s3 + $0x50] sm:$0xff]  ;;  %s2552_s14 = smul.u32 3, %s2803_s15 }
  0x12   : > { %470 = vmatpush.msra.mxu0 %v459_v3  ;;  %552 = vmatpush.msra.mxu1 %v2279_v4  ;;  %v2277_v10 = vld [vmem:[%s4322_s3 + $0xe0] sm:$0xff]  ;;  %v2276_v13 = vld [vmem:[%s4322_s3 + $0xd8] sm:$0xff]  ;;  %v2275_v16 = vld [vmem:[%s4322_s3 + $0xd0] sm:$0xff]  ;;  %s2861_s10 = scalar_select %p362_p7, %s2823_s9, 17 }
  0x13   : > { %632 = vmatpush.msra.mxu2 %v2295_v5  ;;  %681 = vmatpush.msra.mxu3 %v2295_v5  ;;  %v2293_v11 = vld [vmem:[%s4322_s3 + $0x160] sm:$0xff]  ;;  %v2292_v14 = vld [vmem:[%s4322_s3 + $0x158] sm:$0xff]  ;;  %v2291_v17 = vld [vmem:[%s4322_s3 + $0x150] sm:$0xff]  ;;  %s349_s7 = sadd.s32 %s2820_s8, %s2552_s14  ;;  %s2555_s25 = smul.u32 3, %s4337_s27 }
  0x14   : > { %471 = vmatpush.msra.mxu0 %v458_v6  ;;  %553 = vmatpush.msra.mxu1 %v2278_v7  ;;  %v454_v18 = vld [vmem:[%s4322_s3 + $0x48] sm:$0xff]  ;;  %v453_v21 = vld [vmem:[%s4322_s3 + $0x40] sm:$0xff]  ;;  %v452_v24 = vld [vmem:[%s4322_s3 + $0x38] sm:$0xff]  ;;  %s2256_s28 = sshll.u32 %s349_s7, 3  ;;  %s2554_s30 = smul.u32 3, %s2861_s10 }
  0x15   : > { %633 = vmatpush.msra.mxu2 %v2294_v8  ;;  %682 = vmatpush.msra.mxu3 %v2294_v8  ;;  %v2274_v19 = vld [vmem:[%s4322_s3 + $0xc8] sm:$0xff]  ;;  %v2273_v22 = vld [vmem:[%s4322_s3 + $0xc0] sm:$0xff]  ;;  %v2272_v25 = vld [vmem:[%s4322_s3 + $0xb8] sm:$0xff]  ;;  %s2884_s14 = scalar_lea.vmem %s4319_s0, %s2256_s28  ;;  %s3096_s28 = sadd.s32 %s2555_s25, %s2820_s8 }
  0x16   : > { %472 = vmatpush.msra.mxu0 %v457_v9  ;;  %554 = vmatpush.msra.mxu1 %v2277_v10  ;;  %v2290_v20 = vld [vmem:[%s4322_s3 + $0x148] sm:$0xff]  ;;  %v2289_v23 = vld [vmem:[%s4322_s3 + $0x140] sm:$0xff]  ;;  %v2288_v26 = vld [vmem:[%s4322_s3 + $0x138] sm:$0xff]  ;;  %s366_s7 = sadd.s32 %s2554_s30, %s2820_s8  ;;  %s2262_s30 = sshll.u32 %s3570_s26, 2 }
  0x17   : > { %634 = vmatpush.msra.mxu2 %v2293_v11  ;;  %683 = vmatpush.msra.mxu3 %v2293_v11  ;;  %v451_v27 = vld [vmem:[%s4322_s3 + $0x30] sm:$0xff]  ;;  %v450_v30 = vld [vmem:[%s4322_s3 + $0x28] sm:$0xff]  ;;  %v449_v33 = vld [vmem:[%s4322_s3 + $0x20] sm:$0xff]  ;;  %s2258_s6 = sshll.u32 %s366_s7, 3  ;;  %p3611_p9 = scmp.lt.s32.totalorder %s2262_s30, 31 }
  0x18   : > { %473 = vmatpush.msra.mxu0 %v456_v12  ;;  %555 = vmatpush.msra.mxu1 %v2276_v13  ;;  %v2271_v28 = vld [vmem:[%s4322_s3 + $0xb0] sm:$0xff]  ;;  %v2270_v31 = vld [vmem:[%s4322_s3 + $0xa8] sm:$0xff]  ;;  %v2269_v34 = vld [vmem:[%s4322_s3 + $0xa0] sm:$0xff]  ;;  %s2937_s12 = scalar_lea.vmem %s4320_s1, %s2258_s6  ;;  %s2260_s26 = sshll.u32 %s3096_s28, 3 }
  0x19   : > { %635 = vmatpush.msra.mxu2 %v2292_v14  ;;  %684 = vmatpush.msra.mxu3 %v2292_v14  ;;  %v2287_v29 = vld [vmem:[%s4322_s3 + $0x130] sm:$0xff]  ;;  %v2286_v32 = vld [vmem:[%s4322_s3 + $0x128] sm:$0xff]  ;;  %v2285_v35 = vld [vmem:[%s4322_s3 + $0x120] sm:$0xff]  ;;  %s4339_s30 = smov (!%p3611_p9, %s2262_s30), 31  ;;  %s3673_s6 = scalar_lea.vmem %s4321_s2, %s2260_s26 }
  0x1a   : > { %474 = vmatpush.msra.mxu0 %v455_v15  ;;  %556 = vmatpush.msra.mxu1 %v2275_v16  ;;  %v448_v36 = vld [vmem:[%s4322_s3 + $0x18] sm:$0xff]  ;;  %v447_v39 = vld [vmem:[%s4322_s3 + $0x10] sm:$0xff]  ;;  %v446_v42 = vld [vmem:[%s4322_s3 + $0x8] sm:$0xff]  ;;  %s2535_s19 = sshll.u32 %s4339_s30, 6 }
  0x1b   : > { %636 = vmatpush.msra.mxu2 %v2291_v17  ;;  %685 = vmatpush.msra.mxu3 %v2291_v17  ;;  %v2268_v37 = vld [vmem:[%s4322_s3 + $0x98] sm:$0xff]  ;;  %v2267_v40 = vld [vmem:[%s4322_s3 + $0x90] sm:$0xff]  ;;  %v2266_v43 = vld [vmem:[%s4322_s3 + $0x88] sm:$0xff]  ;;  %s3680_s9 = scalar_lea.vmem %s4324_s5, %s2535_s19 }
  0x1c   : > { %475 = vmatpush.msra.mxu0 %v454_v18  ;;  %557 = vmatpush.msra.mxu1 %v2274_v19  ;;  %v2284_v38 = vld [vmem:[%s4322_s3 + $0x118] sm:$0xff]  ;;  %v2283_v41 = vld [vmem:[%s4322_s3 + $0x110] sm:$0xff]  ;;  %v2282_v44 = vld [vmem:[%s4322_s3 + $0x108] sm:$0xff] }
  0x1d   : > { %637 = vmatpush.msra.mxu2 %v2290_v20  ;;  %686 = vmatpush.msra.mxu3 %v2290_v20  ;;  %v445_v45 = vld [vmem:[%s4322_s3] sm:$0xff]  ;;  %v2901_v50 = vld [vmem:[%s2884_s14 + $0x18] sm:$0xff]  ;;  %v2311_v53 = vld [vmem:[%s4322_s3 + $0x1f0] sm:$0xff] }
  0x1e   : > { %476 = vmatpush.msra.mxu0 %v453_v21  ;;  %558 = vmatpush.msra.mxu1 %v2273_v22  ;;  %v2265_v46 = vld [vmem:[%s4322_s3 + $0x80] sm:$0xff]  ;;  %v2312_v51 = vld [vmem:[%s4322_s3 + $0x1f8] sm:$0xff]  ;;  %v2327_v55 = vld [vmem:[%s4322_s3 + $0x270] sm:$0xff] }
  0x1f   : > { %638 = vmatpush.msra.mxu2 %v2289_v23  ;;  %687 = vmatpush.msra.mxu3 %v2289_v23  ;;  %v2281_v47 = vld [vmem:[%s4322_s3 + $0x100] sm:$0xff]  ;;  %v2328_v52 = vld [vmem:[%s4322_s3 + $0x278] sm:$0xff]  ;;  %v2310_v56 = vld [vmem:[%s4322_s3 + $0x1e8] sm:$0xff] }
  0x20   : > { %477 = vmatpush.msra.mxu0 %v452_v24  ;;  %559 = vmatpush.msra.mxu1 %v2272_v25  ;;  %v397_v48 = vld [vmem:[%s2884_s14] sm:$0xff]  ;;  %v2344_v54 = vld [vmem:[%s4322_s3 + $0x2f8] sm:$0xff]  ;;  %v2326_v57 = vld [vmem:[%s4322_s3 + $0x268] sm:$0xff] }
  0x21   : > { %639 = vmatpush.msra.mxu2 %v2288_v26  ;;  %688 = vmatpush.msra.mxu3 %v2288_v26  ;;  %v2898_v49 = vld [vmem:[%s2884_s14 + $0x1] sm:$0xff]  ;;  %v2343_v59 = vld [vmem:[%s4322_s3 + $0x2f0] sm:$0xff]  ;;  %v2308_v63 = vld [vmem:[%s4322_s3 + $0x1d8] sm:$0xff] }
  0x22   : > { %478 = vmatpush.msra.mxu0 %v451_v27  ;;  %560 = vmatpush.msra.mxu1 %v2271_v28  ;;  %v2309_v58 = vld [vmem:[%s4322_s3 + $0x1e0] sm:$0xff]  ;;  %v398_v60 = vld [vmem:[%s2884_s14 + $0x8] sm:$0xff]  ;;  %v2307_v2 = vld [vmem:[%s4322_s3 + $0x1d0] sm:$0xff] }
  0x23   : > { %640 = vmatpush.msra.mxu2 %v2287_v29  ;;  %689 = vmatpush.msra.mxu3 %v2287_v29  ;;  %v2940_v61 = vld [vmem:[%s2884_s14 + $0x9] sm:$0xff]  ;;  %v2943_v62 = vld [vmem:[%s2884_s14 + $0x20] sm:$0xff]  ;;  %v2324_v3 = vld [vmem:[%s4322_s3 + $0x258] sm:$0xff] }
  0x24   : > { %479 = vmatpush.msra.mxu0 %v450_v30  ;;  %561 = vmatpush.msra.mxu1 %v2270_v31  ;;  %v2949_v0 = vld [vmem:[%s2937_s12] sm:$0xff]  ;;  %v2342_v4 = vld [vmem:[%s4322_s3 + $0x2e8] sm:$0xff]  ;;  %v2323_v6 = vld [vmem:[%s4322_s3 + $0x250] sm:$0xff] }
  0x25   : > { %641 = vmatpush.msra.mxu2 %v2286_v32  ;;  %690 = vmatpush.msra.mxu3 %v2286_v32  ;;  %v2325_v1 = vld [vmem:[%s4322_s3 + $0x260] sm:$0xff]  ;;  %v2306_v5 = vld [vmem:[%s4322_s3 + $0x1c8] sm:$0xff]  ;;  %v2982_v10 = vld [vmem:[%s2884_s14 + $0x30] sm:$0xff] }
  0x26   : > { %480 = vmatpush.msra.mxu0 %v449_v33  ;;  %562 = vmatpush.msra.mxu1 %v2269_v34  ;;  %v2341_v7 = vld [vmem:[%s4322_s3 + $0x2e0] sm:$0xff]  ;;  %v2304_v11 = vld [vmem:[%s4322_s3 + $0x1b8] sm:$0xff]  ;;  %v2988_v12 = vld [vmem:[%s2937_s12 + $0x8] sm:$0xff] }
  0x27   : > { %642 = vmatpush.msra.mxu2 %v2285_v35  ;;  %691 = vmatpush.msra.mxu3 %v2285_v35  ;;  %v2305_v8 = vld [vmem:[%s4322_s3 + $0x1c0] sm:$0xff]  ;;  %v2303_v13 = vld [vmem:[%s4322_s3 + $0x1b0] sm:$0xff]  ;;  %v2322_v14 = vld [vmem:[%s4322_s3 + $0x248] sm:$0xff] }
  0x28   : > { %481 = vmatpush.msra.mxu0 %v448_v36  ;;  %563 = vmatpush.msra.mxu1 %v2268_v37  ;;  %v2979_v9 = vld [vmem:[%s2884_s14 + $0x19] sm:$0xff]  ;;  %v2302_v16 = vld [vmem:[%s4322_s3 + $0x1a8] sm:$0xff]  ;;  %v2339_v18 = vld [vmem:[%s4322_s3 + $0x2d0] sm:$0xff] }
  0x29   : > { %643 = vmatpush.msra.mxu2 %v2284_v38  ;;  %692 = vmatpush.msra.mxu3 %v2284_v38  ;;  %v2340_v15 = vld [vmem:[%s4322_s3 + $0x2d8] sm:$0xff]  ;;  %v2321_v17 = vld [vmem:[%s4322_s3 + $0x240] sm:$0xff]  ;;  %v2319_v24 = vld [vmem:[%s4322_s3 + $0x230] sm:$0xff] }
  0x2a   : > { %482 = vmatpush.msra.mxu0 %v447_v39  ;;  %564 = vmatpush.msra.mxu1 %v2267_v40  ;;  %v2301_v19 = vld [vmem:[%s4322_s3 + $0x1a0] sm:$0xff]  ;;  %v2320_v20 = vld [vmem:[%s4322_s3 + $0x238] sm:$0xff]  ;;  %v2338_v25 = vld [vmem:[%s4322_s3 + $0x2c8] sm:$0xff] }
  0x2b   : > { %644 = vmatpush.msra.mxu2 %v2283_v41  ;;  %693 = vmatpush.msra.mxu3 %v2283_v41  ;;  %v3019_v21 = vld [vmem:[%s2884_s14 + $0x21] sm:$0xff]  ;;  %v3022_v22 = vld [vmem:[%s2884_s14 + $0x38] sm:$0xff]  ;;  %v2299_v26 = vld [vmem:[%s4322_s3 + $0x190] sm:$0xff] }
  0x2c   : > { %483 = vmatpush.msra.mxu0 %v446_v42  ;;  %565 = vmatpush.msra.mxu1 %v2266_v43  ;;  %v2300_v23 = vld [vmem:[%s4322_s3 + $0x198] sm:$0xff]  ;;  %v2318_v27 = vld [vmem:[%s4322_s3 + $0x228] sm:$0xff]  ;;  %v2337_v28 = vld [vmem:[%s4322_s3 + $0x2c0] sm:$0xff] }
  0x2d   : > { %645 = vmatpush.msra.mxu2 %v2282_v44  ;;  %694 = vmatpush.msra.mxu3 %v2282_v44  ;;  %v2298_v29 = vld [vmem:[%s4322_s3 + $0x188] sm:$0xff]  ;;  %v2317_v30 = vld [vmem:[%s4322_s3 + $0x220] sm:$0xff]  ;;  %v2336_v31 = vld [vmem:[%s4322_s3 + $0x2b8] sm:$0xff] }
  0x2e   : > { %484 = vmatpush.msra.mxu0 %v445_v45  ;;  %566 = vmatpush.msra.mxu1 %v2265_v46  ;;  %v2297_v32 = vld [vmem:[%s4322_s3 + $0x180] sm:$0xff]  ;;  %v2360_v33 = vld [vmem:[%s4322_s3 + $0x378] sm:$0xff]  ;;  %v3065_v35 = vld [vmem:[%s2884_s14 + $0x48] sm:$0xff] }
  0x2f   : > { %646 = vmatpush.msra.mxu2 %v2281_v47  ;;  %695 = vmatpush.msra.mxu3 %v2281_v47  ;;  %v3062_v34 = vld [vmem:[%s2884_s14 + $0x31] sm:$0xff]  ;;  %v2358_v39 = vld [vmem:[%s4322_s3 + $0x368] sm:$0xff]  ;;  %v2357_v42 = vld [vmem:[%s4322_s3 + $0x360] sm:$0xff] }
  0x30   : > { %485 = vmatmul.f32.vlgmr.msra.gmra.mxu0 %v397_v48  ;;  %567 = vmatmul.f32.vlgmr.msra.gmra.mxu1 %v2898_v49  ;;  %v2359_v36 = vld [vmem:[%s4322_s3 + $0x370] sm:$0xff]  ;;  %v2316_v38 = vld [vmem:[%s4322_s3 + $0x218] sm:$0xff]  ;;  %v2334_v40 = vld [vmem:[%s4322_s3 + $0x2a8] sm:$0xff] }
  0x31   : > { %647 = vmatmul.f32.vlgmr.msra.gmra.mxu2 %v2901_v50  ;;  %730 = vmatpush.msrb.mxu3 %v2312_v51  ;;  %v2335_v37 = vld [vmem:[%s4322_s3 + $0x2b0] sm:$0xff]  ;;  %v2333_v43 = vld [vmem:[%s4322_s3 + $0x2a0] sm:$0xff]  ;;  %v2314_v44 = vld [vmem:[%s4322_s3 + $0x208] sm:$0xff] }
  0x32   : > { %779 = vmatpush.msrb.mxu2 %v2312_v51  ;;  %855 = vmatpush.msrb.mxu0 %v2328_v52  ;;  %v2315_v41 = vld [vmem:[%s4322_s3 + $0x210] sm:$0xff]  ;;  %v2356_v45 = vld [vmem:[%s4322_s3 + $0x358] sm:$0xff]  ;;  %v2313_v52 = vld [vmem:[%s4322_s3 + $0x200] sm:$0xff] }
  0x33   : > { %731 = vmatpush.msrb.mxu3 %v2311_v53  ;;  %937 = vmatpush.msrb.mxu1 %v2344_v54  ;;  %v3105_v46 = vld [vmem:[%s2884_s14 + $0x39] sm:$0xff]  ;;  %v3109_v47 = vld [vmem:[%s2884_s14 + $0x50] sm:$0xff] }
  0x34   : > { %780 = vmatpush.msrb.mxu2 %v2311_v53  ;;  %856 = vmatpush.msrb.mxu0 %v2327_v55  ;;  %v2355_v48 = vld [vmem:[%s4322_s3 + $0x350] sm:$0xff]  ;;  %v2332_v51 = vld [vmem:[%s4322_s3 + $0x298] sm:$0xff]  ;;  %v2354_v53 = vld [vmem:[%s4322_s3 + $0x348] sm:$0xff] }
  0x35   : > { %732 = vmatpush.msrb.mxu3 %v2310_v56  ;;  %938 = vmatpush.msrb.mxu1 %v2343_v59  ;;  %v2331_v54 = vld [vmem:[%s4322_s3 + $0x290] sm:$0xff]  ;;  %v2353_v55 = vld [vmem:[%s4322_s3 + $0x340] sm:$0xff] }
  0x36   : > { %781 = vmatpush.msrb.mxu2 %v2310_v56  ;;  %857 = vmatpush.msrb.mxu0 %v2326_v57  ;;  %v2330_v56 = vld [vmem:[%s4322_s3 + $0x288] sm:$0xff]  ;;  %v3138_v57 = vld [vmem:[%s4322_s3 + $0x3f8] sm:$0xff] }
  0x37   : > { %733 = vmatpush.msrb.mxu3 %v2309_v58  ;;  %939 = vmatpush.msrb.mxu1 %v2342_v4  ;;  %v3146_v59 = vld [vmem:[%s2884_s14 + $0x49] sm:$0xff]  ;;  %v2349_v4 = vld [vmem:[%s4322_s3 + $0x320] sm:$0xff] }
  0x38   : > { %782 = vmatpush.msrb.mxu2 %v2309_v58  ;;  %488 = vmatmul.f32.gmra.mxu0 %v398_v60  ;;  %v2352_v58 = vld [vmem:[%s4322_s3 + $0x338] sm:$0xff]  ;;  %v3149_v60 = vld [vmem:[%s2937_s12 + $0x1] sm:$0xff] }
  0x39   : > { %570 = vmatmul.f32.gmra.mxu1 %v2940_v61  ;;  %650 = vmatmul.f32.gmra.mxu2 %v2943_v62 }
  0x3a   : > { %734 = vmatpush.msrb.mxu3 %v2308_v63  ;;  %783 = vmatpush.msrb.mxu2 %v2308_v63  ;;  %v2351_v63 = vld [vmem:[%s4322_s3 + $0x330] sm:$0xff] }
  0x3b   : > { %696 = vmatmul.f32.vlgmr.msra.gmra.mxu3 %v2949_v0  ;;  %858 = vmatpush.msrb.mxu0 %v2325_v1  ;;  %v2329_v1 = vld [vmem:[%s4322_s3 + $0x280] sm:$0xff] }
  0x3c   : > { %735 = vmatpush.msrb.mxu3 %v2307_v2  ;;  %784 = vmatpush.msrb.mxu2 %v2307_v2  ;;  %v2350_v2 = vld [vmem:[%s4322_s3 + $0x328] sm:$0xff] }
  0x3d   : > { %859 = vmatpush.msrb.mxu0 %v2324_v3  ;;  %940 = vmatpush.msrb.mxu1 %v2341_v7  ;;  %v2375_v3 = vld [vmem:[%s4322_s3 + $0x3f0] sm:$0xff]  ;;  %v2348_v7 = vld [vmem:[%s4322_s3 + $0x318] sm:$0xff] }
  0x3e   : > { %736 = vmatpush.msrb.mxu3 %v2306_v5  ;;  %785 = vmatpush.msrb.mxu2 %v2306_v5  ;;  %v2392_v5 = vld [vmem:[%s4322_s3 + $0x478] sm:$0xff] }
  0x3f   : > { %860 = vmatpush.msrb.mxu0 %v2323_v6  ;;  %941 = vmatpush.msrb.mxu1 %v2340_v15  ;;  %v2374_v6 = vld [vmem:[%s4322_s3 + $0x3e8] sm:$0xff] }
  0x40   : > { %737 = vmatpush.msrb.mxu3 %v2305_v8  ;;  %786 = vmatpush.msrb.mxu2 %v2305_v8  ;;  %v3179_v8 = vld [vmem:[%s2884_s14 + $0x51] sm:$0xff]  ;;  %v2346_v15 = vld [vmem:[%s4322_s3 + $0x308] sm:$0xff] }
  0x41   : > { %491 = vmatmul.f32.gmra.mxu0 %v2901_v50  ;;  %573 = vmatmul.f32.gmra.mxu1 %v2979_v9 }
  0x42   : > { %653 = vmatmul.f32.gmra.mxu2 %v2982_v10  ;;  %738 = vmatpush.msrb.mxu3 %v2304_v11 }
  0x43   : > { %787 = vmatpush.msrb.mxu2 %v2304_v11  ;;  %699 = vmatmul.f32.gmra.mxu3 %v2988_v12  ;;  %v2373_v11 = vld [vmem:[%s4322_s3 + $0x3e0] sm:$0xff] }
  0x44   : > { %739 = vmatpush.msrb.mxu3 %v2303_v13  ;;  %861 = vmatpush.msrb.mxu0 %v2322_v14  ;;  %v2347_v14 = vld [vmem:[%s4322_s3 + $0x310] sm:$0xff] }
  0x45   : > { %788 = vmatpush.msrb.mxu2 %v2303_v13  ;;  %942 = vmatpush.msrb.mxu1 %v2339_v18  ;;  %v3186_v13 = vld [vmem:[%s2937_s12 + $0x9] sm:$0xff]  ;;  %v2345_v18 = vld [vmem:[%s4322_s3 + $0x300] sm:$0xff] }
  0x46   : > { %740 = vmatpush.msrb.mxu3 %v2302_v16  ;;  %862 = vmatpush.msrb.mxu0 %v2321_v17  ;;  %v2391_v17 = vld [vmem:[%s4322_s3 + $0x470] sm:$0xff] }
  0x47   : > { %789 = vmatpush.msrb.mxu2 %v2302_v16  ;;  %943 = vmatpush.msrb.mxu1 %v2338_v25  ;;  %v2372_v16 = vld [vmem:[%s4322_s3 + $0x3d8] sm:$0xff]  ;;  %v2370_v25 = vld [vmem:[%s4322_s3 + $0x3c8] sm:$0xff] }
  0x48   : > { %741 = vmatpush.msrb.mxu3 %v2301_v19  ;;  %863 = vmatpush.msrb.mxu0 %v2320_v20  ;;  %v2390_v20 = vld [vmem:[%s4322_s3 + $0x468] sm:$0xff] }
  0x49   : > { %790 = vmatpush.msrb.mxu2 %v2301_v19  ;;  %494 = vmatmul.f32.gmra.mxu0 %v2943_v62  ;;  %v2371_v19 = vld [vmem:[%s4322_s3 + $0x3d0] sm:$0xff] }
  0x4a   : > { %576 = vmatmul.f32.gmra.mxu1 %v3019_v21  ;;  %656 = vmatmul.f32.gmra.mxu2 %v3022_v22 }
  0x4b   : > { %742 = vmatpush.msrb.mxu3 %v2300_v23  ;;  %791 = vmatpush.msrb.mxu2 %v2300_v23  ;;  %v413_v23 = vld [vmem:[%s2884_s14 + $0x2] sm:$0xff] }
  0x4c   : > { %864 = vmatpush.msrb.mxu0 %v2319_v24  ;;  %944 = vmatpush.msrb.mxu1 %v2337_v28  ;;  %v2389_v24 = vld [vmem:[%s4322_s3 + $0x460] sm:$0xff]  ;;  %v2387_v28 = vld [vmem:[%s4322_s3 + $0x450] sm:$0xff] }
  0x4d   : > { %743 = vmatpush.msrb.mxu3 %v2299_v26  ;;  %792 = vmatpush.msrb.mxu2 %v2299_v26  ;;  %v2369_v26 = vld [vmem:[%s4322_s3 + $0x3c0] sm:$0xff] }
  0x4e   : > { %865 = vmatpush.msrb.mxu0 %v2318_v27  ;;  %945 = vmatpush.msrb.mxu1 %v2336_v31  ;;  %v414_v27 = vld [vmem:[%s2884_s14 + $0xa] sm:$0xff]  ;;  %v2385_v31 = vld [vmem:[%s4322_s3 + $0x440] sm:$0xff] }
  0x4f   : > { %744 = vmatpush.msrb.mxu3 %v2298_v29  ;;  %793 = vmatpush.msrb.mxu2 %v2298_v29  ;;  %v2386_v29 = vld [vmem:[%s4322_s3 + $0x448] sm:$0xff] }
  0x50   : > { %866 = vmatpush.msrb.mxu0 %v2317_v30  ;;  %946 = vmatpush.msrb.mxu1 %v2335_v37  ;;  %v2368_v30 = vld [vmem:[%s4322_s3 + $0x3b8] sm:$0xff]  ;;  %v2382_v37 = vld [vmem:[%s4322_s3 + $0x428] sm:$0xff] }
  0x51   : > { %745 = vmatpush.msrb.mxu3 %v2297_v32  ;;  %794 = vmatpush.msrb.mxu2 %v2297_v32  ;;  %v2384_v32 = vld [vmem:[%s4322_s3 + $0x438] sm:$0xff] }
  0x52   : > { %746 = vmatmul.f32.vlgmr.msrb.gmra.mxu3 %v2979_v9  ;;  %497 = vmatmul.f32.gmra.mxu0 %v2982_v10 }
  0x53   : > { %1017 = vmatpush.msra.mxu2 %v2360_v33  ;;  %579 = vmatmul.f32.gmra.mxu1 %v3062_v34 }
  0x54   : > { %659 = vmatmul.f32.gmra.mxu2 %v3065_v35  ;;  %1066 = vmatpush.msra.mxu3 %v2360_v33  ;;  %v415_v33 = vld [vmem:[%s2884_s14 + $0x1a] sm:$0xff] }
  0x55   : > { %1018 = vmatpush.msra.mxu2 %v2359_v36  ;;  %867 = vmatpush.msrb.mxu0 %v2316_v38  ;;  %v2366_v38 = vld [vmem:[%s4322_s3 + $0x3a8] sm:$0xff] }
  0x56   : > { %1067 = vmatpush.msra.mxu3 %v2359_v36  ;;  %947 = vmatpush.msrb.mxu1 %v2334_v40  ;;  %v2383_v36 = vld [vmem:[%s4322_s3 + $0x430] sm:$0xff]  ;;  %v2365_v40 = vld [vmem:[%s4322_s3 + $0x3a0] sm:$0xff] }
  0x57   : > { %1019 = vmatpush.msra.mxu2 %v2358_v39  ;;  %868 = vmatpush.msrb.mxu0 %v2315_v41  ;;  %v2380_v41 = vld [vmem:[%s4322_s3 + $0x418] sm:$0xff] }
  0x58   : > { %1068 = vmatpush.msra.mxu3 %v2358_v39  ;;  %948 = vmatpush.msrb.mxu1 %v2333_v43  ;;  %v2381_v39 = vld [vmem:[%s4322_s3 + $0x420] sm:$0xff]  ;;  %v2364_v43 = vld [vmem:[%s4322_s3 + $0x398] sm:$0xff] }
  0x59   : > { %1020 = vmatpush.msra.mxu2 %v2357_v42  ;;  %869 = vmatpush.msrb.mxu0 %v2314_v44  ;;  %v2379_v44 = vld [vmem:[%s4322_s3 + $0x410] sm:$0xff] }
  0x5a   : > { %749 = vmatmul.f32.gmra.mxu3 %v3019_v21  ;;  %500 = vmatmul.f32.gmra.mxu0 %v3022_v22 }
  0x5b   : > { %1021 = vmatpush.msra.mxu2 %v2356_v45  ;;  %1069 = vmatpush.msra.mxu3 %v2357_v42  ;;  %v416_v42 = vld [vmem:[%s2884_s14 + $0x22] sm:$0xff] }
  0x5c   : > { %582 = vmatmul.f32.gmra.mxu1 %v3105_v46  ;;  %662 = vmatmul.f32.gmra.mxu2 %v3109_v47 }
  0x5d   : > { %1070 = vmatpush.msra.mxu3 %v2356_v45  ;;  %1022 = vmatpush.msra.mxu2 %v2355_v48  ;;  %v2363_v45 = vld [vmem:[%s4322_s3 + $0x390] sm:$0xff] }
  0x5e   : > { %949 = vmatpush.msrb.mxu1 %v2332_v51  ;;  %870 = vmatpush.msrb.mxu0 %v2313_v52  ;;  %v2362_v51 = vld [vmem:[%s4322_s3 + $0x388] sm:$0xff]  ;;  %v2377_v52 = vld [vmem:[%s4322_s3 + $0x400] sm:$0xff] }
  0x5f   : > { %1071 = vmatpush.msra.mxu3 %v2355_v48  ;;  %1023 = vmatpush.msra.mxu2 %v2354_v53  ;;  %v2378_v48 = vld [vmem:[%s4322_s3 + $0x408] sm:$0xff] }
  0x60   : > { %950 = vmatpush.msrb.mxu1 %v2331_v54  ;;  %1165 = vmatpush.msra.mxu0 %v3138_v57  ;;  %v2361_v54 = vld [vmem:[%s4322_s3 + $0x380] sm:$0xff] }
  0x61   : > { %1072 = vmatpush.msra.mxu3 %v2354_v53  ;;  %1024 = vmatpush.msra.mxu2 %v2353_v55  ;;  %v2408_v53 = vld [vmem:[%s4322_s3 + $0x4f8] sm:$0xff] }
  0x62   : > { %752 = vmatmul.f32.gmra.mxu3 %v3062_v34  ;;  %951 = vmatpush.msrb.mxu1 %v2330_v56  ;;  %v417_v56 = vld [vmem:[%s2884_s14 + $0x32] sm:$0xff] }
  0x63   : > { %1073 = vmatpush.msra.mxu3 %v2353_v55  ;;  %1025 = vmatpush.msra.mxu2 %v2352_v58  ;;  %v2407_v55 = vld [vmem:[%s4322_s3 + $0x4f0] sm:$0xff] }
  0x64   : > { %503 = vmatmul.f32.gmra.mxu0 %v3065_v35  ;;  %585 = vmatmul.f32.gmra.mxu1 %v3146_v59 }
  0x65   : > { %795 = vmatmul.f32.vlgmr.msrb.gmra.mxu2 %v3149_v60  ;;  %1074 = vmatpush.msra.mxu3 %v2352_v58  ;;  %v3312_v58 = vld [vmem:[%s4322_s3 + $0x578] sm:$0xff] }
  0x66   : > { %1026 = vmatpush.msra.mxu2 %v2351_v63  ;;  %952 = vmatpush.msrb.mxu1 %v2329_v1  ;;  %v3321_v1 = vld [vmem:[%s4322_s3 + $0x570] sm:$0xff] }
  0x67   : > { %1166 = vmatpush.msra.mxu0 %v2375_v3  ;;  %1075 = vmatpush.msra.mxu3 %v2351_v63  ;;  %v2405_v63 = vld [vmem:[%s4322_s3 + $0x4e0] sm:$0xff] }
  0x68   : > { %1027 = vmatpush.msra.mxu2 %v2350_v2  ;;  %1239 = vmatpush.msra.mxu1 %v2392_v5 }
  0x69   : > { %1167 = vmatpush.msra.mxu0 %v2374_v6  ;;  %1076 = vmatpush.msra.mxu3 %v2350_v2  ;;  %v2404_v2 = vld [vmem:[%s4322_s3 + $0x4d8] sm:$0xff] }
  0x6a   : > { %1028 = vmatpush.msra.mxu2 %v2349_v4  ;;  %755 = vmatmul.f32.gmra.mxu3 %v3105_v46 }
  0x6b   : > { %1168 = vmatpush.msra.mxu0 %v2373_v11  ;;  %1077 = vmatpush.msra.mxu3 %v2349_v4  ;;  %v2403_v4 = vld [vmem:[%s4322_s3 + $0x4d0] sm:$0xff] }
  0x6c   : > { %1029 = vmatpush.msra.mxu2 %v2348_v7  ;;  %506 = vmatmul.f32.gmra.mxu0 %v3109_v47 }
  0x6d   : > { %588 = vmatmul.f32.gmra.mxu1 %v3179_v8  ;;  %798 = vmatmul.f32.gmra.mxu2 %v3186_v13 }
  0x6e   : > { %1078 = vmatpush.msra.mxu3 %v2348_v7  ;;  %1030 = vmatpush.msra.mxu2 %v2347_v14  ;;  %v3347_v7 = vld [vmem:[%s4322_s3 + $0x560] sm:$0xff] }
  0x6f   : > { %1169 = vmatpush.msra.mxu0 %v2372_v16  ;;  %1240 = vmatpush.msra.mxu1 %v2391_v17 }
  0x70   : > { %1079 = vmatpush.msra.mxu3 %v2347_v14  ;;  %1031 = vmatpush.msra.mxu2 %v2346_v15  ;;  %v3359_v14 = vld [vmem:[%s4322_s3 + $0x558] sm:$0xff] }
  0x71   : > { %1170 = vmatpush.msra.mxu0 %v2371_v19  ;;  %1241 = vmatpush.msra.mxu1 %v2390_v20 }
  0x72   : > { %1080 = vmatpush.msra.mxu3 %v2346_v15  ;;  %1032 = vmatpush.msra.mxu2 %v2345_v18  ;;  %v3366_v15 = vld [vmem:[%s4322_s3 + $0x4b8] sm:$0xff] }
  0x73   : > { %758 = vmatmul.f32.gmra.mxu3 %v3146_v59  ;;  %1242 = vmatpush.msra.mxu1 %v2389_v24 }
  0x74   : > { %1288 = vmatpush.msrb.mxu2 %v2392_v5  ;;  %1081 = vmatpush.msra.mxu3 %v2345_v18  ;;  %v418_v5 = vld [vmem:[%s2884_s14 + $0x3a] sm:$0xff]  ;;  %v3387_v18 = vld [vmem:[%s4322_s3 + $0x548] sm:$0xff] }
  0x75   : > { %871 = vmatmul.f32.vlgmr.msrb.gmra.mxu0 %v2898_v49  ;;  %953 = vmatmul.f32.vlgmr.msrb.gmra.mxu1 %v413_v23  ;;  %v2388_v49 = vld [vmem:[%s4322_s3 + $0x458] sm:$0xff]  ;;  %v3401_v23 = vld [vmem:[%s4322_s3 + $0x540] sm:$0xff] }
  0x76   : > { %1033 = vmatmul.f32.vlgmr.msra.gmra.mxu2 %v2979_v9  ;;  %1116 = vmatpush.msrb.mxu3 %v3138_v57  ;;  %v2406_v57 = vld [vmem:[%s4322_s3 + $0x4e8] sm:$0xff] }
  0x77   : > { %1289 = vmatpush.msrb.mxu2 %v2391_v17  ;;  %1171 = vmatpush.msra.mxu0 %v2370_v25  ;;  %v3379_v17 = vld [vmem:[%s4322_s3 + $0x4b0] sm:$0xff] }
  0x78   : > { %1117 = vmatpush.msrb.mxu3 %v2375_v3  ;;  %1243 = vmatpush.msra.mxu1 %v2388_v49  ;;  %v3330_v3 = vld [vmem:[%s4322_s3 + $0x568] sm:$0xff] }
  0x79   : > { %1290 = vmatpush.msrb.mxu2 %v2390_v20  ;;  %1172 = vmatpush.msra.mxu0 %v2369_v26  ;;  %v3394_v20 = vld [vmem:[%s4322_s3 + $0x4a8] sm:$0xff] }
  0x7a   : > { %1118 = vmatpush.msrb.mxu3 %v2374_v6  ;;  %1244 = vmatpush.msra.mxu1 %v2387_v28  ;;  %v3342_v6 = vld [vmem:[%s4322_s3 + $0x4c8] sm:$0xff] }
  0x7b   : > { %1291 = vmatpush.msrb.mxu2 %v2389_v24  ;;  %761 = vmatmul.f32.gmra.mxu3 %v3179_v8  ;;  %v3407_v24 = vld [vmem:[%s4322_s3 + $0x4a0] sm:$0xff] }
  0x7c   : > { %1119 = vmatpush.msrb.mxu3 %v2373_v11  ;;  %1245 = vmatpush.msra.mxu1 %v2386_v29  ;;  %v3354_v11 = vld [vmem:[%s4322_s3 + $0x4c0] sm:$0xff] }
  0x7d   : > { %1292 = vmatpush.msrb.mxu2 %v2388_v49  ;;  %874 = vmatmul.f32.gmra.mxu0 %v2940_v61  ;;  %v2367_v61 = vld [vmem:[%s4322_s3 + $0x3b0] sm:$0xff]  ;;  %v3419_v49 = vld [vmem:[%s4322_s3 + $0x498] sm:$0xff] }
  0x7e   : > { %956 = vmatmul.f32.gmra.mxu1 %v414_v27  ;;  %1036 = vmatmul.f32.gmra.mxu2 %v3019_v21  ;;  %v3432_v27 = vld [vmem:[%s4322_s3 + $0x490] sm:$0xff] }
  0x7f   : > { %1120 = vmatpush.msrb.mxu3 %v2372_v16  ;;  %1293 = vmatpush.msrb.mxu2 %v2387_v28  ;;  %v3371_v16 = vld [vmem:[%s4322_s3 + $0x550] sm:$0xff]  ;;  %v3439_v28 = vld [vmem:[%s4322_s3 + $0x528] sm:$0xff] }
  0x80   : > { %1173 = vmatpush.msra.mxu0 %v2368_v30  ;;  %1246 = vmatpush.msra.mxu1 %v2385_v31 }
  0x81   : > { %1121 = vmatpush.msrb.mxu3 %v2371_v19  ;;  %1294 = vmatpush.msrb.mxu2 %v2386_v29  ;;  %v419_v19 = vld [vmem:[%s2884_s14 + $0x4a] sm:$0xff]  ;;  %v420_v29 = vld [vmem:[%s2884_s14 + $0x52] sm:$0xff] }
  0x82   : > { %1174 = vmatpush.msra.mxu0 %v2367_v61  ;;  %1247 = vmatpush.msra.mxu1 %v2384_v32 }
  0x83   : > { %1122 = vmatpush.msrb.mxu3 %v2370_v25  ;;  %1295 = vmatpush.msrb.mxu2 %v2385_v31  ;;  %v3413_v25 = vld [vmem:[%s4322_s3 + $0x538] sm:$0xff] }
  0x84   : > { %1082 = vmatmul.f32.vlgmr.msra.gmra.mxu3 %v3149_v60  ;;  %1248 = vmatpush.msra.mxu1 %v2383_v36 }
  0x85   : > { %1123 = vmatpush.msrb.mxu3 %v2369_v26  ;;  %1296 = vmatpush.msrb.mxu2 %v2384_v32  ;;  %v3426_v26 = vld [vmem:[%s4322_s3 + $0x530] sm:$0xff]  ;;  %v3463_v32 = vld [vmem:[%s4322_s3 + $0x480] sm:$0xff] }
  0x86   : > { %877 = vmatmul.f32.gmra.mxu0 %v2979_v9  ;;  %959 = vmatmul.f32.gmra.mxu1 %v415_v33 }
  0x87   : > { %1039 = vmatmul.f32.gmra.mxu2 %v3062_v34  ;;  %1124 = vmatpush.msrb.mxu3 %v2368_v30 }
  0x88   : > { %1297 = vmatpush.msrb.mxu2 %v2383_v36  ;;  %1175 = vmatpush.msra.mxu0 %v2366_v38  ;;  %v3478_v36 = vld [vmem:[%s4322_s3 + $0x510] sm:$0xff] }
  0x89   : > { %1125 = vmatpush.msrb.mxu3 %v2367_v61  ;;  %1249 = vmatpush.msra.mxu1 %v2382_v37  ;;  %v3457_v61 = vld [vmem:[%s4322_s3 + $0x520] sm:$0xff] }
  0x8a   : > { %1298 = vmatpush.msrb.mxu2 %v2382_v37  ;;  %1176 = vmatpush.msra.mxu0 %v2365_v40  ;;  %v3484_v37 = vld [vmem:[%s2937_s12 + $0x2] sm:$0xff] }
  0x8b   : > { %1126 = vmatpush.msrb.mxu3 %v2366_v38  ;;  %1250 = vmatpush.msra.mxu1 %v2381_v39 }
  0x8c   : > { %1299 = vmatpush.msrb.mxu2 %v2381_v39  ;;  %1085 = vmatmul.f32.gmra.mxu3 %v3186_v13  ;;  %v3492_v39 = vld [vmem:[%s4322_s3 + $0x508] sm:$0xff] }
  0x8d   : > { %1127 = vmatpush.msrb.mxu3 %v2365_v40  ;;  %1177 = vmatpush.msra.mxu0 %v2364_v43 }
  0x8e   : > { %1300 = vmatpush.msrb.mxu2 %v2380_v41  ;;  %880 = vmatmul.f32.gmra.mxu0 %v3019_v21 }
  0x8f   : > { %962 = vmatmul.f32.gmra.mxu1 %v416_v42  ;;  %1042 = vmatmul.f32.gmra.mxu2 %v3105_v46 }
  0x90   : > { %1128 = vmatpush.msrb.mxu3 %v2364_v43  ;;  %1301 = vmatpush.msrb.mxu2 %v2379_v44  ;;  %v3512_v43 = vld [vmem:[%s4322_s3 + $0x5f8] sm:$0xff] }
  0x91   : > { %1251 = vmatpush.msra.mxu1 %v2380_v41  ;;  %1178 = vmatpush.msra.mxu0 %v2363_v45 }
  0x92   : > { %1129 = vmatpush.msrb.mxu3 %v2363_v45  ;;  %1302 = vmatpush.msrb.mxu2 %v2378_v48  ;;  %v3534_v45 = vld [vmem:[%s4322_s3 + $0x5e8] sm:$0xff] }
  0x93   : > { %1252 = vmatpush.msra.mxu1 %v2379_v44  ;;  %1179 = vmatpush.msra.mxu0 %v2362_v51 }
  0x94   : > { %1130 = vmatpush.msrb.mxu3 %v2362_v51  ;;  %1303 = vmatpush.msrb.mxu2 %v2377_v52 }
  0x95   : > { %1253 = vmatpush.msra.mxu1 %v2378_v48  ;;  %1180 = vmatpush.msra.mxu0 %v2361_v54  ;;  %v3539_v48 = vld [vmem:[%s2937_s12 + $0xa] sm:$0xff] }
  0x96   : > { %1387 = vmatpush.msra.mxu2 %v2408_v53  ;;  %1131 = vmatpush.msrb.mxu3 %v2361_v54  ;;  %v3563_v54 = vld [vmem:[%s4322_s3 + $0x5d8] sm:$0xff] }
  0x97   : > { %883 = vmatmul.f32.gmra.mxu0 %v3062_v34  ;;  %1132 = vmatmul.f32.vlgmr.msrb.gmra.mxu3 %v415_v33  ;;  %v3469_v33 = vld [vmem:[%s4322_s3 + $0x518] sm:$0xff] }
  0x98   : > { %1388 = vmatpush.msra.mxu2 %v2407_v55  ;;  %965 = vmatmul.f32.gmra.mxu1 %v417_v56 }
  0x99   : > { %1045 = vmatmul.f32.gmra.mxu2 %v3146_v59  ;;  %1435 = vmatpush.msra.mxu3 %v3312_v58 }
  0x9a   : > { %1389 = vmatpush.msra.mxu2 %v2406_v57  ;;  %1254 = vmatpush.msra.mxu1 %v2377_v52  ;;  %v3552_v52 = vld [vmem:[%s4322_s3 + $0x5e0] sm:$0xff] }
  0x9b   : > { %1436 = vmatpush.msra.mxu3 %v3321_v1  ;;  %1338 = vmatpush.msrb.mxu0 %v2408_v53 }
  0x9c   : > { %1390 = vmatpush.msra.mxu2 %v2405_v63  ;;  %1474 = vmatpush.msrb.mxu1 %v3312_v58 }
  0x9d   : > { %1437 = vmatpush.msra.mxu3 %v3330_v3  ;;  %1339 = vmatpush.msrb.mxu0 %v2407_v55 }
  0x9e   : > { %1391 = vmatpush.msra.mxu2 %v2404_v2  ;;  %1475 = vmatpush.msrb.mxu1 %v3321_v1 }
  0x9f   : > { %886 = vmatmul.f32.gmra.mxu0 %v3105_v46  ;;  %1135 = vmatmul.f32.gmra.mxu3 %v416_v42  ;;  %v3505_v42 = vld [vmem:[%s4322_s3 + $0x500] sm:$0xff] }
  0xa0   : > { %1392 = vmatpush.msra.mxu2 %v2403_v4  ;;  %968 = vmatmul.f32.gmra.mxu1 %v418_v5 }
  0xa1   : > { %1048 = vmatmul.f32.gmra.mxu2 %v3179_v8  ;;  %1438 = vmatpush.msra.mxu3 %v3347_v7 }
  0xa2   : > { %1393 = vmatpush.msra.mxu2 %v3342_v6  ;;  %1340 = vmatpush.msrb.mxu0 %v2406_v57  ;;  %v3590_v57 = vld [vmem:[%s4322_s3 + $0x5c8] sm:$0xff] }
  0xa3   : > { %1439 = vmatpush.msra.mxu3 %v3359_v14  ;;  %1476 = vmatpush.msrb.mxu1 %v3330_v3 }
  0xa4   : > { %1394 = vmatpush.msra.mxu2 %v3354_v11  ;;  %1341 = vmatpush.msrb.mxu0 %v2405_v63  ;;  %v3609_v63 = vld [vmem:[%s4322_s3 + $0x5c0] sm:$0xff] }
  0xa5   : > { %1440 = vmatpush.msra.mxu3 %v3371_v16  ;;  %1477 = vmatpush.msrb.mxu1 %v3347_v7 }
  0xa6   : > { %1395 = vmatpush.msra.mxu2 %v3366_v15  ;;  %1342 = vmatpush.msrb.mxu0 %v2404_v2  ;;  %v3624_v2 = vld [vmem:[%s4322_s3 + $0x5b8] sm:$0xff] }
  0xa7   : > { %889 = vmatmul.f32.gmra.mxu0 %v3146_v59  ;;  %1138 = vmatmul.f32.gmra.mxu3 %v417_v56 }
  0xa8   : > { %1396 = vmatpush.msra.mxu2 %v3379_v17  ;;  %1441 = vmatpush.msra.mxu3 %v3387_v18 }
  0xa9   : > { %971 = vmatmul.f32.gmra.mxu1 %v419_v19  ;;  %1304 = vmatmul.f32.vlgmr.msrb.gmra.mxu2 %v2949_v0  ;;  %v3451_v0 = vld [vmem:[%s4322_s3 + $0x488] sm:$0xff] }
  0xaa   : > { %1397 = vmatpush.msra.mxu2 %v3394_v20  ;;  %1442 = vmatpush.msra.mxu3 %v3401_v23 }
  0xab   : > { %1478 = vmatpush.msrb.mxu1 %v3359_v14  ;;  %1343 = vmatpush.msrb.mxu0 %v2403_v4  ;;  %v3648_v4 = vld [vmem:[%s4322_s3 + $0x5a8] sm:$0xff] }
  0xac   : > { %1398 = vmatpush.msra.mxu2 %v3407_v24  ;;  %1443 = vmatpush.msra.mxu3 %v3413_v25 }
  0xad   : > { %v3442_v30 = vpop.f32.mrf.mxu0  ;;  %v3444_v31 = vpop.f32.mrf.mxu1  ;;  %1479 = vmatpush.msrb.mxu1 %v3371_v16  ;;  %1344 = vmatpush.msrb.mxu0 %v3342_v6 }
  0xae   : > { %1399 = vmatpush.msra.mxu2 %v3419_v49  ;;  %1444 = vmatpush.msra.mxu3 %v3426_v26 }
  0xaf   : > { %892 = vmatmul.f32.gmra.mxu0 %v3179_v8  ;;  %1141 = vmatmul.f32.gmra.mxu3 %v418_v5 }
  0xb0   : > { %1400 = vmatpush.msra.mxu2 %v3432_v27  ;;  %1445 = vmatpush.msra.mxu3 %v3439_v28 }
  0xb1   : > { %974 = vmatmul.f32.gmra.mxu1 %v420_v29  ;;  %1345 = vmatpush.msrb.mxu0 %v3354_v11  ;;  %v3668_v11 = vld [vmem:[%s4322_s3 + $0x5a0] sm:$0xff] }
  0xb2   : > { %1401 = vmatpush.msra.mxu2 %v3451_v0  ;;  %1446 = vmatpush.msra.mxu3 %v3457_v61 }
  0xb3   : > { %1480 = vmatpush.msrb.mxu1 %v3387_v18  ;;  %1346 = vmatpush.msrb.mxu0 %v3366_v15 }
  0xb4   : > { %1402 = vmatpush.msra.mxu2 %v3463_v32  ;;  %1447 = vmatpush.msra.mxu3 %v3469_v33  ;;  %v3486_v38 = vpop.f32.mrf.mxu2 }
  0xb5   : > { %1481 = vmatpush.msrb.mxu1 %v3401_v23  ;;  %v3495_v40 = vpop.f32.mrf.mxu0  ;;  %1307 = vmatmul.f32.gmra.mxu2 %v2988_v12 }
  0xb6   : > { %1503 = vmatpush.msrb.mxu2 %v3312_v58  ;;  %1448 = vmatpush.msra.mxu3 %v3478_v36  ;;  %v3499_v41 = vpop.f32.mrf.mxu1 }
  0xb7   : > { %1144 = vmatmul.f32.gmra.mxu3 %v419_v19  ;;  %1181 = vmatmul.f32.vlgmr.msra.gmra.mxu0 %v3484_v37  ;;  %v3704_v19 = vld [vmem:[%s4322_s3 + $0x590] sm:$0xff] }
  0xb8   : > { %1504 = vmatpush.msrb.mxu2 %v3321_v1  ;;  %1449 = vmatpush.msra.mxu3 %v3492_v39 }
  0xb9   : > { %1255 = vmatmul.f32.vlgmr.msra.gmra.mxu1 %v2901_v50  ;;  %v3523_v50 = vld [vmem:[%s4322_s3 + $0x5f0] sm:$0xff]  ;;  %1347 = vmatpush.msrb.mxu0 %v3379_v17  ;;  %v427_v17 = vld [vmem:[%s3673_s6] sm:$0xff] }
  0xba   : > { %1505 = vmatpush.msrb.mxu2 %v3330_v3  ;;  %1450 = vmatpush.msra.mxu3 %v3505_v42 }
  0xbb   : > { %1482 = vmatpush.msrb.mxu1 %v3413_v25  ;;  %1348 = vmatpush.msrb.mxu0 %v3394_v20 }
  0xbc   : > { %1506 = vmatpush.msrb.mxu2 %v3347_v7  ;;  %1551 = vmatpush.msrb.mxu3 %v3512_v43  ;;  %v3527_v44 = vpop.f32.mrf.mxu2 }
  0xbd   : > { %1483 = vmatpush.msrb.mxu1 %v3426_v26  ;;  %1349 = vmatpush.msrb.mxu0 %v3407_v24 }
  0xbe   : > { %1507 = vmatpush.msrb.mxu2 %v3359_v14  ;;  %1552 = vmatpush.msrb.mxu3 %v3523_v50  ;;  %v3541_v12 = vpop.f32.mrf.mxu0  ;;  %v3543_v51 = vpop.f32.mrf.mxu1 }
  0xbf   : > { %1484 = vmatpush.msrb.mxu1 %v3439_v28  ;;  %1147 = vmatmul.f32.gmra.mxu3 %v420_v29  ;;  %v3555_v53 = vpop.f32.mrf.mxu3 }
  0xc0   : > { %1508 = vmatpush.msrb.mxu2 %v3371_v16  ;;  %1553 = vmatpush.msrb.mxu3 %v3534_v45  ;;  %v3689_v16 = vld [vmem:[%s4322_s3 + $0x598] sm:$0xff] }
  0xc1   : > { %1184 = vmatmul.f32.gmra.mxu0 %v3539_v48  ;;  %1258 = vmatmul.f32.gmra.mxu1 %v2943_v62  ;;  %v3577_v62 = vld [vmem:[%s4322_s3 + $0x5d0] sm:$0xff] }
  0xc2   : > { %1509 = vmatpush.msrb.mxu2 %v3387_v18  ;;  %1485 = vmatpush.msrb.mxu1 %v3457_v61 }
  0xc3   : > { %1554 = vmatpush.msrb.mxu3 %v3552_v52  ;;  %1350 = vmatpush.msrb.mxu0 %v3419_v49  ;;  %v3721_v49 = vld [vmem:[%s4322_s3 + $0x588] sm:$0xff] }
  0xc4   : > { %1510 = vmatpush.msrb.mxu2 %v3401_v23  ;;  %1486 = vmatpush.msrb.mxu1 %v3469_v33 }
  0xc5   : > { %1555 = vmatpush.msrb.mxu3 %v3563_v54  ;;  %v3579_v55 = vpop.f32.mrf.mxu2  ;;  %1351 = vmatpush.msrb.mxu0 %v3432_v27  ;;  %v2462_v27 = vld [vmem:[%s4322_s3 + $0x668] sm:$0xff] }
  0xc6   : > { %1403 = vmatmul.f32.vlgmr.msra.gmra.mxu2 %v3149_v60  ;;  %v3583_v56 = vpop.f32.mrf.mxu0  ;;  %1487 = vmatpush.msrb.mxu1 %v3478_v36  ;;  %v3602_v60 = vld [vmem:[%s4323_s4] ss:$0 sm:$0xff] }
  0xc7   : > { %1511 = vmatpush.msrb.mxu2 %v3413_v25  ;;  %v3592_v58 = vpop.f32.mrf.mxu1  ;;  %1556 = vmatpush.msrb.mxu3 %v3577_v62  ;;  %v3617_v1 = vpop.f32.mrf.mxu3  ;;  %v511_v15 = vadd.f32 %v3602_v60, %v3495_v40  ;;  %v2463_v25 = vld [vmem:[%s4322_s3 + $0x670] sm:$0xff]  ;;  %v512_v29 = vadd.f32 %v3602_v60, %v3541_v12  ;;  %v2457_v12 = vld [vmem:[%s4322_s3 + $0x640] sm:$0xff] }
  0xc8   : > { %1352 = vmatpush.msrb.mxu0 %v3451_v0  ;;  %1488 = vmatpush.msrb.mxu1 %v3492_v39  ;;  %v2461_v0 = vld [vmem:[%s4322_s3 + $0x660] sm:$0xff] }
  0xc9   : > { %1512 = vmatpush.msrb.mxu2 %v3426_v26  ;;  %1557 = vmatpush.msrb.mxu3 %v3590_v57  ;;  %v593_v24 = vadd.f32 %v3499_v41, %v511_v15  ;;  %v2598_v15 = vld [vmem:[%s2937_s12] sm:$0xff] }
  0xca   : > { %1353 = vmatpush.msrb.mxu0 %v3463_v32  ;;  %1451 = vmatmul.f32.vlgmr.msra.gmra.mxu3 %v2982_v10  ;;  %v2460_v32 = vld [vmem:[%s4322_s3 + $0x658] sm:$0xff] }
  0xcb   : > { %1261 = vmatmul.f32.gmra.mxu1 %v2982_v10  ;;  %1354 = vmatmul.f32.vlgmr.msrb.gmra.mxu0 %v2979_v9  ;;  %v510_v10 = vadd.f32 %v3602_v60, %v3442_v30  ;;  %v3637_v9 = vld [vmem:[%s4322_s3 + $0x5b0] sm:$0xff]  ;;  %v667_v26 = vadd.f32 %v3527_v44, %v593_v24  ;;  %v3738_v30 = vld [vmem:[%s4322_s3 + $0x580] sm:$0xff]  ;;  %v513_v44 = vadd.f32 %v3602_v60, %v3583_v56 }
  0xcc   : > { %1489 = vmatpush.msrb.mxu1 %v3505_v42  ;;  %1513 = vmatpush.msrb.mxu2 %v3439_v28  ;;  %v2477_v24 = vld [vmem:[%s4322_s3 + $0x6e0] sm:$0xff] }
  0xcd   : > { %1558 = vmatpush.msrb.mxu3 %v3609_v63  ;;  %v3628_v3 = vpop.f32.mrf.mxu2  ;;  %1590 = vmatpush.msra.mxu0 %v3512_v43  ;;  %v592_v7 = vadd.f32 %v3444_v31, %v510_v10  ;;  %v2454_v10 = vld [vmem:[%s4322_s3 + $0x628] sm:$0xff] }
  0xce   : > { %1619 = vmatpush.msra.mxu1 %v3512_v43  ;;  %1514 = vmatpush.msrb.mxu2 %v3457_v61 }
  0xcf   : > { %1559 = vmatpush.msrb.mxu3 %v3624_v2  ;;  %1406 = vmatmul.f32.gmra.mxu2 %v3186_v13  ;;  %v3650_v5 = vpop.f32.mrf.mxu0  ;;  %v666_v13 = vadd.f32 %v3486_v38, %v592_v7  ;;  %v2459_v38 = vld [vmem:[%s4322_s3 + $0x650] sm:$0xff] }
  0xd0   : > { %1620 = vmatpush.msra.mxu1 %v3523_v50  ;;  %v3652_v6 = vpop.f32.mrf.mxu1  ;;  %1515 = vmatpush.msrb.mxu2 %v3469_v33 }
  0xd1   : > { %1560 = vmatpush.msrb.mxu3 %v3637_v9  ;;  %1591 = vmatpush.msra.mxu0 %v3523_v50 }
  0xd2   : > { %1621 = vmatpush.msra.mxu1 %v3534_v45  ;;  %1516 = vmatpush.msrb.mxu2 %v3478_v36  ;;  %v594_v36 = vadd.f32 %v3543_v51, %v512_v29  ;;  %v2449_v29 = vld [vmem:[%s4322_s3 + $0x600] sm:$0xff] }
  0xd3   : > { %1561 = vmatpush.msrb.mxu3 %v3648_v4  ;;  %1592 = vmatpush.msra.mxu0 %v3534_v45 }
  0xd4   : > { %1454 = vmatmul.f32.gmra.mxu3 %v3022_v22  ;;  %1622 = vmatpush.msra.mxu1 %v3552_v52 }
  0xd5   : > { %1357 = vmatmul.f32.gmra.mxu0 %v3019_v21  ;;  %v747_v14 = vpop.f32.mrf.mxu3  ;;  %1264 = vmatmul.f32.gmra.mxu1 %v3022_v22  ;;  %v2464_v22 = vld [vmem:[%s4322_s3 + $0x678] sm:$0xff] }
  0xd6   : > { %1517 = vmatpush.msrb.mxu2 %v3492_v39  ;;  %v765_v21 = vadd.f32 %v747_v14, %v666_v13  ;;  %1562 = vmatpush.msrb.mxu3 %v3668_v11  ;;  %v668_v39 = vadd.f32 %v3579_v55, %v594_v36  ;;  %v2456_v55 = vld [vmem:[%s4322_s3 + $0x638] sm:$0xff]  ;;  %v2453_v14 = vld [vmem:[%s4322_s3 + $0x620] sm:$0xff] }
  0xd7   : > { %1593 = vmatpush.msra.mxu0 %v3552_v52  ;;  %v3694_v18 = vpop.f32.mrf.mxu2  ;;  %1623 = vmatpush.msra.mxu1 %v3563_v54  ;;  %v3709_v20 = vpop.f32.mrf.mxu0  ;;  %v428_v52 = vld [vmem:[%s3673_s6 + $0x8] sm:$0xff]  ;;  %v2473_v36 = vld [vmem:[%s4322_s3 + $0x6c0] sm:$0xff] }
  0xd8   : > { %1518 = vmatpush.msrb.mxu2 %v3505_v42  ;;  %814 = vst [vmem:[%s3680_s9] sm:$0xff] %v765_v21  ;;  %1563 = vmatpush.msrb.mxu3 %v3689_v16  ;;  %v2458_v42 = vld [vmem:[%s4322_s3 + $0x648] sm:$0xff] }
  0xd9   : > { %1594 = vmatpush.msra.mxu0 %v3563_v54  ;;  %v3711_v23 = vpop.f32.mrf.mxu1  ;;  %1519 = vmatmul.f32.vlgmr.msrb.gmra.mxu2 %v427_v17 }
  0xda   : > { %1624 = vmatpush.msra.mxu1 %v3577_v62  ;;  %1694 = vmatpush.msra.mxu2 %v2464_v22 }
  0xdb   : > { %1564 = vmatpush.msrb.mxu3 %v3704_v19  ;;  %1595 = vmatpush.msra.mxu0 %v3577_v62  ;;  %v595_v62 = vadd.f32 %v3592_v58, %v513_v44  ;;  %v2471_v44 = vld [vmem:[%s4322_s3 + $0x6b0] sm:$0xff] }
  0xdc   : > { %1625 = vmatpush.msra.mxu1 %v3590_v57  ;;  %1695 = vmatpush.msra.mxu2 %v2463_v25 }
  0xdd   : > { %1565 = vmatpush.msrb.mxu3 %v3721_v49  ;;  %v750_v28 = vpop.f32.mrf.mxu3  ;;  %1596 = vmatpush.msra.mxu0 %v3590_v57 }
  0xde   : > { %1457 = vmatmul.f32.gmra.mxu3 %v3065_v35  ;;  %v766_v31 = vadd.f32 %v750_v28, %v667_v26  ;;  %1626 = vmatpush.msra.mxu1 %v3609_v63  ;;  %v2476_v28 = vld [vmem:[%s4322_s3 + $0x6d8] sm:$0xff] }
  0xdf   : > { %1696 = vmatpush.msra.mxu2 %v2462_v27  ;;  %1267 = vmatmul.f32.gmra.mxu1 %v3065_v35  ;;  %v3747_v61 = vpop.f32.mrf.mxu2 }
  0xe0   : > { %1360 = vmatmul.f32.gmra.mxu0 %v3062_v34  ;;  %815 = vst [vmem:[%s3680_s9 + $0x10] sm:$0xff] %v766_v31  ;;  %1566 = vmatpush.msrb.mxu3 %v3738_v30  ;;  %v2475_v31 = vld [vmem:[%s4322_s3 + $0x6d0] sm:$0xff] }
  0xe1   : > { %1597 = vmatpush.msra.mxu0 %v3609_v63  ;;  %v504_v33 = vpop.f32.mrf.mxu0  ;;  %1627 = vmatpush.msra.mxu1 %v3624_v2  ;;  %v586_v34 = vpop.f32.mrf.mxu1  ;;  %v514_v63 = vadd.f32 %v3602_v60, %v3650_v5 }
  0xe2   : > { %1697 = vmatpush.msra.mxu2 %v2461_v0  ;;  %v516_v35 = vadd.f32 %v3602_v60, %v504_v33  ;;  %1743 = vmatpush.msra.mxu3 %v2464_v22  ;;  %v515_v22 = vadd.f32 %v3602_v60, %v3709_v20  ;;  %v2450_v20 = vld [vmem:[%s4322_s3 + $0x608] sm:$0xff]  ;;  %v2601_v33 = vld [vmem:[%s2884_s14 + $0x19] sm:$0xff] }
  0xe3   : > { %1598 = vmatpush.msra.mxu0 %v3624_v2  ;;  %1628 = vmatpush.msra.mxu1 %v3637_v9 }
  0xe4   : > { %1698 = vmatpush.msra.mxu2 %v2460_v32  ;;  %v598_v40 = vadd.f32 %v586_v34, %v516_v35  ;;  %1744 = vmatpush.msra.mxu3 %v2463_v25  ;;  %v3884_v35 = vld [vmem:[%s4322_s3 + $0x770] sm:$0xff] }
  0xe5   : > { %1599 = vmatpush.msra.mxu0 %v3637_v9  ;;  %v753_v41 = vpop.f32.mrf.mxu3  ;;  %1629 = vmatpush.msra.mxu1 %v3648_v4 }
  0xe6   : > { %1699 = vmatpush.msra.mxu2 %v2459_v38  ;;  %v767_v43 = vadd.f32 %v753_v41, %v668_v39  ;;  %v703_v50 = vadd.f32 %v3555_v53, %v598_v40  ;;  %1745 = vmatpush.msra.mxu3 %v2462_v27  ;;  %v3853_v27 = vld [vmem:[%s2884_s14 + $0x39] sm:$0xff]  ;;  %v3893_v39 = vld [vmem:[%s3673_s6 + $0x1] sm:$0xff]  ;;  %v3896_v40 = vld [vmem:[%s2884_s14 + $0x49] sm:$0xff] }
  0xe7   : > { %1600 = vmatpush.msra.mxu0 %v3648_v4  ;;  %1460 = vmatmul.f32.gmra.mxu3 %v3109_v47  ;;  %v3806_v4 = vld [vmem:[%s2884_s14 + $0x31] sm:$0xff] }
  0xe8   : > { %1630 = vmatpush.msra.mxu1 %v3668_v11  ;;  %816 = vst [vmem:[%s3680_s9 + $0x40] sm:$0xff] %v767_v43  ;;  %v796_v45 = vpop.f32.mrf.mxu2  ;;  %1700 = vmatpush.msra.mxu2 %v2458_v42  ;;  %v2472_v41 = vld [vmem:[%s4322_s3 + $0x6b8] sm:$0xff]  ;;  %v3908_v43 = vld [vmem:[%s2937_s12 + $0x1] sm:$0xff] }
  0xe9   : > { %1746 = vmatpush.msra.mxu3 %v2461_v0  ;;  %v802_v51 = vadd.f32 %v796_v45, %v703_v50  ;;  %1270 = vmatmul.f32.gmra.mxu1 %v3109_v47  ;;  %v507_v53 = vpop.f32.mrf.mxu0  ;;  %v2455_v47 = vld [vmem:[%s4322_s3 + $0x630] sm:$0xff]  ;;  %v3922_v45 = vld [vmem:[%s4322_s3 + $0x760] sm:$0xff] }
  0xea   : > { %1363 = vmatmul.f32.gmra.mxu0 %v3105_v46  ;;  %v589_v54 = vpop.f32.mrf.mxu1  ;;  %1631 = vmatpush.msra.mxu1 %v3689_v16  ;;  %v517_v56 = vadd.f32 %v3602_v60, %v507_v53  ;;  %v669_v46 = vadd.f32 %v3628_v3, %v595_v62 }
  0xeb   : > { %1601 = vmatpush.msra.mxu0 %v3668_v11  ;;  %820 = vst [vmem:[%s3680_s9 + $0xc0] sm:$0xff] %v802_v51  ;;  %1701 = vmatpush.msra.mxu2 %v2457_v12  ;;  %v596_v11 = vadd.f32 %v3652_v6, %v514_v63  ;;  %v2452_v6 = vld [vmem:[%s4322_s3 + $0x618] sm:$0xff]  ;;  %v2470_v51 = vld [vmem:[%s4322_s3 + $0x6a8] sm:$0xff] }
  0xec   : > { %1747 = vmatpush.msra.mxu3 %v2460_v32  ;;  %1522 = vmatmul.f32.gmra.mxu2 %v428_v52  ;;  %v599_v57 = vadd.f32 %v589_v54, %v517_v56  ;;  %v3932_v52 = vld [vmem:[%s4322_s3 + $0x758] sm:$0xff]  ;;  %v2469_v54 = vld [vmem:[%s4322_s3 + $0x6a0] sm:$0xff] }
  0xed   : > { %1602 = vmatpush.msra.mxu0 %v3689_v16  ;;  %1632 = vmatpush.msra.mxu1 %v3704_v19  ;;  %v756_v58 = vpop.f32.mrf.mxu3  ;;  %v2479_v16 = vld [vmem:[%s4322_s3 + $0x6f0] sm:$0xff]  ;;  %v670_v21 = vadd.f32 %v3694_v18, %v596_v11 }
  0xee   : > { %1702 = vmatpush.msra.mxu2 %v2456_v55  ;;  %1748 = vmatpush.msra.mxu3 %v2459_v38  ;;  %v768_v2 = vadd.f32 %v756_v58, %v669_v46  ;;  %v704_v3 = vadd.f32 %v3617_v1, %v599_v57  ;;  %v2480_v1 = vld [vmem:[%s4322_s3 + $0x6f8] sm:$0xff]  ;;  %v2451_v18 = vld [vmem:[%s4322_s3 + $0x610] sm:$0xff]  ;;  %v3964_v58 = vld [vmem:[%s4322_s3 + $0x748] sm:$0xff] }
  0xef   : > { %1603 = vmatpush.msra.mxu0 %v3704_v19  ;;  %1633 = vmatpush.msra.mxu1 %v3721_v49  ;;  %v3950_v46 = vld [vmem:[%s3673_s6 + $0x9] sm:$0xff]  ;;  %v3958_v57 = vld [vmem:[%s2884_s14 + $0x51] sm:$0xff] }
  0xf0   : > { %1703 = vmatpush.msra.mxu2 %v2455_v47  ;;  %1749 = vmatpush.msra.mxu3 %v2458_v42  ;;  %817 = vst [vmem:[%s3680_s9 + $0x50] sm:$0xff] %v768_v2  ;;  %v799_v9 = vpop.f32.mrf.mxu2  ;;  %v3905_v42 = vld [vmem:[%s4322_s3 + $0x768] sm:$0xff] }
  0xf1   : > { %1604 = vmatpush.msra.mxu0 %v3721_v49  ;;  %1567 = vmatmul.f32.vlgmr.msrb.gmra.mxu3 %v3806_v4  ;;  %v803_v5 = vadd.f32 %v799_v9, %v704_v3  ;;  %v597_v49 = vadd.f32 %v3711_v23, %v515_v22  ;;  %v3970_v2 = vld [vmem:[%s2937_s12 + $0x9] sm:$0xff]  ;;  %v3983_v9 = vld [vmem:[%s4322_s3 + $0x740] sm:$0xff] }
  0xf2   : > { %1634 = vmatpush.msra.mxu1 %v3738_v30  ;;  %v3813_v7 = vpop.f32.mrf.mxu0  ;;  %v3815_v13 = vpop.f32.mrf.mxu1  ;;  %1704 = vmatpush.msra.mxu2 %v2454_v10  ;;  %v2467_v3 = vld [vmem:[%s4322_s3 + $0x690] sm:$0xff] }
  0xf3   : > { %1750 = vmatpush.msra.mxu3 %v2457_v12  ;;  %1366 = vmatmul.f32.gmra.mxu0 %v3146_v59  ;;  %821 = vst [vmem:[%s3680_s9 + $0xd0] sm:$0xff] %v803_v5  ;;  %v2478_v59 = vld [vmem:[%s4322_s3 + $0x6e8] sm:$0xff]  ;;  %v671_v23 = vadd.f32 %v3747_v61, %v597_v49 }
  0xf4   : > { %1490 = vmatmul.f32.vlgmr.msrb.gmra.mxu1 %v2598_v15  ;;  %1605 = vmatpush.msra.mxu0 %v3738_v30  ;;  %v2600_v30 = vld [vmem:[%s2937_s12 + $0x8] sm:$0xff] }
  0xf5   : > { %1842 = vmatpush.msrb.mxu1 %v2480_v1  ;;  %1705 = vmatpush.msra.mxu2 %v2453_v14  ;;  %v2474_v61 = vld [vmem:[%s4322_s3 + $0x6c8] sm:$0xff] }
  0xf6   : > { %1751 = vmatpush.msra.mxu3 %v2456_v55  ;;  %v759_v17 = vpop.f32.mrf.mxu3  ;;  %1793 = vmatpush.msrb.mxu0 %v2480_v1  ;;  %v2604_v12 = vld [vmem:[%s2884_s14 + $0x21] sm:$0xff]  ;;  %v3946_v55 = vld [vmem:[%s4322_s3 + $0x750] sm:$0xff] }
  0xf7   : > { %1843 = vmatpush.msrb.mxu1 %v2479_v16  ;;  %v769_v19 = vadd.f32 %v759_v17, %v670_v21  ;;  %1706 = vmatpush.msra.mxu2 %v2452_v6  ;;  %v2466_v5 = vld [vmem:[%s4322_s3 + $0x688] sm:$0xff] }
  0xf8   : > { %1752 = vmatpush.msra.mxu3 %v2455_v47  ;;  %1794 = vmatpush.msrb.mxu0 %v2479_v16  ;;  %v2468_v47 = vld [vmem:[%s4322_s3 + $0x698] sm:$0xff]  ;;  %v4008_v16 = vld [vmem:[%s4322_s3 + $0x730] sm:$0xff] }
  0xf9   : > { %1844 = vmatpush.msrb.mxu1 %v2478_v59  ;;  %818 = vst [vmem:[%s3680_s9 + $0x80] sm:$0xff] %v769_v19  ;;  %1707 = vmatpush.msra.mxu2 %v2451_v18  ;;  %v1034_v56 = vpop.f32.mrf.mxu2  ;;  %v2607_v19 = vld [vmem:[%s2884_s14 + $0x1a] sm:$0xff] }
  0xfa   : > { %1753 = vmatpush.msra.mxu3 %v2454_v10  ;;  %v3847_v25 = vpop.f32.mrf.mxu0  ;;  %1795 = vmatpush.msrb.mxu0 %v2478_v59  ;;  %v896_v10 = vadd.f32 %v3602_v60, %v3813_v7  ;;  %v3995_v7 = vld [vmem:[%s4322_s3 + $0x738] sm:$0xff] }
  0xfb   : > { %1845 = vmatpush.msrb.mxu1 %v2477_v24  ;;  %v3850_v26 = vpop.f32.mrf.mxu1  ;;  %1570 = vmatmul.f32.gmra.mxu3 %v3853_v27  ;;  %v897_v17 = vadd.f32 %v3602_v60, %v3847_v25  ;;  %v4041_v25 = vld [vmem:[%s4322_s3 + $0x718] sm:$0xff] }
  0xfc   : > { %1708 = vmatpush.msra.mxu2 %v2450_v20  ;;  %1754 = vmatpush.msra.mxu3 %v2453_v14  ;;  %v2465_v14 = vld [vmem:[%s4322_s3 + $0x680] sm:$0xff]  ;;  %v978_v15 = vadd.f32 %v3815_v13, %v896_v10  ;;  %v4017_v13 = vld [vmem:[%s4322_s3 + $0x728] sm:$0xff] }
  0xfd   : > { %1796 = vmatpush.msrb.mxu0 %v2477_v24  ;;  %1493 = vmatmul.f32.gmra.mxu1 %v2600_v30  ;;  %v4029_v24 = vld [vmem:[%s4322_s3 + $0x720] sm:$0xff]  ;;  %v979_v49 = vadd.f32 %v3850_v26, %v897_v17 }
  0xfe   : > { %1369 = vmatmul.f32.gmra.mxu0 %v3179_v8  ;;  %v762_v0 = vpop.f32.mrf.mxu3  ;;  %1846 = vmatpush.msrb.mxu1 %v2476_v28  ;;  %v3874_v8 = vld [vmem:[%s4322_s3 + $0x778] sm:$0xff] }
  0xff   : > { %1709 = vmatpush.msra.mxu2 %v2449_v29  ;;  %v770_v32 = vadd.f32 %v762_v0, %v671_v23  ;;  %1755 = vmatpush.msra.mxu3 %v2452_v6  ;;  %v1052_v6 = vadd.f32 %v1034_v56, %v978_v15  ;;  %v4063_v23 = vld [vmem:[%s4322_s3 + $0x7f0] sm:$0xff] }
 0x100   : > { %1797 = vmatpush.msrb.mxu0 %v2476_v28  ;;  %1710 = vmatmul.f32.vlgmr.msra.gmra.mxu2 %v2601_v33  ;;  %v4049_v28 = vld [vmem:[%s4322_s3 + $0x7f8] sm:$0xff]  ;;  %v2608_v33 = vld [vmem:[%s2884_s14 + $0x22] sm:$0xff] }
 0x101   : > { %1847 = vmatpush.msrb.mxu1 %v2475_v31  ;;  %819 = vst [vmem:[%s3680_s9 + $0x90] sm:$0xff] %v770_v32  ;;  %1756 = vmatpush.msra.mxu3 %v2451_v18  ;;  %v1037_v21 = vpop.f32.mrf.mxu2 }
 0x102   : > { %1798 = vmatpush.msrb.mxu0 %v2475_v31  ;;  %1958 = vmatpush.msrb.mxu2 %v3874_v8  ;;  %v1053_v26 = vadd.f32 %v1037_v21, %v979_v49  ;;  %v4069_v31 = vld [vmem:[%s4322_s3 + $0x708] sm:$0xff]  ;;  %v4169_v21 = vld [vmem:[%s2884_s14 + $0x3a] sm:$0xff] }
 0x103   : > { %1848 = vmatpush.msrb.mxu1 %v2474_v61  ;;  %v3887_v34 = vpop.f32.mrf.mxu0  ;;  %v3889_v38 = vpop.f32.mrf.mxu1  ;;  %1757 = vmatpush.msra.mxu3 %v2450_v20 }
 0x104   : > { %1799 = vmatpush.msrb.mxu0 %v2474_v61  ;;  %1959 = vmatpush.msrb.mxu2 %v3884_v35  ;;  %v898_v32 = vadd.f32 %v3602_v60, %v3887_v34 }
 0x105   : > { %1849 = vmatpush.msrb.mxu1 %v2473_v36  ;;  %1573 = vmatmul.f32.gmra.mxu3 %v3896_v40 }
 0x106   : > { %1800 = vmatpush.msrb.mxu0 %v2473_v36  ;;  %1758 = vmatpush.msra.mxu3 %v2449_v29  ;;  %v4056_v29 = vld [vmem:[%s4322_s3 + $0x710] sm:$0xff]  ;;  %v4081_v36 = vld [vmem:[%s4322_s3 + $0x700] sm:$0xff]  ;;  %v980_v34 = vadd.f32 %v3889_v38, %v898_v32 }
 0x107   : > { %1606 = vmatmul.f32.vlgmr.msra.gmra.mxu0 %v3908_v43  ;;  %v3911_v50 = vpop.f32.mrf.mxu3  ;;  %1635 = vmatmul.f32.vlgmr.msra.gmra.mxu1 %v3893_v39  ;;  %v4105_v38 = vld [vmem:[%s4322_s3 + $0x7e0] sm:$0xff] }
 0x108   : > { %1890 = vmatpush.msrb.mxu3 %v3874_v8  ;;  %1850 = vmatpush.msrb.mxu1 %v2472_v41 }
 0x109   : > { %1960 = vmatpush.msrb.mxu2 %v3905_v42  ;;  %1801 = vmatpush.msrb.mxu0 %v2472_v41  ;;  %v4096_v41 = vld [vmem:[%s4322_s3 + $0x7e8] sm:$0xff] }
 0x10a   : > { %1713 = vmatmul.f32.gmra.mxu2 %v2604_v12  ;;  %1851 = vmatpush.msrb.mxu1 %v2471_v44  ;;  %v1040_v30 = vpop.f32.mrf.mxu2 }
 0x10b   : > { %1891 = vmatpush.msrb.mxu3 %v3884_v35  ;;  %v3934_v53 = vpop.f32.mrf.mxu0  ;;  %1961 = vmatpush.msrb.mxu2 %v3922_v45 }
 0x10c   : > { %1802 = vmatpush.msrb.mxu0 %v2471_v44  ;;  %v3940_v62 = vpop.f32.mrf.mxu1  ;;  %1852 = vmatpush.msrb.mxu1 %v2470_v51 }
 0x10d   : > { %1892 = vmatpush.msrb.mxu3 %v3905_v42  ;;  %1962 = vmatpush.msrb.mxu2 %v3932_v52 }
 0x10e   : > { %1803 = vmatpush.msrb.mxu0 %v2470_v51  ;;  %1853 = vmatpush.msrb.mxu1 %v2469_v54 }
 0x10f   : > { %1893 = vmatpush.msrb.mxu3 %v3922_v45  ;;  %1963 = vmatpush.msrb.mxu2 %v3946_v55  ;;  %v3966_v63 = vpop.f32.mrf.mxu3 }
 0x110   : > { %1576 = vmatmul.f32.gmra.mxu3 %v3958_v57  ;;  %1804 = vmatpush.msrb.mxu0 %v2469_v54 }
 0x111   : > { %1638 = vmatmul.f32.gmra.mxu1 %v3950_v46  ;;  %1609 = vmatmul.f32.gmra.mxu0 %v3970_v2 }
 0x112   : > { %1854 = vmatpush.msrb.mxu1 %v2468_v47  ;;  %1894 = vmatpush.msrb.mxu3 %v3932_v52  ;;  %v1043_v54 = vpop.f32.mrf.mxu2 }
 0x113   : > { %1964 = vmatpush.msrb.mxu2 %v3964_v58  ;;  %1805 = vmatpush.msrb.mxu0 %v2468_v47 }
 0x114   : > { %v3985_v1 = vpop.f32.mrf.mxu0  ;;  %1716 = vmatmul.f32.gmra.mxu2 %v3806_v4  ;;  %1855 = vmatpush.msrb.mxu1 %v2467_v3 }
 0x115   : > { %1895 = vmatpush.msrb.mxu3 %v3946_v55  ;;  %v3997_v11 = vpop.f32.mrf.mxu1  ;;  %1965 = vmatpush.msrb.mxu2 %v3983_v9 }
 0x116   : > { %1806 = vmatpush.msrb.mxu0 %v2467_v3  ;;  %1856 = vmatpush.msrb.mxu1 %v2466_v5  ;;  %v900_v3 = vadd.f32 %v3602_v60, %v3985_v1 }
 0x117   : > { %1896 = vmatpush.msrb.mxu3 %v3964_v58  ;;  %1966 = vmatpush.msrb.mxu2 %v3995_v7 }
 0x118   : > { %1807 = vmatpush.msrb.mxu0 %v2466_v5  ;;  %1857 = vmatpush.msrb.mxu1 %v2465_v14  ;;  %v4151_v5 = vld [vmem:[%s4322_s3 + $0x7c8] sm:$0xff] }
 0x119   : > { %1897 = vmatpush.msrb.mxu3 %v3983_v9  ;;  %1967 = vmatpush.msrb.mxu2 %v4008_v16 }
 0x11a   : > { %1759 = vmatmul.f32.vlgmr.msra.gmra.mxu3 %v3908_v43  ;;  %v1133_v59 = vpop.f32.mrf.mxu3  ;;  %1808 = vmatpush.msrb.mxu0 %v2465_v14 }
 0x11b   : > { %1929 = vmatpush.msra.mxu1 %v3874_v8  ;;  %v1151_v22 = vadd.f32 %v1133_v59, %v1052_v6  ;;  %1809 = vmatmul.f32.vlgmr.msrb.gmra.mxu0 %v2607_v19 }
 0x11c   : > { %v4022_v18 = vpop.f32.mrf.mxu0  ;;  %1898 = vmatpush.msrb.mxu3 %v3995_v7  ;;  %1968 = vmatpush.msrb.mxu2 %v4017_v13  ;;  %v1046_v15 = vpop.f32.mrf.mxu2 }
 0x11d   : > { %1930 = vmatpush.msra.mxu1 %v3884_v35  ;;  %1200 = vst [vmem:[%s3680_s9 + $0x8] sm:$0xff] %v1151_v22  ;;  %v4034_v20 = vpop.f32.mrf.mxu1  ;;  %1719 = vmatmul.f32.gmra.mxu2 %v3853_v27  ;;  %v901_v22 = vadd.f32 %v3602_v60, %v4022_v18 }
 0x11e   : > { %1899 = vmatpush.msrb.mxu3 %v4008_v16  ;;  %1969 = vmatpush.msrb.mxu2 %v4029_v24 }
 0x11f   : > { %1931 = vmatpush.msra.mxu1 %v3905_v42  ;;  %2006 = vmatpush.msra.mxu0 %v4049_v28  ;;  %v1054_v42 = vadd.f32 %v1040_v30, %v980_v34  ;;  %v2497_v30 = vld [vmem:[%s4322_s3 + $0x780] sm:$0xff] }
 0x120   : > { %1900 = vmatpush.msrb.mxu3 %v4017_v13  ;;  %1970 = vmatpush.msrb.mxu2 %v4041_v25  ;;  %v431_v34 = vld [vmem:[%s3673_s6 + $0x2] sm:$0xff] }
 0x121   : > { %1932 = vmatpush.msra.mxu1 %v3922_v45  ;;  %2007 = vmatpush.msra.mxu0 %v4063_v23  ;;  %v899_v45 = vadd.f32 %v3602_v60, %v3934_v53  ;;  %v4118_v53 = vld [vmem:[%s2884_s14 + $0x32] sm:$0xff] }
 0x122   : > { %1901 = vmatpush.msrb.mxu3 %v4029_v24  ;;  %v1136_v0 = vpop.f32.mrf.mxu3  ;;  %1971 = vmatpush.msrb.mxu2 %v4056_v29 }
 0x123   : > { %1762 = vmatmul.f32.gmra.mxu3 %v3970_v2  ;;  %v1152_v61 = vadd.f32 %v1136_v0, %v1053_v26  ;;  %1933 = vmatpush.msra.mxu1 %v3932_v52  ;;  %v981_v56 = vadd.f32 %v3940_v62, %v899_v45  ;;  %v4137_v62 = vld [vmem:[%s4322_s3 + $0x7d0] sm:$0xff] }
 0x124   : > { %v890_v8 = vpop.f32.mrf.mxu0  ;;  %1812 = vmatmul.f32.gmra.mxu0 %v2608_v33  ;;  %1902 = vmatpush.msrb.mxu3 %v4041_v25  ;;  %v1049_v49 = vpop.f32.mrf.mxu2  ;;  %v432_v45 = vld [vmem:[%s3673_s6 + $0xa] sm:$0xff] }
 0x125   : > { %1972 = vmatpush.msrb.mxu2 %v4069_v31  ;;  %1201 = vst [vmem:[%s3680_s9 + $0x18] sm:$0xff] %v1152_v61  ;;  %1934 = vmatpush.msra.mxu1 %v3946_v55  ;;  %v902_v12 = vadd.f32 %v3602_v60, %v890_v8  ;;  %v1055_v47 = vadd.f32 %v1043_v54, %v981_v56  ;;  %v2613_v61 = vld [vmem:[%s2937_s12 + $0x2] sm:$0xff] }
 0x126   : > { %v972_v35 = vpop.f32.mrf.mxu1  ;;  %1722 = vmatmul.f32.gmra.mxu2 %v3896_v40  ;;  %1903 = vmatpush.msrb.mxu3 %v4056_v29 }
 0x127   : > { %1973 = vmatpush.msrb.mxu2 %v4081_v36  ;;  %1935 = vmatpush.msra.mxu1 %v3964_v58 }
 0x128   : > { %2008 = vmatpush.msra.mxu0 %v4096_v41  ;;  %1904 = vmatpush.msrb.mxu3 %v4069_v31 }
 0x129   : > { %2536 = vmatpush.msra.mxu2 %v4049_v28  ;;  %1936 = vmatpush.msra.mxu1 %v3983_v9 }
 0x12a   : > { %v1139_v44 = vpop.f32.mrf.mxu3  ;;  %1905 = vmatpush.msrb.mxu3 %v4081_v36  ;;  %2009 = vmatpush.msra.mxu0 %v4105_v38 }
 0x12b   : > { %2537 = vmatpush.msra.mxu2 %v4063_v23  ;;  %v1153_v51 = vadd.f32 %v1139_v44, %v1054_v42  ;;  %1858 = vmatmul.f32.vlgmr.msrb.gmra.mxu1 %v3484_v37  ;;  %v4128_v37 = vld [vmem:[%s4322_s3 + $0x7d8] sm:$0xff] }
 0x12c   : > { %v893_v52 = vpop.f32.mrf.mxu0  ;;  %1906 = vmatmul.f32.vlgmr.msrb.gmra.mxu3 %v3806_v4  ;;  %1937 = vmatpush.msra.mxu1 %v3995_v7  ;;  %v984_v4 = vadd.f32 %v972_v35, %v902_v12 }
 0x12d   : > { %2538 = vmatpush.msra.mxu2 %v4096_v41  ;;  %1202 = vst [vmem:[%s3680_s9 + $0x48] sm:$0xff] %v1153_v51  ;;  %1815 = vmatmul.f32.gmra.mxu0 %v4118_v53  ;;  %v903_v1 = vadd.f32 %v3602_v60, %v893_v52  ;;  %v2501_v60 = vld [vmem:[%s4322_s3 + $0x7a0] sm:$0xff] }
 0x12e   : > { %v975_v55 = vpop.f32.mrf.mxu1  ;;  %2045 = vmatpush.msra.mxu3 %v4049_v28  ;;  %1938 = vmatpush.msra.mxu1 %v4008_v16  ;;  %v1089_v9 = vadd.f32 %v3911_v50, %v984_v4  ;;  %v982_v16 = vadd.f32 %v3997_v11, %v900_v3 }
 0x12f   : > { %2539 = vmatpush.msra.mxu2 %v4105_v38  ;;  %2010 = vmatpush.msra.mxu0 %v4128_v37  ;;  %v985_v11 = vadd.f32 %v975_v55, %v903_v1  ;;  %v4266_v55 = vld [vmem:[%s4323_s4] ss:$0 sm:$0xff] }
 0x130   : > { %1725 = vmatmul.f32.gmra.mxu2 %v3958_v57  ;;  %2046 = vmatpush.msra.mxu3 %v4063_v23  ;;  %v1056_v6 = vadd.f32 %v1046_v15, %v982_v16 }
 0x131   : > { %1939 = vmatpush.msra.mxu1 %v4017_v13  ;;  %2540 = vmatpush.msra.mxu2 %v4128_v37  ;;  %v4187_v13 = vld [vmem:[%s4322_s3 + $0x7b0] sm:$0xff]  ;;  %v1090_v19 = vadd.f32 %v3966_v63, %v985_v11  ;;  %v983_v63 = vadd.f32 %v4034_v20, %v901_v22 }
 0x132   : > { %2011 = vmatpush.msra.mxu0 %v4137_v62  ;;  %v1142_v58 = vpop.f32.mrf.mxu3  ;;  %2047 = vmatpush.msra.mxu3 %v4096_v41  ;;  %v2499_v20 = vld [vmem:[%s4322_s3 + $0x790] sm:$0xff] }
 0x133   : > { %1940 = vmatpush.msra.mxu1 %v4029_v24  ;;  %v1154_v10 = vadd.f32 %v1142_v58, %v1055_v47  ;;  %2541 = vmatpush.msra.mxu2 %v4137_v62 }
 0x134   : > { %1861 = vmatmul.f32.gmra.mxu1 %v3539_v48  ;;  %v1182_v7 = vpop.f32.mrf.mxu0  ;;  %2048 = vmatpush.msra.mxu3 %v4105_v38  ;;  %v4164_v48 = vld [vmem:[%s4322_s3 + $0x7c0] sm:$0xff] }
 0x135   : > { %1941 = vmatpush.msra.mxu1 %v4041_v25  ;;  %1203 = vst [vmem:[%s3680_s9 + $0x58] sm:$0xff] %v1154_v10  ;;  %v1188_v50 = vadd.f32 %v1182_v7, %v1089_v9  ;;  %1909 = vmatmul.f32.gmra.mxu3 %v3853_v27  ;;  %v4178_v27 = vld [vmem:[%s4322_s3 + $0x7b8] sm:$0xff] }
 0x136   : > { %v4157_v14 = vpop.f32.mrf.mxu1  ;;  %2012 = vmatpush.msra.mxu0 %v4151_v5  ;;  %2542 = vmatpush.msra.mxu2 %v4151_v5 }
 0x137   : > { %1818 = vmatmul.f32.gmra.mxu0 %v4169_v21  ;;  %1206 = vst [vmem:[%s3680_s9 + $0xc8] sm:$0xff] %v1188_v50  ;;  %2049 = vmatpush.msra.mxu3 %v4128_v37 }
 0x138   : > { %1942 = vmatpush.msra.mxu1 %v4056_v29  ;;  %2543 = vmatpush.msra.mxu2 %v4164_v48  ;;  %v4214_v29 = vld [vmem:[%s2884_s14 + $0x4a] sm:$0xff] }
 0x139   : > { %2013 = vmatpush.msra.mxu0 %v4164_v48  ;;  %1974 = vmatmul.f32.vlgmr.msrb.gmra.mxu2 %v3893_v39  ;;  %v4196_v39 = vld [vmem:[%s4322_s3 + $0x7a8] sm:$0xff] }
 0x13a   : > { %2050 = vmatpush.msra.mxu3 %v4137_v62  ;;  %v1145_v59 = vpop.f32.mrf.mxu3  ;;  %1943 = vmatpush.msra.mxu1 %v4069_v31  ;;  %v2612_v31 = vld [vmem:[%s2884_s14 + $0x52] sm:$0xff] }
 0x13b   : > { %2544 = vmatpush.msra.mxu2 %v4178_v27  ;;  %v1155_v17 = vadd.f32 %v1145_v59, %v1056_v6  ;;  %2014 = vmatpush.msra.mxu0 %v4178_v27 }
 0x13c   : > { %2051 = vmatpush.msra.mxu3 %v4151_v5  ;;  %1944 = vmatpush.msra.mxu1 %v4081_v36 }
 0x13d   : > { %2545 = vmatpush.msra.mxu2 %v4187_v13  ;;  %1204 = vst [vmem:[%s3680_s9 + $0x88] sm:$0xff] %v1155_v17  ;;  %1912 = vmatmul.f32.gmra.mxu3 %v3896_v40  ;;  %v2500_v40 = vld [vmem:[%s4322_s3 + $0x798] sm:$0xff] }
 0x13e   : > { %2052 = vmatpush.msra.mxu3 %v4164_v48  ;;  %2074 = vmatpush.msrb.mxu1 %v4049_v28  ;;  %v1185_v24 = vpop.f32.mrf.mxu0  ;;  %v4211_v25 = vpop.f32.mrf.mxu1  ;;  %v1057_v28 = vadd.f32 %v1049_v49, %v983_v63 }
 0x13f   : > { %2546 = vmatpush.msra.mxu2 %v4196_v39  ;;  %v1189_v18 = vadd.f32 %v1185_v24, %v1090_v19  ;;  %1821 = vmatmul.f32.gmra.mxu0 %v4214_v29  ;;  %v1275_v10 = vadd.f32 %v4266_v55, %v4211_v25 }
 0x140   : > { %2053 = vmatpush.msra.mxu3 %v4178_v27  ;;  %2015 = vmatpush.msra.mxu0 %v4187_v13 }
 0x141   : > { %2075 = vmatpush.msrb.mxu1 %v4063_v23  ;;  %1207 = vst [vmem:[%s3680_s9 + $0xd8] sm:$0xff] %v1189_v18  ;;  %2547 = vmatpush.msra.mxu2 %v2501_v60 }
 0x142   : > { %2054 = vmatpush.msra.mxu3 %v4187_v13  ;;  %1977 = vmatmul.f32.gmra.mxu2 %v3950_v46  ;;  %v1148_v26 = vpop.f32.mrf.mxu3  ;;  %v2498_v46 = vld [vmem:[%s4322_s3 + $0x788] sm:$0xff] }
 0x143   : > { %2076 = vmatpush.msrb.mxu1 %v4096_v41  ;;  %2016 = vmatpush.msra.mxu0 %v4196_v39  ;;  %v1156_v23 = vadd.f32 %v1148_v26, %v1057_v28 }
 0x144   : > { %2548 = vmatpush.msra.mxu2 %v2500_v40  ;;  %2055 = vmatpush.msra.mxu3 %v4196_v39 }
 0x145   : > { %2077 = vmatpush.msrb.mxu1 %v4105_v38  ;;  %2017 = vmatpush.msra.mxu0 %v2501_v60  ;;  %1205 = vst [vmem:[%s3680_s9 + $0x98] sm:$0xff] %v1156_v23 }
 0x146   : > { %2549 = vmatpush.msra.mxu2 %v2499_v20  ;;  %2056 = vmatpush.msra.mxu3 %v2501_v60 }
 0x147   : > { %2078 = vmatpush.msrb.mxu1 %v4128_v37  ;;  %1915 = vmatmul.f32.gmra.mxu3 %v3958_v57  ;;  %v1305_v57 = vpop.f32.mrf.mxu2 }
 0x148   : > { %1945 = vmatmul.f32.vlgmr.msra.gmra.mxu1 %v3908_v43  ;;  %2550 = vmatpush.msra.mxu2 %v2498_v46  ;;  %v4245_v0 = vpop.f32.mrf.mxu1  ;;  %v1355_v32 = vpop.f32.mrf.mxu0 }
 0x149   : > { %1824 = vmatmul.f32.gmra.mxu0 %v2612_v31  ;;  %2057 = vmatpush.msra.mxu3 %v2500_v40  ;;  %v1276_v11 = vadd.f32 %v4266_v55, %v4245_v0 }
 0x14a   : > { %2079 = vmatpush.msrb.mxu1 %v4137_v62  ;;  %2018 = vmatpush.msra.mxu0 %v2500_v40 }
 0x14b   : > { %2551 = vmatpush.msra.mxu2 %v2497_v30  ;;  %2058 = vmatpush.msra.mxu3 %v2499_v20 }
 0x14c   : > { %2031 = vmatmul.f32.vlgmr.msra.gmra.mxu2 %v2612_v31  ;;  %2080 = vmatpush.msrb.mxu1 %v4151_v5 }
 0x14d   : > { %2019 = vmatpush.msra.mxu0 %v2499_v20  ;;  %2059 = vmatpush.msra.mxu3 %v2498_v46  ;;  %v1452_v43 = vpop.f32.mrf.mxu3 }
 0x14e   : > { %2081 = vmatpush.msrb.mxu1 %v4164_v48 }
 0x14f   : > { %2020 = vmatpush.msra.mxu0 %v2498_v46  ;;  %2060 = vmatpush.msra.mxu3 %v2497_v30  ;;  %v1308_v36 = vpop.f32.mrf.mxu2 }
 0x150   : > { %1948 = vmatmul.f32.gmra.mxu1 %v3970_v2  ;;  %2061 = vmatmul.f32.vlgmr.msra.gmra.mxu3 %v2613_v61  ;;  %v2614_v2 = vld [vmem:[%s2937_s12 + $0xa] sm:$0xff] }
 0x151   : > { %2082 = vmatpush.msrb.mxu1 %v4178_v27  ;;  %2021 = vmatpush.msra.mxu0 %v2497_v30 }
 0x152   : > { %2022 = vmatmul.f32.vlgmr.msra.gmra.mxu0 %v4118_v53  ;;  %v4255_v8 = vpop.f32.mrf.mxu1  ;;  %v1358_v33 = vpop.f32.mrf.mxu0  ;;  %v1274_v53 = vadd.f32 %v4266_v55, %v4157_v14  ;;  %v1311_v14 = vadd.f32 %v4266_v55, %v1305_v57 }
 0x153   : > { %2083 = vmatpush.msrb.mxu1 %v4187_v13  ;;  %v1374_v7 = vadd.f32 %v1358_v33, %v1275_v10  ;;  %v1277_v26 = vadd.f32 %v4266_v55, %v4255_v8 }
 0x154   : > { %v1373_v4 = vadd.f32 %v1355_v32, %v1274_v53 }
 0x155   : > { %2084 = vmatpush.msrb.mxu1 %v4196_v39  ;;  %v1312_v39 = vadd.f32 %v4266_v55, %v1308_v36 }
 0x156   : > { %v1464_v47 = vadd.f32 %v1452_v43, %v1373_v4 }
 0x157   : > { %2085 = vmatpush.msrb.mxu1 %v2501_v60  ;;  %v1455_v35 = vpop.f32.mrf.mxu3  ;;  %v1404_v38 = vpop.f32.mrf.mxu2 }
 0x158   : > { %2064 = vmatmul.f32.gmra.mxu3 %v2614_v2  ;;  %v1465_v15 = vadd.f32 %v1455_v35, %v1374_v7  ;;  %v1410_v27 = vadd.f32 %v1404_v38, %v1311_v14 }
 0x159   : > { %2086 = vmatpush.msrb.mxu1 %v2500_v40 }
 0x15a   : > { %2025 = vmatmul.f32.gmra.mxu0 %v4169_v21 }
 0x15b   : > { %2087 = vmatpush.msrb.mxu1 %v2499_v20 }
 0x15c   : > { %v1268_v41 = vpop.f32.mrf.mxu1 }
 0x15d   : > { %2088 = vmatpush.msrb.mxu1 %v2498_v46  ;;  %v1361_v42 = vpop.f32.mrf.mxu0  ;;  %v1278_v50 = vadd.f32 %v4266_v55, %v1268_v41 }
 0x15e   : > { %v1375_v24 = vadd.f32 %v1361_v42, %v1276_v11 }
 0x15f   : > { %2089 = vmatpush.msrb.mxu1 %v2497_v30  ;;  %v1407_v52 = vpop.f32.mrf.mxu2 }
 0x160   : > { %2090 = vmatmul.f32.vlgmr.msrb.gmra.mxu1 %v431_v34  ;;  %v1411_v49 = vadd.f32 %v1407_v52, %v1312_v39 }
 0x161   : > { %v1458_v44 = vpop.f32.mrf.mxu3 }
 0x162   : > { %2028 = vmatmul.f32.gmra.mxu0 %v4214_v29  ;;  %v1466_v18 = vadd.f32 %v1458_v44, %v1375_v24 }
 0x166   : > { %v1271_v12 = vpop.f32.mrf.mxu1 }
 0x167   : > { %v1364_v51 = vpop.f32.mrf.mxu0  ;;  %v1520_v62 = vpop.f32.mrf.mxu2  ;;  %v1279_v25 = vadd.f32 %v4266_v55, %v1271_v12 }
 0x168   : > { %2093 = vmatmul.f32.gmra.mxu1 %v432_v45  ;;  %v1526_v13 = vadd.f32 %v1520_v62, %v1410_v27  ;;  %v1376_v0 = vadd.f32 %v1364_v51, %v1277_v26 }
 0x16a   : > { %v1461_v54 = vpop.f32.mrf.mxu3 }
 0x16b   : > { %v1467_v57 = vadd.f32 %v1461_v54, %v1376_v0 }
 0x16f   : > { %v1523_v1 = vpop.f32.mrf.mxu2 }
 0x170   : > { %v1367_v56 = vpop.f32.mrf.mxu0  ;;  %v1527_v28 = vadd.f32 %v1523_v1, %v1411_v49 }
 0x171   : > { %v1491_v37 = vpop.f32.mrf.mxu1  ;;  %v1377_v48 = vadd.f32 %v1367_v56, %v1278_v50 }
 0x173   : > { %v1497_v6 = vadd.f32 %v1491_v37, %v1377_v48 }
 0x174   : > { %v1568_v58 = vpop.f32.mrf.mxu3 }
 0x175   : > { %v1580_v3 = vadd.f32 %v1568_v58, %v1464_v47 }
 0x177   : > { %2441 = vst [vmem:[%s3680_s9 + $0x20] sm:$0xff] %v1580_v3 }
 0x17a   : > { %v1494_v5 = vpop.f32.mrf.mxu1 }
 0x17b   : > { %v1370_v9 = vpop.f32.mrf.mxu0 }
 0x17c   : > { %v1378_v63 = vadd.f32 %v1370_v9, %v1279_v25 }
 0x17e   : > { %v1571_v16 = vpop.f32.mrf.mxu3  ;;  %v1498_v23 = vadd.f32 %v1494_v5, %v1378_v63 }
 0x17f   : > { %v1581_v21 = vadd.f32 %v1571_v16, %v1465_v15 }
 0x181   : > { %2442 = vst [vmem:[%s3680_s9 + $0x30] sm:$0xff] %v1581_v21 }
 0x183   : > { %v1711_v17 = vpop.f32.mrf.mxu2 }
 0x184   : > { %v1607_v59 = vpop.f32.mrf.mxu0  ;;  %v1636_v19 = vpop.f32.mrf.mxu1  ;;  %v1729_v62 = vadd.f32 %v4266_v55, %v1711_v17 }
 0x185   : > { %v1613_v22 = vadd.f32 %v1607_v59, %v1497_v6  ;;  %v1642_v60 = vadd.f32 %v1636_v19, %v1526_v13 }
 0x187   : > { %2445 = vst [vmem:[%s3680_s9 + $0xa0] sm:$0xff] %v1613_v22 }
 0x188   : > { %2447 = vst [vmem:[%s3680_s9 + $0xe0] sm:$0xff] %v1642_v60  ;;  %v1574_v29 = vpop.f32.mrf.mxu3 }
 0x189   : > { %v1582_v40 = vadd.f32 %v1574_v29, %v1466_v18 }
 0x18b   : > { %2443 = vst [vmem:[%s3680_s9 + $0x60] sm:$0xff] %v1582_v40 }
 0x18d   : > { %v1714_v20 = vpop.f32.mrf.mxu2 }
 0x18e   : > { %v1639_v46 = vpop.f32.mrf.mxu1  ;;  %v1610_v30 = vpop.f32.mrf.mxu0  ;;  %v1730_v15 = vadd.f32 %v4266_v55, %v1714_v20 }
 0x18f   : > { %v1643_v31 = vadd.f32 %v1639_v46, %v1527_v28  ;;  %v1614_v32 = vadd.f32 %v1610_v30, %v1498_v23 }
 0x191   : > { %2448 = vst [vmem:[%s3680_s9 + $0xf0] sm:$0xff] %v1643_v31 }
 0x192   : > { %2446 = vst [vmem:[%s3680_s9 + $0xb0] sm:$0xff] %v1614_v32 }
 0x193   : > { %v1577_v43 = vpop.f32.mrf.mxu3 }
 0x194   : > { %v1583_v61 = vadd.f32 %v1577_v43, %v1467_v57 }
 0x196   : > { %2444 = vst [vmem:[%s3680_s9 + $0x70] sm:$0xff] %v1583_v61 }
 0x197   : > { %v1717_v33 = vpop.f32.mrf.mxu2 }
 0x198   : > { %v1810_v36 = vpop.f32.mrf.mxu0  ;;  %v1731_v24 = vadd.f32 %v4266_v55, %v1717_v33 }
 0x199   : > { %v1828_v9 = vadd.f32 %v1810_v36, %v1729_v62 }
 0x19d   : > { %v1760_v35 = vpop.f32.mrf.mxu3 }
 0x19e   : > { %v1766_v17 = vadd.f32 %v4266_v55, %v1760_v35 }
 0x1a0   : > { %v1720_v2 = vpop.f32.mrf.mxu2 }
 0x1a1   : > { %v1813_v34 = vpop.f32.mrf.mxu0  ;;  %v1732_v37 = vadd.f32 %v4266_v55, %v1720_v2 }
 0x1a2   : > { %v1829_v27 = vadd.f32 %v1813_v34, %v1730_v15 }
 0x1a6   : > { %v1763_v41 = vpop.f32.mrf.mxu3 }
 0x1a7   : > { %v1767_v20 = vadd.f32 %v4266_v55, %v1763_v41 }
 0x1a8   : > { %v1859_v12 = vpop.f32.mrf.mxu1 }
 0x1a9   : > { %v1723_v42 = vpop.f32.mrf.mxu2  ;;  %v1865_v25 = vadd.f32 %v1859_v12, %v1766_v17 }
 0x1aa   : > { %v1816_v8 = vpop.f32.mrf.mxu0  ;;  %v1733_v5 = vadd.f32 %v4266_v55, %v1723_v42 }
 0x1ab   : > { %v1830_v49 = vadd.f32 %v1816_v8, %v1731_v24 }
 0x1af   : > { %v1907_v38 = vpop.f32.mrf.mxu3 }
 0x1b0   : > { %v1919_v1 = vadd.f32 %v1907_v38, %v1828_v9 }
 0x1b1   : > { %v1862_v56 = vpop.f32.mrf.mxu1 }
 0x1b2   : > { %v1866_v0 = vadd.f32 %v1862_v56, %v1767_v20 }
 0x1b3   : > { %v1726_v44 = vpop.f32.mrf.mxu2 }
 0x1b4   : > { %v1819_v45 = vpop.f32.mrf.mxu0  ;;  %v1734_v6 = vadd.f32 %v4266_v55, %v1726_v44 }
 0x1b5   : > { %v1831_v58 = vadd.f32 %v1819_v45, %v1732_v37 }
 0x1b8   : > { %v1910_v51 = vpop.f32.mrf.mxu3 }
 0x1b9   : > { %v1920_v39 = vadd.f32 %v1910_v51, %v1829_v27 }
 0x1bc   : > { %v1822_v52 = vpop.f32.mrf.mxu0  ;;  %v1975_v53 = vpop.f32.mrf.mxu2 }
 0x1bd   : > { %v1832_v48 = vadd.f32 %v1822_v52, %v1733_v5  ;;  %v1981_v29 = vadd.f32 %v1975_v53, %v1865_v25 }
 0x1c0   : > { %v1913_v54 = vpop.f32.mrf.mxu3 }
 0x1c1   : > { %v1921_v26 = vadd.f32 %v1913_v54, %v1830_v49 }
 0x1c5   : > { %v1978_v47 = vpop.f32.mrf.mxu2  ;;  %v1946_v3 = vpop.f32.mrf.mxu1 }
 0x1c6   : > { %v1825_v4 = vpop.f32.mrf.mxu0  ;;  %v1952_v11 = vadd.f32 %v1946_v3, %v1832_v48  ;;  %v1982_v32 = vadd.f32 %v1978_v47, %v1866_v0 }
 0x1c7   : > { %v1833_v60 = vadd.f32 %v1825_v4, %v1734_v6 }
 0x1ca   : > { %v1916_v10 = vpop.f32.mrf.mxu3 }
 0x1cb   : > { %v1922_v7 = vadd.f32 %v1916_v10, %v1831_v58 }
 0x1cd   : > { %v1949_v13 = vpop.f32.mrf.mxu1 }
 0x1ce   : > { %v1953_v63 = vadd.f32 %v1949_v13, %v1833_v60 }
 0x1cf   : > { %v2023_v50 = vpop.f32.mrf.mxu0  ;;  %v2032_v14 = vpop.f32.mrf.mxu2 }
 0x1d0   : > { %v2035_v16 = vadd.f32 %v2023_v50, %v1919_v1  ;;  %v2038_v21 = vadd.f32 %v2032_v14, %v1922_v7 }
 0x1d2   : > { %2513 = vst [vmem:[%s3680_s9 + $0x28] sm:$0xff] %v2035_v16 }
 0x1d3   : > { %2516 = vst [vmem:[%s3680_s9 + $0x78] sm:$0xff] %v2038_v21  ;;  %v2062_v59 = vpop.f32.mrf.mxu3 }
 0x1d4   : > { %v2068_v22 = vadd.f32 %v2062_v59, %v1952_v11 }
 0x1d6   : > { %2517 = vst [vmem:[%s3680_s9 + $0xa8] sm:$0xff] %v2068_v22 }
 0x1d7   : > { %v2026_v19 = vpop.f32.mrf.mxu0 }
 0x1d8   : > { %v2036_v18 = vadd.f32 %v2026_v19, %v1920_v39 }
 0x1da   : > { %2514 = vst [vmem:[%s3680_s9 + $0x38] sm:$0xff] %v2036_v18 }
 0x1db   : > { %v2065_v40 = vpop.f32.mrf.mxu3 }
 0x1dc   : > { %v2069_v23 = vadd.f32 %v2065_v40, %v1953_v63 }
 0x1dd   : > { %v2091_v28 = vpop.f32.mrf.mxu1 }
 0x1de   : > { %v2097_v46 = vadd.f32 %v2091_v28, %v1981_v29  ;;  %2518 = vst [vmem:[%s3680_s9 + $0xb8] sm:$0xff] %v2069_v23 }
 0x1df   : > { %v2029_v30 = vpop.f32.mrf.mxu0 }
 0x1e0   : > { %v2037_v31 = vadd.f32 %v2029_v30, %v1921_v26  ;;  %2519 = vst [vmem:[%s3680_s9 + $0xe8] sm:$0xff] %v2097_v46 }
 0x1e2   : > { %2515 = vst [vmem:[%s3680_s9 + $0x68] sm:$0xff] %v2037_v31 }
 0x1e5   : > { %v2094_v57 = vpop.f32.mrf.mxu1 }
 0x1e6   : > { %v2098_v43 = vadd.f32 %v2094_v57, %v1982_v32 }
 0x1e8   : > { %2520 = vst [vmem:[%s3680_s9 + $0xf8] sm:$0xff] %v2098_v43 }
 0x1e9 PF: > { %s15_s22 = sadd.s32 1, %s2654_s22   ;;  %s4326_s18 = smov %s2646_s20 }
 0x1ea   : > { %p12_p10 = scmp.ge.s32.totalorder %s15_s22, 10   ;;  %s4327_s19 = smov %s2650_s21 }
 0x1eb   : > { %s4328_s20 = smov %s4331_s23  ;;  %s4329_s21 = smov %s4335_s24 }
 0x1ec   :  { %14 = sbr.rel (!%p12_p10) target bundleno = 3 (0x3), region = 92 }

// kernel: _forward_impl.1
= control target key start
LH: loop header
LB: loop body
LE: loop exit
PB: predicated region body
PF: predicated region fallthrough
CT: control target
= control target key end

     0   :  { %s2686_s18 = smov 0   ;;  %s2688_s19 = smov 0   ;;  %s4319_s0 = inlined_call_operand.vmem [shape: f32[2,18,18,128], index: 0, kind: input, shape index: {}, may-alias: {0,1,2}]   ;;  %s4320_s1 = inlined_call_operand.vmem [shape: f32[2,18,18,128], index: 1, kind: input, shape index: {}, may-alias: {0,1,2}]   ;;  %s4321_s2 = inlined_call_operand.vmem [shape: f32[2,18,18,128], index: 2, kind: input, shape index: {}, may-alias: {0,1,2}]   ;;  %s4322_s3 = inlined_call_operand.vmem [shape: f32[16,128,128], index: 3, kind: input, shape index: {}]   ;;  %s4323_s4 = inlined_call_operand.vmem [shape: f32[1,128], index: 4, kind: input, shape index: {}]   ;;  %s4324_s5 = inlined_call_operand.vmem [shape: f32[32,2,16,256], index: 5, kind: output, shape index: {}]  }
   0x1   :  { %s2690_s20 = smov 0   ;;  %s2692_s21 = smov 0  }
   0x2   :  { %s2694_s22 = smov 0  }
   0x3 LB: > { %s24_s23 = sadd.s32 1, %s2646_s20  ;;  %s27_s24 = sadd.s32 1, %s2650_s21  ;;  %s2654_s22 = sphi %s2694_s22, %s15_s22   ;;  %s2650_s21 = sphi %s2692_s21, %s4329_s21   ;;  %s2646_s20 = sphi %s2690_s20, %s4328_s20   ;;  %s2642_s19 = sphi %s2688_s19, %s4327_s19   ;;  %s2638_s18 = sphi %s2686_s18, %s4326_s18  }
   0x4   : > { %p25_p0 = scmp.ge.s32.totalorder %s24_s23, 4  ;;  %p2254_p1 = scmp.ge.s32.totalorder %s2654_s22, 1 }
   0x5   : > { %p273_p2 = scmp.lt.s32.totalorder %s2654_s22, 9 }
   0x6   : > { %s4331_s23 = smov (%p25_p0, %s24_s23), 0  ;;  %s4333_s24 = smov (!%p25_p0, %s27_s24), %s2650_s21 }
   0x7   : > { %p274_p3 = pnand %p2254_p1, %p273_p2  ;;  %p29_p4 = scmp.ge.s32.totalorder %s4333_s24, 2 }
   0x8   : > { %s2763_s10 = sshll.u32 (!%p274_p3), %s2638_s18, 2  ;;  %p343_p5 = scmp.lt.s32.totalorder (!%p274_p3), %s2642_s19, 1 }
   0x9   : > { %s4335_s24 = smov (%p29_p4, %s4333_s24), 0  ;;  %277 = sbr.rel (%p274_p3) target bundleno = 489 (0x1e9), region = 40 }
   0xa   : > { %p345_p6 = scmp.lt.s32.totalorder (!%p274_p3), %s2763_s10, 17  ;;  %s2823_s9 = sadd.s32 (!%p274_p3), 4, %s2763_s10 }
   0xb   : > { %p362_p7 = scmp.lt.s32.totalorder (!%p274_p3), %s2823_s9, 17  ;;  %s373_s27 = sadd.s32 (!%p274_p3), 1, %s2823_s9 }
   0xc   : > { %p376_p8 = scmp.lt.s32.totalorder (!%p274_p3), %s373_s27, 17  ;;  %s2261_s17 = sshll.u32 (!%p274_p3), %s2642_s19, 2 }
   0xd   : > { %s3570_s26 = sadd.s32 (!%p274_p3), %s2638_s18, %s2261_s17 }
   0xe   : > { %v460_v0 = vld [vmem:[%s4322_s3 + $0x78] sm:$0xff]  ;;  %v459_v3 = vld [vmem:[%s4322_s3 + $0x70] sm:$0xff]  ;;  %v458_v6 = vld [vmem:[%s4322_s3 + $0x68] sm:$0xff]  ;;  %s344_s12 = scalar_select %p343_p5, %s2642_s19, 1 }
   0xf   : > { %v2280_v1 = vld [vmem:[%s4322_s3 + $0xf8] sm:$0xff]  ;;  %469 = vmatpush.msra.mxu0 %v460_v0  ;;  %v2279_v4 = vld [vmem:[%s4322_s3 + $0xf0] sm:$0xff]  ;;  %v2278_v7 = vld [vmem:[%s4322_s3 + $0xe8] sm:$0xff]  ;;  %s2803_s15 = scalar_select %p345_p6, %s2763_s10, 17 }
  0x10   : > { %v2296_v2 = vld [vmem:[%s4322_s3 + $0x178] sm:$0xff]  ;;  %551 = vmatpush.msra.mxu1 %v2280_v1  ;;  %v2295_v5 = vld [vmem:[%s4322_s3 + $0x170] sm:$0xff]  ;;  %v2294_v8 = vld [vmem:[%s4322_s3 + $0x168] sm:$0xff]  ;;  %s2820_s8 = smul.u32 54, %s344_s12  ;;  %s4337_s27 = smov (!%p376_p8, %s373_s27), 17 }
  0x11   : > { %631 = vmatpush.msra.mxu2 %v2296_v2  ;;  %680 = vmatpush.msra.mxu3 %v2296_v2  ;;  %v457_v9 = vld [vmem:[%s4322_s3 + $0x60] sm:$0xff]  ;;  %v456_v12 = vld [vmem:[%s4322_s3 + $0x58] sm:$0xff]  ;;  %v455_v15 = vld [vmem:[%s4322_s3 + $0x50] sm:$0xff]  ;;  %s2552_s14 = smul.u32 3, %s2803_s15 }
  0x12   : > { %470 = vmatpush.msra.mxu0 %v459_v3  ;;  %552 = vmatpush.msra.mxu1 %v2279_v4  ;;  %v2277_v10 = vld [vmem:[%s4322_s3 + $0xe0] sm:$0xff]  ;;  %v2276_v13 = vld [vmem:[%s4322_s3 + $0xd8] sm:$0xff]  ;;  %v2275_v16 = vld [vmem:[%s4322_s3 + $0xd0] sm:$0xff]  ;;  %s2861_s10 = scalar_select %p362_p7, %s2823_s9, 17 }
  0x13   : > { %632 = vmatpush.msra.mxu2 %v2295_v5  ;;  %681 = vmatpush.msra.mxu3 %v2295_v5  ;;  %v2293_v11 = vld [vmem:[%s4322_s3 + $0x160] sm:$0xff]  ;;  %v2292_v14 = vld [vmem:[%s4322_s3 + $0x158] sm:$0xff]  ;;  %v2291_v17 = vld [vmem:[%s4322_s3 + $0x150] sm:$0xff]  ;;  %s349_s7 = sadd.s32 %s2820_s8, %s2552_s14  ;;  %s2555_s25 = smul.u32 3, %s4337_s27 }
  0x14   : > { %471 = vmatpush.msra.mxu0 %v458_v6  ;;  %553 = vmatpush.msra.mxu1 %v2278_v7  ;;  %v454_v18 = vld [vmem:[%s4322_s3 + $0x48] sm:$0xff]  ;;  %v453_v21 = vld [vmem:[%s4322_s3 + $0x40] sm:$0xff]  ;;  %v452_v24 = vld [vmem:[%s4322_s3 + $0x38] sm:$0xff]  ;;  %s2256_s28 = sshll.u32 %s349_s7, 3  ;;  %s2554_s30 = smul.u32 3, %s2861_s10 }
  0x15   : > { %633 = vmatpush.msra.mxu2 %v2294_v8  ;;  %682 = vmatpush.msra.mxu3 %v2294_v8  ;;  %v2274_v19 = vld [vmem:[%s4322_s3 + $0xc8] sm:$0xff]  ;;  %v2273_v22 = vld [vmem:[%s4322_s3 + $0xc0] sm:$0xff]  ;;  %v2272_v25 = vld [vmem:[%s4322_s3 + $0xb8] sm:$0xff]  ;;  %s2884_s14 = scalar_lea.vmem %s4319_s0, %s2256_s28  ;;  %s3096_s28 = sadd.s32 %s2555_s25, %s2820_s8 }
  0x16   : > { %472 = vmatpush.msra.mxu0 %v457_v9  ;;  %554 = vmatpush.msra.mxu1 %v2277_v10  ;;  %v2290_v20 = vld [vmem:[%s4322_s3 + $0x148] sm:$0xff]  ;;  %v2289_v23 = vld [vmem:[%s4322_s3 + $0x140] sm:$0xff]  ;;  %v2288_v26 = vld [vmem:[%s4322_s3 + $0x138] sm:$0xff]  ;;  %s366_s7 = sadd.s32 %s2554_s30, %s2820_s8  ;;  %s2262_s30 = sshll.u32 %s3570_s26, 2 }
  0x17   : > { %634 = vmatpush.msra.mxu2 %v2293_v11  ;;  %683 = vmatpush.msra.mxu3 %v2293_v11  ;;  %v451_v27 = vld [vmem:[%s4322_s3 + $0x30] sm:$0xff]  ;;  %v450_v30 = vld [vmem:[%s4322_s3 + $0x28] sm:$0xff]  ;;  %v449_v33 = vld [vmem:[%s4322_s3 + $0x20] sm:$0xff]  ;;  %s2258_s6 = sshll.u32 %s366_s7, 3  ;;  %p3611_p9 = scmp.lt.s32.totalorder %s2262_s30, 31 }
  0x18   : > { %473 = vmatpush.msra.mxu0 %v456_v12  ;;  %555 = vmatpush.msra.mxu1 %v2276_v13  ;;  %v2271_v28 = vld [vmem:[%s4322_s3 + $0xb0] sm:$0xff]  ;;  %v2270_v31 = vld [vmem:[%s4322_s3 + $0xa8] sm:$0xff]  ;;  %v2269_v34 = vld [vmem:[%s4322_s3 + $0xa0] sm:$0xff]  ;;  %s2937_s12 = scalar_lea.vmem %s4320_s1, %s2258_s6  ;;  %s2260_s26 = sshll.u32 %s3096_s28, 3 }
  0x19   : > { %635 = vmatpush.msra.mxu2 %v2292_v14  ;;  %684 = vmatpush.msra.mxu3 %v2292_v14  ;;  %v2287_v29 = vld [vmem:[%s4322_s3 + $0x130] sm:$0xff]  ;;  %v2286_v32 = vld [vmem:[%s4322_s3 + $0x128] sm:$0xff]  ;;  %v2285_v35 = vld [vmem:[%s4322_s3 + $0x120] sm:$0xff]  ;;  %s4339_s30 = smov (!%p3611_p9, %s2262_s30), 31  ;;  %s3673_s6 = scalar_lea.vmem %s4321_s2, %s2260_s26 }
  0x1a   : > { %474 = vmatpush.msra.mxu0 %v455_v15  ;;  %556 = vmatpush.msra.mxu1 %v2275_v16  ;;  %v448_v36 = vld [vmem:[%s4322_s3 + $0x18] sm:$0xff]  ;;  %v447_v39 = vld [vmem:[%s4322_s3 + $0x10] sm:$0xff]  ;;  %v446_v42 = vld [vmem:[%s4322_s3 + $0x8] sm:$0xff]  ;;  %s2535_s19 = sshll.u32 %s4339_s30, 6 }
  0x1b   : > { %636 = vmatpush.msra.mxu2 %v2291_v17  ;;  %685 = vmatpush.msra.mxu3 %v2291_v17  ;;  %v2268_v37 = vld [vmem:[%s4322_s3 + $0x98] sm:$0xff]  ;;  %v2267_v40 = vld [vmem:[%s4322_s3 + $0x90] sm:$0xff]  ;;  %v2266_v43 = vld [vmem:[%s4322_s3 + $0x88] sm:$0xff]  ;;  %s3680_s9 = scalar_lea.vmem %s4324_s5, %s2535_s19 }
  0x1c   : > { %475 = vmatpush.msra.mxu0 %v454_v18  ;;  %557 = vmatpush.msra.mxu1 %v2274_v19  ;;  %v2284_v38 = vld [vmem:[%s4322_s3 + $0x118] sm:$0xff]  ;;  %v2283_v41 = vld [vmem:[%s4322_s3 + $0x110] sm:$0xff]  ;;  %v2282_v44 = vld [vmem:[%s4322_s3 + $0x108] sm:$0xff] }
  0x1d   : > { %637 = vmatpush.msra.mxu2 %v2290_v20  ;;  %686 = vmatpush.msra.mxu3 %v2290_v20  ;;  %v445_v45 = vld [vmem:[%s4322_s3] sm:$0xff]  ;;  %v2901_v50 = vld [vmem:[%s2884_s14 + $0x18] sm:$0xff]  ;;  %v2311_v53 = vld [vmem:[%s4322_s3 + $0x1f0] sm:$0xff] }
  0x1e   : > { %476 = vmatpush.msra.mxu0 %v453_v21  ;;  %558 = vmatpush.msra.mxu1 %v2273_v22  ;;  %v2265_v46 = vld [vmem:[%s4322_s3 + $0x80] sm:$0xff]  ;;  %v2312_v51 = vld [vmem:[%s4322_s3 + $0x1f8] sm:$0xff]  ;;  %v2327_v55 = vld [vmem:[%s4322_s3 + $0x270] sm:$0xff] }
  0x1f   : > { %638 = vmatpush.msra.mxu2 %v2289_v23  ;;  %687 = vmatpush.msra.mxu3 %v2289_v23  ;;  %v2281_v47 = vld [vmem:[%s4322_s3 + $0x100] sm:$0xff]  ;;  %v2328_v52 = vld [vmem:[%s4322_s3 + $0x278] sm:$0xff]  ;;  %v2310_v56 = vld [vmem:[%s4322_s3 + $0x1e8] sm:$0xff] }
  0x20   : > { %477 = vmatpush.msra.mxu0 %v452_v24  ;;  %559 = vmatpush.msra.mxu1 %v2272_v25  ;;  %v397_v48 = vld [vmem:[%s2884_s14] sm:$0xff]  ;;  %v2344_v54 = vld [vmem:[%s4322_s3 + $0x2f8] sm:$0xff]  ;;  %v2326_v57 = vld [vmem:[%s4322_s3 + $0x268] sm:$0xff] }
  0x21   : > { %639 = vmatpush.msra.mxu2 %v2288_v26  ;;  %688 = vmatpush.msra.mxu3 %v2288_v26  ;;  %v2898_v49 = vld [vmem:[%s2884_s14 + $0x1] sm:$0xff]  ;;  %v2343_v59 = vld [vmem:[%s4322_s3 + $0x2f0] sm:$0xff]  ;;  %v2308_v63 = vld [vmem:[%s4322_s3 + $0x1d8] sm:$0xff] }
  0x22   : > { %478 = vmatpush.msra.mxu0 %v451_v27  ;;  %560 = vmatpush.msra.mxu1 %v2271_v28  ;;  %v2309_v58 = vld [vmem:[%s4322_s3 + $0x1e0] sm:$0xff]  ;;  %v398_v60 = vld [vmem:[%s2884_s14 + $0x8] sm:$0xff]  ;;  %v2307_v2 = vld [vmem:[%s4322_s3 + $0x1d0] sm:$0xff] }
  0x23   : > { %640 = vmatpush.msra.mxu2 %v2287_v29  ;;  %689 = vmatpush.msra.mxu3 %v2287_v29  ;;  %v2940_v61 = vld [vmem:[%s2884_s14 + $0x9] sm:$0xff]  ;;  %v2943_v62 = vld [vmem:[%s2884_s14 + $0x20] sm:$0xff]  ;;  %v2324_v3 = vld [vmem:[%s4322_s3 + $0x258] sm:$0xff] }
  0x24   : > { %479 = vmatpush.msra.mxu0 %v450_v30  ;;  %561 = vmatpush.msra.mxu1 %v2270_v31  ;;  %v2949_v0 = vld [vmem:[%s2937_s12] sm:$0xff]  ;;  %v2342_v4 = vld [vmem:[%s4322_s3 + $0x2e8] sm:$0xff]  ;;  %v2323_v6 = vld [vmem:[%s4322_s3 + $0x250] sm:$0xff] }
  0x25   : > { %641 = vmatpush.msra.mxu2 %v2286_v32  ;;  %690 = vmatpush.msra.mxu3 %v2286_v32  ;;  %v2325_v1 = vld [vmem:[%s4322_s3 + $0x260] sm:$0xff]  ;;  %v2306_v5 = vld [vmem:[%s4322_s3 + $0x1c8] sm:$0xff]  ;;  %v2982_v10 = vld [vmem:[%s2884_s14 + $0x30] sm:$0xff] }
  0x26   : > { %480 = vmatpush.msra.mxu0 %v449_v33  ;;  %562 = vmatpush.msra.mxu1 %v2269_v34  ;;  %v2341_v7 = vld [vmem:[%s4322_s3 + $0x2e0] sm:$0xff]  ;;  %v2304_v11 = vld [vmem:[%s4322_s3 + $0x1b8] sm:$0xff]  ;;  %v2988_v12 = vld [vmem:[%s2937_s12 + $0x8] sm:$0xff] }
  0x27   : > { %642 = vmatpush.msra.mxu2 %v2285_v35  ;;  %691 = vmatpush.msra.mxu3 %v2285_v35  ;;  %v2305_v8 = vld [vmem:[%s4322_s3 + $0x1c0] sm:$0xff]  ;;  %v2303_v13 = vld [vmem:[%s4322_s3 + $0x1b0] sm:$0xff]  ;;  %v2322_v14 = vld [vmem:[%s4322_s3 + $0x248] sm:$0xff] }
  0x28   : > { %481 = vmatpush.msra.mxu0 %v448_v36  ;;  %563 = vmatpush.msra.mxu1 %v2268_v37  ;;  %v2979_v9 = vld [vmem:[%s2884_s14 + $0x19] sm:$0xff]  ;;  %v2302_v16 = vld [vmem:[%s4322_s3 + $0x1a8] sm:$0xff]  ;;  %v2339_v18 = vld [vmem:[%s4322_s3 + $0x2d0] sm:$0xff] }
  0x29   : > { %643 = vmatpush.msra.mxu2 %v2284_v38  ;;  %692 = vmatpush.msra.mxu3 %v2284_v38  ;;  %v2340_v15 = vld [vmem:[%s4322_s3 + $0x2d8] sm:$0xff]  ;;  %v2321_v17 = vld [vmem:[%s4322_s3 + $0x240] sm:$0xff]  ;;  %v2319_v24 = vld [vmem:[%s4322_s3 + $0x230] sm:$0xff] }
  0x2a   : > { %482 = vmatpush.msra.mxu0 %v447_v39  ;;  %564 = vmatpush.msra.mxu1 %v2267_v40  ;;  %v2301_v19 = vld [vmem:[%s4322_s3 + $0x1a0] sm:$0xff]  ;;  %v2320_v20 = vld [vmem:[%s4322_s3 + $0x238] sm:$0xff]  ;;  %v2338_v25 = vld [vmem:[%s4322_s3 + $0x2c8] sm:$0xff] }
  0x2b   : > { %644 = vmatpush.msra.mxu2 %v2283_v41  ;;  %693 = vmatpush.msra.mxu3 %v2283_v41  ;;  %v3019_v21 = vld [vmem:[%s2884_s14 + $0x21] sm:$0xff]  ;;  %v3022_v22 = vld [vmem:[%s2884_s14 + $0x38] sm:$0xff]  ;;  %v2299_v26 = vld [vmem:[%s4322_s3 + $0x190] sm:$0xff] }
  0x2c   : > { %483 = vmatpush.msra.mxu0 %v446_v42  ;;  %565 = vmatpush.msra.mxu1 %v2266_v43  ;;  %v2300_v23 = vld [vmem:[%s4322_s3 + $0x198] sm:$0xff]  ;;  %v2318_v27 = vld [vmem:[%s4322_s3 + $0x228] sm:$0xff]  ;;  %v2337_v28 = vld [vmem:[%s4322_s3 + $0x2c0] sm:$0xff] }
  0x2d   : > { %645 = vmatpush.msra.mxu2 %v2282_v44  ;;  %694 = vmatpush.msra.mxu3 %v2282_v44  ;;  %v2298_v29 = vld [vmem:[%s4322_s3 + $0x188] sm:$0xff]  ;;  %v2317_v30 = vld [vmem:[%s4322_s3 + $0x220] sm:$0xff]  ;;  %v2336_v31 = vld [vmem:[%s4322_s3 + $0x2b8] sm:$0xff] }
  0x2e   : > { %484 = vmatpush.msra.mxu0 %v445_v45  ;;  %566 = vmatpush.msra.mxu1 %v2265_v46  ;;  %v2297_v32 = vld [vmem:[%s4322_s3 + $0x180] sm:$0xff]  ;;  %v2360_v33 = vld [vmem:[%s4322_s3 + $0x378] sm:$0xff]  ;;  %v3065_v35 = vld [vmem:[%s2884_s14 + $0x48] sm:$0xff] }
  0x2f   : > { %646 = vmatpush.msra.mxu2 %v2281_v47  ;;  %695 = vmatpush.msra.mxu3 %v2281_v47  ;;  %v3062_v34 = vld [vmem:[%s2884_s14 + $0x31] sm:$0xff]  ;;  %v2358_v39 = vld [vmem:[%s4322_s3 + $0x368] sm:$0xff]  ;;  %v2357_v42 = vld [vmem:[%s4322_s3 + $0x360] sm:$0xff] }
  0x30   : > { %485 = vmatmul.f32.vlgmr.msra.gmra.mxu0 %v397_v48  ;;  %567 = vmatmul.f32.vlgmr.msra.gmra.mxu1 %v2898_v49  ;;  %v2359_v36 = vld [vmem:[%s4322_s3 + $0x370] sm:$0xff]  ;;  %v2316_v38 = vld [vmem:[%s4322_s3 + $0x218] sm:$0xff]  ;;  %v2334_v40 = vld [vmem:[%s4322_s3 + $0x2a8] sm:$0xff] }
  0x31   : > { %647 = vmatmul.f32.vlgmr.msra.gmra.mxu2 %v2901_v50  ;;  %730 = vmatpush.msrb.mxu3 %v2312_v51  ;;  %v2335_v37 = vld [vmem:[%s4322_s3 + $0x2b0] sm:$0xff]  ;;  %v2333_v43 = vld [vmem:[%s4322_s3 + $0x2a0] sm:$0xff]  ;;  %v2314_v44 = vld [vmem:[%s4322_s3 + $0x208] sm:$0xff] }
  0x32   : > { %779 = vmatpush.msrb.mxu2 %v2312_v51  ;;  %855 = vmatpush.msrb.mxu0 %v2328_v52  ;;  %v2315_v41 = vld [vmem:[%s4322_s3 + $0x210] sm:$0xff]  ;;  %v2356_v45 = vld [vmem:[%s4322_s3 + $0x358] sm:$0xff]  ;;  %v2313_v52 = vld [vmem:[%s4322_s3 + $0x200] sm:$0xff] }
  0x33   : > { %731 = vmatpush.msrb.mxu3 %v2311_v53  ;;  %937 = vmatpush.msrb.mxu1 %v2344_v54  ;;  %v3105_v46 = vld [vmem:[%s2884_s14 + $0x39] sm:$0xff]  ;;  %v3109_v47 = vld [vmem:[%s2884_s14 + $0x50] sm:$0xff] }
  0x34   : > { %780 = vmatpush.msrb.mxu2 %v2311_v53  ;;  %856 = vmatpush.msrb.mxu0 %v2327_v55  ;;  %v2355_v48 = vld [vmem:[%s4322_s3 + $0x350] sm:$0xff]  ;;  %v2332_v51 = vld [vmem:[%s4322_s3 + $0x298] sm:$0xff]  ;;  %v2354_v53 = vld [vmem:[%s4322_s3 + $0x348] sm:$0xff] }
  0x35   : > { %732 = vmatpush.msrb.mxu3 %v2310_v56  ;;  %938 = vmatpush.msrb.mxu1 %v2343_v59  ;;  %v2331_v54 = vld [vmem:[%s4322_s3 + $0x290] sm:$0xff]  ;;  %v2353_v55 = vld [vmem:[%s4322_s3 + $0x340] sm:$0xff] }
  0x36   : > { %781 = vmatpush.msrb.mxu2 %v2310_v56  ;;  %857 = vmatpush.msrb.mxu0 %v2326_v57  ;;  %v2330_v56 = vld [vmem:[%s4322_s3 + $0x288] sm:$0xff]  ;;  %v3138_v57 = vld [vmem:[%s4322_s3 + $0x3f8] sm:$0xff] }
  0x37   : > { %733 = vmatpush.msrb.mxu3 %v2309_v58  ;;  %939 = vmatpush.msrb.mxu1 %v2342_v4  ;;  %v3146_v59 = vld [vmem:[%s2884_s14 + $0x49] sm:$0xff]  ;;  %v2349_v4 = vld [vmem:[%s4322_s3 + $0x320] sm:$0xff] }
  0x38   : > { %782 = vmatpush.msrb.mxu2 %v2309_v58  ;;  %488 = vmatmul.f32.gmra.mxu0 %v398_v60  ;;  %v2352_v58 = vld [vmem:[%s4322_s3 + $0x338] sm:$0xff]  ;;  %v3149_v60 = vld [vmem:[%s2937_s12 + $0x1] sm:$0xff] }
  0x39   : > { %570 = vmatmul.f32.gmra.mxu1 %v2940_v61  ;;  %650 = vmatmul.f32.gmra.mxu2 %v2943_v62 }
  0x3a   : > { %734 = vmatpush.msrb.mxu3 %v2308_v63  ;;  %783 = vmatpush.msrb.mxu2 %v2308_v63  ;;  %v2351_v63 = vld [vmem:[%s4322_s3 + $0x330] sm:$0xff] }
  0x3b   : > { %696 = vmatmul.f32.vlgmr.msra.gmra.mxu3 %v2949_v0  ;;  %858 = vmatpush.msrb.mxu0 %v2325_v1  ;;  %v2329_v1 = vld [vmem:[%s4322_s3 + $0x280] sm:$0xff] }
  0x3c   : > { %735 = vmatpush.msrb.mxu3 %v2307_v2  ;;  %784 = vmatpush.msrb.mxu2 %v2307_v2  ;;  %v2350_v2 = vld [vmem:[%s4322_s3 + $0x328] sm:$0xff] }
  0x3d   : > { %859 = vmatpush.msrb.mxu0 %v2324_v3  ;;  %940 = vmatpush.msrb.mxu1 %v2341_v7  ;;  %v2375_v3 = vld [vmem:[%s4322_s3 + $0x3f0] sm:$0xff]  ;;  %v2348_v7 = vld [vmem:[%s4322_s3 + $0x318] sm:$0xff] }
  0x3e   : > { %736 = vmatpush.msrb.mxu3 %v2306_v5  ;;  %785 = vmatpush.msrb.mxu2 %v2306_v5  ;;  %v2392_v5 = vld [vmem:[%s4322_s3 + $0x478] sm:$0xff] }
  0x3f   : > { %860 = vmatpush.msrb.mxu0 %v2323_v6  ;;  %941 = vmatpush.msrb.mxu1 %v2340_v15  ;;  %v2374_v6 = vld [vmem:[%s4322_s3 + $0x3e8] sm:$0xff] }
  0x40   : > { %737 = vmatpush.msrb.mxu3 %v2305_v8  ;;  %786 = vmatpush.msrb.mxu2 %v2305_v8  ;;  %v3179_v8 = vld [vmem:[%s2884_s14 + $0x51] sm:$0xff]  ;;  %v2346_v15 = vld [vmem:[%s4322_s3 + $0x308] sm:$0xff] }
  0x41   : > { %491 = vmatmul.f32.gmra.mxu0 %v2901_v50  ;;  %573 = vmatmul.f32.gmra.mxu1 %v2979_v9 }
  0x42   : > { %653 = vmatmul.f32.gmra.mxu2 %v2982_v10  ;;  %738 = vmatpush.msrb.mxu3 %v2304_v11 }
  0x43   : > { %787 = vmatpush.msrb.mxu2 %v2304_v11  ;;  %699 = vmatmul.f32.gmra.mxu3 %v2988_v12  ;;  %v2373_v11 = vld [vmem:[%s4322_s3 + $0x3e0] sm:$0xff] }
  0x44   : > { %739 = vmatpush.msrb.mxu3 %v2303_v13  ;;  %861 = vmatpush.msrb.mxu0 %v2322_v14  ;;  %v2347_v14 = vld [vmem:[%s4322_s3 + $0x310] sm:$0xff] }
  0x45   : > { %788 = vmatpush.msrb.mxu2 %v2303_v13  ;;  %942 = vmatpush.msrb.mxu1 %v2339_v18  ;;  %v3186_v13 = vld [vmem:[%s2937_s12 + $0x9] sm:$0xff]  ;;  %v2345_v18 = vld [vmem:[%s4322_s3 + $0x300] sm:$0xff] }
  0x46   : > { %740 = vmatpush.msrb.mxu3 %v2302_v16  ;;  %862 = vmatpush.msrb.mxu0 %v2321_v17  ;;  %v2391_v17 = vld [vmem:[%s4322_s3 + $0x470] sm:$0xff] }
  0x47   : > { %789 = vmatpush.msrb.mxu2 %v2302_v16  ;;  %943 = vmatpush.msrb.mxu1 %v2338_v25  ;;  %v2372_v16 = vld [vmem:[%s4322_s3 + $0x3d8] sm:$0xff]  ;;  %v2370_v25 = vld [vmem:[%s4322_s3 + $0x3c8] sm:$0xff] }
  0x48   : > { %741 = vmatpush.msrb.mxu3 %v2301_v19  ;;  %863 = vmatpush.msrb.mxu0 %v2320_v20  ;;  %v2390_v20 = vld [vmem:[%s4322_s3 + $0x468] sm:$0xff] }
  0x49   : > { %790 = vmatpush.msrb.mxu2 %v2301_v19  ;;  %494 = vmatmul.f32.gmra.mxu0 %v2943_v62  ;;  %v2371_v19 = vld [vmem:[%s4322_s3 + $0x3d0] sm:$0xff] }
  0x4a   : > { %576 = vmatmul.f32.gmra.mxu1 %v3019_v21  ;;  %656 = vmatmul.f32.gmra.mxu2 %v3022_v22 }
  0x4b   : > { %742 = vmatpush.msrb.mxu3 %v2300_v23  ;;  %791 = vmatpush.msrb.mxu2 %v2300_v23  ;;  %v413_v23 = vld [vmem:[%s2884_s14 + $0x2] sm:$0xff] }
  0x4c   : > { %864 = vmatpush.msrb.mxu0 %v2319_v24  ;;  %944 = vmatpush.msrb.mxu1 %v2337_v28  ;;  %v2389_v24 = vld [vmem:[%s4322_s3 + $0x460] sm:$0xff]  ;;  %v2387_v28 = vld [vmem:[%s4322_s3 + $0x450] sm:$0xff] }
  0x4d   : > { %743 = vmatpush.msrb.mxu3 %v2299_v26  ;;  %792 = vmatpush.msrb.mxu2 %v2299_v26  ;;  %v2369_v26 = vld [vmem:[%s4322_s3 + $0x3c0] sm:$0xff] }
  0x4e   : > { %865 = vmatpush.msrb.mxu0 %v2318_v27  ;;  %945 = vmatpush.msrb.mxu1 %v2336_v31  ;;  %v414_v27 = vld [vmem:[%s2884_s14 + $0xa] sm:$0xff]  ;;  %v2385_v31 = vld [vmem:[%s4322_s3 + $0x440] sm:$0xff] }
  0x4f   : > { %744 = vmatpush.msrb.mxu3 %v2298_v29  ;;  %793 = vmatpush.msrb.mxu2 %v2298_v29  ;;  %v2386_v29 = vld [vmem:[%s4322_s3 + $0x448] sm:$0xff] }
  0x50   : > { %866 = vmatpush.msrb.mxu0 %v2317_v30  ;;  %946 = vmatpush.msrb.mxu1 %v2335_v37  ;;  %v2368_v30 = vld [vmem:[%s4322_s3 + $0x3b8] sm:$0xff]  ;;  %v2382_v37 = vld [vmem:[%s4322_s3 + $0x428] sm:$0xff] }
  0x51   : > { %745 = vmatpush.msrb.mxu3 %v2297_v32  ;;  %794 = vmatpush.msrb.mxu2 %v2297_v32  ;;  %v2384_v32 = vld [vmem:[%s4322_s3 + $0x438] sm:$0xff] }
  0x52   : > { %746 = vmatmul.f32.vlgmr.msrb.gmra.mxu3 %v2979_v9  ;;  %497 = vmatmul.f32.gmra.mxu0 %v2982_v10 }
  0x53   : > { %1017 = vmatpush.msra.mxu2 %v2360_v33  ;;  %579 = vmatmul.f32.gmra.mxu1 %v3062_v34 }
  0x54   : > { %659 = vmatmul.f32.gmra.mxu2 %v3065_v35  ;;  %1066 = vmatpush.msra.mxu3 %v2360_v33  ;;  %v415_v33 = vld [vmem:[%s2884_s14 + $0x1a] sm:$0xff] }
  0x55   : > { %1018 = vmatpush.msra.mxu2 %v2359_v36  ;;  %867 = vmatpush.msrb.mxu0 %v2316_v38  ;;  %v2366_v38 = vld [vmem:[%s4322_s3 + $0x3a8] sm:$0xff] }
  0x56   : > { %1067 = vmatpush.msra.mxu3 %v2359_v36  ;;  %947 = vmatpush.msrb.mxu1 %v2334_v40  ;;  %v2383_v36 = vld [vmem:[%s4322_s3 + $0x430] sm:$0xff]  ;;  %v2365_v40 = vld [vmem:[%s4322_s3 + $0x3a0] sm:$0xff] }
  0x57   : > { %1019 = vmatpush.msra.mxu2 %v2358_v39  ;;  %868 = vmatpush.msrb.mxu0 %v2315_v41  ;;  %v2380_v41 = vld [vmem:[%s4322_s3 + $0x418] sm:$0xff] }
  0x58   : > { %1068 = vmatpush.msra.mxu3 %v2358_v39  ;;  %948 = vmatpush.msrb.mxu1 %v2333_v43  ;;  %v2381_v39 = vld [vmem:[%s4322_s3 + $0x420] sm:$0xff]  ;;  %v2364_v43 = vld [vmem:[%s4322_s3 + $0x398] sm:$0xff] }
  0x59   : > { %1020 = vmatpush.msra.mxu2 %v2357_v42  ;;  %869 = vmatpush.msrb.mxu0 %v2314_v44  ;;  %v2379_v44 = vld [vmem:[%s4322_s3 + $0x410] sm:$0xff] }
  0x5a   : > { %749 = vmatmul.f32.gmra.mxu3 %v3019_v21  ;;  %500 = vmatmul.f32.gmra.mxu0 %v3022_v22 }
  0x5b   : > { %1021 = vmatpush.msra.mxu2 %v2356_v45  ;;  %1069 = vmatpush.msra.mxu3 %v2357_v42  ;;  %v416_v42 = vld [vmem:[%s2884_s14 + $0x22] sm:$0xff] }
  0x5c   : > { %582 = vmatmul.f32.gmra.mxu1 %v3105_v46  ;;  %662 = vmatmul.f32.gmra.mxu2 %v3109_v47 }
  0x5d   : > { %1070 = vmatpush.msra.mxu3 %v2356_v45  ;;  %1022 = vmatpush.msra.mxu2 %v2355_v48  ;;  %v2363_v45 = vld [vmem:[%s4322_s3 + $0x390] sm:$0xff] }
  0x5e   : > { %949 = vmatpush.msrb.mxu1 %v2332_v51  ;;  %870 = vmatpush.msrb.mxu0 %v2313_v52  ;;  %v2362_v51 = vld [vmem:[%s4322_s3 + $0x388] sm:$0xff]  ;;  %v2377_v52 = vld [vmem:[%s4322_s3 + $0x400] sm:$0xff] }
  0x5f   : > { %1071 = vmatpush.msra.mxu3 %v2355_v48  ;;  %1023 = vmatpush.msra.mxu2 %v2354_v53  ;;  %v2378_v48 = vld [vmem:[%s4322_s3 + $0x408] sm:$0xff] }
  0x60   : > { %950 = vmatpush.msrb.mxu1 %v2331_v54  ;;  %1165 = vmatpush.msra.mxu0 %v3138_v57  ;;  %v2361_v54 = vld [vmem:[%s4322_s3 + $0x380] sm:$0xff] }
  0x61   : > { %1072 = vmatpush.msra.mxu3 %v2354_v53  ;;  %1024 = vmatpush.msra.mxu2 %v2353_v55  ;;  %v2408_v53 = vld [vmem:[%s4322_s3 + $0x4f8] sm:$0xff] }
  0x62   : > { %752 = vmatmul.f32.gmra.mxu3 %v3062_v34  ;;  %951 = vmatpush.msrb.mxu1 %v2330_v56  ;;  %v417_v56 = vld [vmem:[%s2884_s14 + $0x32] sm:$0xff] }
  0x63   : > { %1073 = vmatpush.msra.mxu3 %v2353_v55  ;;  %1025 = vmatpush.msra.mxu2 %v2352_v58  ;;  %v2407_v55 = vld [vmem:[%s4322_s3 + $0x4f0] sm:$0xff] }
  0x64   : > { %503 = vmatmul.f32.gmra.mxu0 %v3065_v35  ;;  %585 = vmatmul.f32.gmra.mxu1 %v3146_v59 }
  0x65   : > { %795 = vmatmul.f32.vlgmr.msrb.gmra.mxu2 %v3149_v60  ;;  %1074 = vmatpush.msra.mxu3 %v2352_v58  ;;  %v3312_v58 = vld [vmem:[%s4322_s3 + $0x578] sm:$0xff] }
  0x66   : > { %1026 = vmatpush.msra.mxu2 %v2351_v63  ;;  %952 = vmatpush.msrb.mxu1 %v2329_v1  ;;  %v3321_v1 = vld [vmem:[%s4322_s3 + $0x570] sm:$0xff] }
  0x67   : > { %1166 = vmatpush.msra.mxu0 %v2375_v3  ;;  %1075 = vmatpush.msra.mxu3 %v2351_v63  ;;  %v2405_v63 = vld [vmem:[%s4322_s3 + $0x4e0] sm:$0xff] }
  0x68   : > { %1027 = vmatpush.msra.mxu2 %v2350_v2  ;;  %1239 = vmatpush.msra.mxu1 %v2392_v5 }
  0x69   : > { %1167 = vmatpush.msra.mxu0 %v2374_v6  ;;  %1076 = vmatpush.msra.mxu3 %v2350_v2  ;;  %v2404_v2 = vld [vmem:[%s4322_s3 + $0x4d8] sm:$0xff] }
  0x6a   : > { %1028 = vmatpush.msra.mxu2 %v2349_v4  ;;  %755 = vmatmul.f32.gmra.mxu3 %v3105_v46 }
  0x6b   : > { %1168 = vmatpush.msra.mxu0 %v2373_v11  ;;  %1077 = vmatpush.msra.mxu3 %v2349_v4  ;;  %v2403_v4 = vld [vmem:[%s4322_s3 + $0x4d0] sm:$0xff] }
  0x6c   : > { %1029 = vmatpush.msra.mxu2 %v2348_v7  ;;  %506 = vmatmul.f32.gmra.mxu0 %v3109_v47 }
  0x6d   : > { %588 = vmatmul.f32.gmra.mxu1 %v3179_v8  ;;  %798 = vmatmul.f32.gmra.mxu2 %v3186_v13 }
  0x6e   : > { %1078 = vmatpush.msra.mxu3 %v2348_v7  ;;  %1030 = vmatpush.msra.mxu2 %v2347_v14  ;;  %v3347_v7 = vld [vmem:[%s4322_s3 + $0x560] sm:$0xff] }
  0x6f   : > { %1169 = vmatpush.msra.mxu0 %v2372_v16  ;;  %1240 = vmatpush.msra.mxu1 %v2391_v17 }
  0x70   : > { %1079 = vmatpush.msra.mxu3 %v2347_v14  ;;  %1031 = vmatpush.msra.mxu2 %v2346_v15  ;;  %v3359_v14 = vld [vmem:[%s4322_s3 + $0x558] sm:$0xff] }
  0x71   : > { %1170 = vmatpush.msra.mxu0 %v2371_v19  ;;  %1241 = vmatpush.msra.mxu1 %v2390_v20 }
  0x72   : > { %1080 = vmatpush.msra.mxu3 %v2346_v15  ;;  %1032 = vmatpush.msra.mxu2 %v2345_v18  ;;  %v3366_v15 = vld [vmem:[%s4322_s3 + $0x4b8] sm:$0xff] }
  0x73   : > { %758 = vmatmul.f32.gmra.mxu3 %v3146_v59  ;;  %1242 = vmatpush.msra.mxu1 %v2389_v24 }
  0x74   : > { %1288 = vmatpush.msrb.mxu2 %v2392_v5  ;;  %1081 = vmatpush.msra.mxu3 %v2345_v18  ;;  %v418_v5 = vld [vmem:[%s2884_s14 + $0x3a] sm:$0xff]  ;;  %v3387_v18 = vld [vmem:[%s4322_s3 + $0x548] sm:$0xff] }
  0x75   : > { %871 = vmatmul.f32.vlgmr.msrb.gmra.mxu0 %v2898_v49  ;;  %953 = vmatmul.f32.vlgmr.msrb.gmra.mxu1 %v413_v23  ;;  %v2388_v49 = vld [vmem:[%s4322_s3 + $0x458] sm:$0xff]  ;;  %v3401_v23 = vld [vmem:[%s4322_s3 + $0x540] sm:$0xff] }
  0x76   : > { %1033 = vmatmul.f32.vlgmr.msra.gmra.mxu2 %v2979_v9  ;;  %1116 = vmatpush.msrb.mxu3 %v3138_v57  ;;  %v2406_v57 = vld [vmem:[%s4322_s3 + $0x4e8] sm:$0xff] }
  0x77   : > { %1289 = vmatpush.msrb.mxu2 %v2391_v17  ;;  %1171 = vmatpush.msra.mxu0 %v2370_v25  ;;  %v3379_v17 = vld [vmem:[%s4322_s3 + $0x4b0] sm:$0xff] }
  0x78   : > { %1117 = vmatpush.msrb.mxu3 %v2375_v3  ;;  %1243 = vmatpush.msra.mxu1 %v2388_v49  ;;  %v3330_v3 = vld [vmem:[%s4322_s3 + $0x568] sm:$0xff] }
  0x79   : > { %1290 = vmatpush.msrb.mxu2 %v2390_v20  ;;  %1172 = vmatpush.msra.mxu0 %v2369_v26  ;;  %v3394_v20 = vld [vmem:[%s4322_s3 + $0x4a8] sm:$0xff] }
  0x7a   : > { %1118 = vmatpush.msrb.mxu3 %v2374_v6  ;;  %1244 = vmatpush.msra.mxu1 %v2387_v28  ;;  %v3342_v6 = vld [vmem:[%s4322_s3 + $0x4c8] sm:$0xff] }
  0x7b   : > { %1291 = vmatpush.msrb.mxu2 %v2389_v24  ;;  %761 = vmatmul.f32.gmra.mxu3 %v3179_v8  ;;  %v3407_v24 = vld [vmem:[%s4322_s3 + $0x4a0] sm:$0xff] }
  0x7c   : > { %1119 = vmatpush.msrb.mxu3 %v2373_v11  ;;  %1245 = vmatpush.msra.mxu1 %v2386_v29  ;;  %v3354_v11 = vld [vmem:[%s4322_s3 + $0x4c0] sm:$0xff] }
  0x7d   : > { %1292 = vmatpush.msrb.mxu2 %v2388_v49  ;;  %874 = vmatmul.f32.gmra.mxu0 %v2940_v61  ;;  %v2367_v61 = vld [vmem:[%s4322_s3 + $0x3b0] sm:$0xff]  ;;  %v3419_v49 = vld [vmem:[%s4322_s3 + $0x498] sm:$0xff] }
  0x7e   : > { %956 = vmatmul.f32.gmra.mxu1 %v414_v27  ;;  %1036 = vmatmul.f32.gmra.mxu2 %v3019_v21  ;;  %v3432_v27 = vld [vmem:[%s4322_s3 + $0x490] sm:$0xff] }
  0x7f   : > { %1120 = vmatpush.msrb.mxu3 %v2372_v16  ;;  %1293 = vmatpush.msrb.mxu2 %v2387_v28  ;;  %v3371_v16 = vld [vmem:[%s4322_s3 + $0x550] sm:$0xff]  ;;  %v3439_v28 = vld [vmem:[%s4322_s3 + $0x528] sm:$0xff] }
  0x80   : > { %1173 = vmatpush.msra.mxu0 %v2368_v30  ;;  %1246 = vmatpush.msra.mxu1 %v2385_v31 }
  0x81   : > { %1121 = vmatpush.msrb.mxu3 %v2371_v19  ;;  %1294 = vmatpush.msrb.mxu2 %v2386_v29  ;;  %v419_v19 = vld [vmem:[%s2884_s14 + $0x4a] sm:$0xff]  ;;  %v420_v29 = vld [vmem:[%s2884_s14 + $0x52] sm:$0xff] }
  0x82   : > { %1174 = vmatpush.msra.mxu0 %v2367_v61  ;;  %1247 = vmatpush.msra.mxu1 %v2384_v32 }
  0x83   : > { %1122 = vmatpush.msrb.mxu3 %v2370_v25  ;;  %1295 = vmatpush.msrb.mxu2 %v2385_v31  ;;  %v3413_v25 = vld [vmem:[%s4322_s3 + $0x538] sm:$0xff] }
  0x84   : > { %1082 = vmatmul.f32.vlgmr.msra.gmra.mxu3 %v3149_v60  ;;  %1248 = vmatpush.msra.mxu1 %v2383_v36 }
  0x85   : > { %1123 = vmatpush.msrb.mxu3 %v2369_v26  ;;  %1296 = vmatpush.msrb.mxu2 %v2384_v32  ;;  %v3426_v26 = vld [vmem:[%s4322_s3 + $0x530] sm:$0xff]  ;;  %v3463_v32 = vld [vmem:[%s4322_s3 + $0x480] sm:$0xff] }
  0x86   : > { %877 = vmatmul.f32.gmra.mxu0 %v2979_v9  ;;  %959 = vmatmul.f32.gmra.mxu1 %v415_v33 }
  0x87   : > { %1039 = vmatmul.f32.gmra.mxu2 %v3062_v34  ;;  %1124 = vmatpush.msrb.mxu3 %v2368_v30 }
  0x88   : > { %1297 = vmatpush.msrb.mxu2 %v2383_v36  ;;  %1175 = vmatpush.msra.mxu0 %v2366_v38  ;;  %v3478_v36 = vld [vmem:[%s4322_s3 + $0x510] sm:$0xff] }
  0x89   : > { %1125 = vmatpush.msrb.mxu3 %v2367_v61  ;;  %1249 = vmatpush.msra.mxu1 %v2382_v37  ;;  %v3457_v61 = vld [vmem:[%s4322_s3 + $0x520] sm:$0xff] }
  0x8a   : > { %1298 = vmatpush.msrb.mxu2 %v2382_v37  ;;  %1176 = vmatpush.msra.mxu0 %v2365_v40  ;;  %v3484_v37 = vld [vmem:[%s2937_s12 + $0x2] sm:$0xff] }
  0x8b   : > { %1126 = vmatpush.msrb.mxu3 %v2366_v38  ;;  %1250 = vmatpush.msra.mxu1 %v2381_v39 }
  0x8c   : > { %1299 = vmatpush.msrb.mxu2 %v2381_v39  ;;  %1085 = vmatmul.f32.gmra.mxu3 %v3186_v13  ;;  %v3492_v39 = vld [vmem:[%s4322_s3 + $0x508] sm:$0xff] }
  0x8d   : > { %1127 = vmatpush.msrb.mxu3 %v2365_v40  ;;  %1177 = vmatpush.msra.mxu0 %v2364_v43 }
  0x8e   : > { %1300 = vmatpush.msrb.mxu2 %v2380_v41  ;;  %880 = vmatmul.f32.gmra.mxu0 %v3019_v21 }
  0x8f   : > { %962 = vmatmul.f32.gmra.mxu1 %v416_v42  ;;  %1042 = vmatmul.f32.gmra.mxu2 %v3105_v46 }
  0x90   : > { %1128 = vmatpush.msrb.mxu3 %v2364_v43  ;;  %1301 = vmatpush.msrb.mxu2 %v2379_v44  ;;  %v3512_v43 = vld [vmem:[%s4322_s3 + $0x5f8] sm:$0xff] }
  0x91   : > { %1251 = vmatpush.msra.mxu1 %v2380_v41  ;;  %1178 = vmatpush.msra.mxu0 %v2363_v45 }
  0x92   : > { %1129 = vmatpush.msrb.mxu3 %v2363_v45  ;;  %1302 = vmatpush.msrb.mxu2 %v2378_v48  ;;  %v3534_v45 = vld [vmem:[%s4322_s3 + $0x5e8] sm:$0xff] }
  0x93   : > { %1252 = vmatpush.msra.mxu1 %v2379_v44  ;;  %1179 = vmatpush.msra.mxu0 %v2362_v51 }
  0x94   : > { %1130 = vmatpush.msrb.mxu3 %v2362_v51  ;;  %1303 = vmatpush.msrb.mxu2 %v2377_v52 }
  0x95   : > { %1253 = vmatpush.msra.mxu1 %v2378_v48  ;;  %1180 = vmatpush.msra.mxu0 %v2361_v54  ;;  %v3539_v48 = vld [vmem:[%s2937_s12 + $0xa] sm:$0xff] }
  0x96   : > { %1387 = vmatpush.msra.mxu2 %v2408_v53  ;;  %1131 = vmatpush.msrb.mxu3 %v2361_v54  ;;  %v3563_v54 = vld [vmem:[%s4322_s3 + $0x5d8] sm:$0xff] }
  0x97   : > { %883 = vmatmul.f32.gmra.mxu0 %v3062_v34  ;;  %1132 = vmatmul.f32.vlgmr.msrb.gmra.mxu3 %v415_v33  ;;  %v3469_v33 = vld [vmem:[%s4322_s3 + $0x518] sm:$0xff] }
  0x98   : > { %1388 = vmatpush.msra.mxu2 %v2407_v55  ;;  %965 = vmatmul.f32.gmra.mxu1 %v417_v56 }
  0x99   : > { %1045 = vmatmul.f32.gmra.mxu2 %v3146_v59  ;;  %1435 = vmatpush.msra.mxu3 %v3312_v58 }
  0x9a   : > { %1389 = vmatpush.msra.mxu2 %v2406_v57  ;;  %1254 = vmatpush.msra.mxu1 %v2377_v52  ;;  %v3552_v52 = vld [vmem:[%s4322_s3 + $0x5e0] sm:$0xff] }
  0x9b   : > { %1436 = vmatpush.msra.mxu3 %v3321_v1  ;;  %1338 = vmatpush.msrb.mxu0 %v2408_v53 }
  0x9c   : > { %1390 = vmatpush.msra.mxu2 %v2405_v63  ;;  %1474 = vmatpush.msrb.mxu1 %v3312_v58 }
  0x9d   : > { %1437 = vmatpush.msra.mxu3 %v3330_v3  ;;  %1339 = vmatpush.msrb.mxu0 %v2407_v55 }
  0x9e   : > { %1391 = vmatpush.msra.mxu2 %v2404_v2  ;;  %1475 = vmatpush.msrb.mxu1 %v3321_v1 }
  0x9f   : > { %886 = vmatmul.f32.gmra.mxu0 %v3105_v46  ;;  %1135 = vmatmul.f32.gmra.mxu3 %v416_v42  ;;  %v3505_v42 = vld [vmem:[%s4322_s3 + $0x500] sm:$0xff] }
  0xa0   : > { %1392 = vmatpush.msra.mxu2 %v2403_v4  ;;  %968 = vmatmul.f32.gmra.mxu1 %v418_v5 }
  0xa1   : > { %1048 = vmatmul.f32.gmra.mxu2 %v3179_v8  ;;  %1438 = vmatpush.msra.mxu3 %v3347_v7 }
  0xa2   : > { %1393 = vmatpush.msra.mxu2 %v3342_v6  ;;  %1340 = vmatpush.msrb.mxu0 %v2406_v57  ;;  %v3590_v57 = vld [vmem:[%s4322_s3 + $0x5c8] sm:$0xff] }
  0xa3   : > { %1439 = vmatpush.msra.mxu3 %v3359_v14  ;;  %1476 = vmatpush.msrb.mxu1 %v3330_v3 }
  0xa4   : > { %1394 = vmatpush.msra.mxu2 %v3354_v11  ;;  %1341 = vmatpush.msrb.mxu0 %v2405_v63  ;;  %v3609_v63 = vld [vmem:[%s4322_s3 + $0x5c0] sm:$0xff] }
  0xa5   : > { %1440 = vmatpush.msra.mxu3 %v3371_v16  ;;  %1477 = vmatpush.msrb.mxu1 %v3347_v7 }
  0xa6   : > { %1395 = vmatpush.msra.mxu2 %v3366_v15  ;;  %1342 = vmatpush.msrb.mxu0 %v2404_v2  ;;  %v3624_v2 = vld [vmem:[%s4322_s3 + $0x5b8] sm:$0xff] }
  0xa7   : > { %889 = vmatmul.f32.gmra.mxu0 %v3146_v59  ;;  %1138 = vmatmul.f32.gmra.mxu3 %v417_v56 }
  0xa8   : > { %1396 = vmatpush.msra.mxu2 %v3379_v17  ;;  %1441 = vmatpush.msra.mxu3 %v3387_v18 }
  0xa9   : > { %971 = vmatmul.f32.gmra.mxu1 %v419_v19  ;;  %1304 = vmatmul.f32.vlgmr.msrb.gmra.mxu2 %v2949_v0  ;;  %v3451_v0 = vld [vmem:[%s4322_s3 + $0x488] sm:$0xff] }
  0xaa   : > { %1397 = vmatpush.msra.mxu2 %v3394_v20  ;;  %1442 = vmatpush.msra.mxu3 %v3401_v23 }
  0xab   : > { %1478 = vmatpush.msrb.mxu1 %v3359_v14  ;;  %1343 = vmatpush.msrb.mxu0 %v2403_v4  ;;  %v3648_v4 = vld [vmem:[%s4322_s3 + $0x5a8] sm:$0xff] }
  0xac   : > { %1398 = vmatpush.msra.mxu2 %v3407_v24  ;;  %1443 = vmatpush.msra.mxu3 %v3413_v25 }
  0xad   : > { %v3442_v30 = vpop.f32.mrf.mxu0  ;;  %v3444_v31 = vpop.f32.mrf.mxu1  ;;  %1479 = vmatpush.msrb.mxu1 %v3371_v16  ;;  %1344 = vmatpush.msrb.mxu0 %v3342_v6 }
  0xae   : > { %1399 = vmatpush.msra.mxu2 %v3419_v49  ;;  %1444 = vmatpush.msra.mxu3 %v3426_v26 }
  0xaf   : > { %892 = vmatmul.f32.gmra.mxu0 %v3179_v8  ;;  %1141 = vmatmul.f32.gmra.mxu3 %v418_v5 }
  0xb0   : > { %1400 = vmatpush.msra.mxu2 %v3432_v27  ;;  %1445 = vmatpush.msra.mxu3 %v3439_v28 }
  0xb1   : > { %974 = vmatmul.f32.gmra.mxu1 %v420_v29  ;;  %1345 = vmatpush.msrb.mxu0 %v3354_v11  ;;  %v3668_v11 = vld [vmem:[%s4322_s3 + $0x5a0] sm:$0xff] }
  0xb2   : > { %1401 = vmatpush.msra.mxu2 %v3451_v0  ;;  %1446 = vmatpush.msra.mxu3 %v3457_v61 }
  0xb3   : > { %1480 = vmatpush.msrb.mxu1 %v3387_v18  ;;  %1346 = vmatpush.msrb.mxu0 %v3366_v15 }
  0xb4   : > { %1402 = vmatpush.msra.mxu2 %v3463_v32  ;;  %1447 = vmatpush.msra.mxu3 %v3469_v33  ;;  %v3486_v38 = vpop.f32.mrf.mxu2 }
  0xb5   : > { %1481 = vmatpush.msrb.mxu1 %v3401_v23  ;;  %v3495_v40 = vpop.f32.mrf.mxu0  ;;  %1307 = vmatmul.f32.gmra.mxu2 %v2988_v12 }
  0xb6   : > { %1503 = vmatpush.msrb.mxu2 %v3312_v58  ;;  %1448 = vmatpush.msra.mxu3 %v3478_v36  ;;  %v3499_v41 = vpop.f32.mrf.mxu1 }
  0xb7   : > { %1144 = vmatmul.f32.gmra.mxu3 %v419_v19  ;;  %1181 = vmatmul.f32.vlgmr.msra.gmra.mxu0 %v3484_v37  ;;  %v3704_v19 = vld [vmem:[%s4322_s3 + $0x590] sm:$0xff] }
  0xb8   : > { %1504 = vmatpush.msrb.mxu2 %v3321_v1  ;;  %1449 = vmatpush.msra.mxu3 %v3492_v39 }
  0xb9   : > { %1255 = vmatmul.f32.vlgmr.msra.gmra.mxu1 %v2901_v50  ;;  %v3523_v50 = vld [vmem:[%s4322_s3 + $0x5f0] sm:$0xff]  ;;  %1347 = vmatpush.msrb.mxu0 %v3379_v17  ;;  %v427_v17 = vld [vmem:[%s3673_s6] sm:$0xff] }
  0xba   : > { %1505 = vmatpush.msrb.mxu2 %v3330_v3  ;;  %1450 = vmatpush.msra.mxu3 %v3505_v42 }
  0xbb   : > { %1482 = vmatpush.msrb.mxu1 %v3413_v25  ;;  %1348 = vmatpush.msrb.mxu0 %v3394_v20 }
  0xbc   : > { %1506 = vmatpush.msrb.mxu2 %v3347_v7  ;;  %1551 = vmatpush.msrb.mxu3 %v3512_v43  ;;  %v3527_v44 = vpop.f32.mrf.mxu2 }
  0xbd   : > { %1483 = vmatpush.msrb.mxu1 %v3426_v26  ;;  %1349 = vmatpush.msrb.mxu0 %v3407_v24 }
  0xbe   : > { %1507 = vmatpush.msrb.mxu2 %v3359_v14  ;;  %1552 = vmatpush.msrb.mxu3 %v3523_v50  ;;  %v3541_v12 = vpop.f32.mrf.mxu0  ;;  %v3543_v51 = vpop.f32.mrf.mxu1 }
  0xbf   : > { %1484 = vmatpush.msrb.mxu1 %v3439_v28  ;;  %1147 = vmatmul.f32.gmra.mxu3 %v420_v29  ;;  %v3555_v53 = vpop.f32.mrf.mxu3 }
  0xc0   : > { %1508 = vmatpush.msrb.mxu2 %v3371_v16  ;;  %1553 = vmatpush.msrb.mxu3 %v3534_v45  ;;  %v3689_v16 = vld [vmem:[%s4322_s3 + $0x598] sm:$0xff] }
  0xc1   : > { %1184 = vmatmul.f32.gmra.mxu0 %v3539_v48  ;;  %1258 = vmatmul.f32.gmra.mxu1 %v2943_v62  ;;  %v3577_v62 = vld [vmem:[%s4322_s3 + $0x5d0] sm:$0xff] }
  0xc2   : > { %1509 = vmatpush.msrb.mxu2 %v3387_v18  ;;  %1485 = vmatpush.msrb.mxu1 %v3457_v61 }
  0xc3   : > { %1554 = vmatpush.msrb.mxu3 %v3552_v52  ;;  %1350 = vmatpush.msrb.mxu0 %v3419_v49  ;;  %v3721_v49 = vld [vmem:[%s4322_s3 + $0x588] sm:$0xff] }
  0xc4   : > { %1510 = vmatpush.msrb.mxu2 %v3401_v23  ;;  %1486 = vmatpush.msrb.mxu1 %v3469_v33 }
  0xc5   : > { %1555 = vmatpush.msrb.mxu3 %v3563_v54  ;;  %v3579_v55 = vpop.f32.mrf.mxu2  ;;  %1351 = vmatpush.msrb.mxu0 %v3432_v27  ;;  %v2462_v27 = vld [vmem:[%s4322_s3 + $0x668] sm:$0xff] }
  0xc6   : > { %1403 = vmatmul.f32.vlgmr.msra.gmra.mxu2 %v3149_v60  ;;  %v3583_v56 = vpop.f32.mrf.mxu0  ;;  %1487 = vmatpush.msrb.mxu1 %v3478_v36  ;;  %v3602_v60 = vld [vmem:[%s4323_s4] ss:$0 sm:$0xff] }
  0xc7   : > { %1511 = vmatpush.msrb.mxu2 %v3413_v25  ;;  %v3592_v58 = vpop.f32.mrf.mxu1  ;;  %1556 = vmatpush.msrb.mxu3 %v3577_v62  ;;  %v3617_v1 = vpop.f32.mrf.mxu3  ;;  %v511_v15 = vadd.f32 %v3602_v60, %v3495_v40  ;;  %v2463_v25 = vld [vmem:[%s4322_s3 + $0x670] sm:$0xff]  ;;  %v512_v29 = vadd.f32 %v3602_v60, %v3541_v12  ;;  %v2457_v12 = vld [vmem:[%s4322_s3 + $0x640] sm:$0xff] }
  0xc8   : > { %1352 = vmatpush.msrb.mxu0 %v3451_v0  ;;  %1488 = vmatpush.msrb.mxu1 %v3492_v39  ;;  %v2461_v0 = vld [vmem:[%s4322_s3 + $0x660] sm:$0xff] }
  0xc9   : > { %1512 = vmatpush.msrb.mxu2 %v3426_v26  ;;  %1557 = vmatpush.msrb.mxu3 %v3590_v57  ;;  %v593_v24 = vadd.f32 %v3499_v41, %v511_v15  ;;  %v2598_v15 = vld [vmem:[%s2937_s12] sm:$0xff] }
  0xca   : > { %1353 = vmatpush.msrb.mxu0 %v3463_v32  ;;  %1451 = vmatmul.f32.vlgmr.msra.gmra.mxu3 %v2982_v10  ;;  %v2460_v32 = vld [vmem:[%s4322_s3 + $0x658] sm:$0xff] }
  0xcb   : > { %1261 = vmatmul.f32.gmra.mxu1 %v2982_v10  ;;  %1354 = vmatmul.f32.vlgmr.msrb.gmra.mxu0 %v2979_v9  ;;  %v510_v10 = vadd.f32 %v3602_v60, %v3442_v30  ;;  %v3637_v9 = vld [vmem:[%s4322_s3 + $0x5b0] sm:$0xff]  ;;  %v667_v26 = vadd.f32 %v3527_v44, %v593_v24  ;;  %v3738_v30 = vld [vmem:[%s4322_s3 + $0x580] sm:$0xff]  ;;  %v513_v44 = vadd.f32 %v3602_v60, %v3583_v56 }
  0xcc   : > { %1489 = vmatpush.msrb.mxu1 %v3505_v42  ;;  %1513 = vmatpush.msrb.mxu2 %v3439_v28  ;;  %v2477_v24 = vld [vmem:[%s4322_s3 + $0x6e0] sm:$0xff] }
  0xcd   : > { %1558 = vmatpush.msrb.mxu3 %v3609_v63  ;;  %v3628_v3 = vpop.f32.mrf.mxu2  ;;  %1590 = vmatpush.msra.mxu0 %v3512_v43  ;;  %v592_v7 = vadd.f32 %v3444_v31, %v510_v10  ;;  %v2454_v10 = vld [vmem:[%s4322_s3 + $0x628] sm:$0xff] }
  0xce   : > { %1619 = vmatpush.msra.mxu1 %v3512_v43  ;;  %1514 = vmatpush.msrb.mxu2 %v3457_v61 }
  0xcf   : > { %1559 = vmatpush.msrb.mxu3 %v3624_v2  ;;  %1406 = vmatmul.f32.gmra.mxu2 %v3186_v13  ;;  %v3650_v5 = vpop.f32.mrf.mxu0  ;;  %v666_v13 = vadd.f32 %v3486_v38, %v592_v7  ;;  %v2459_v38 = vld [vmem:[%s4322_s3 + $0x650] sm:$0xff] }
  0xd0   : > { %1620 = vmatpush.msra.mxu1 %v3523_v50  ;;  %v3652_v6 = vpop.f32.mrf.mxu1  ;;  %1515 = vmatpush.msrb.mxu2 %v3469_v33 }
  0xd1   : > { %1560 = vmatpush.msrb.mxu3 %v3637_v9  ;;  %1591 = vmatpush.msra.mxu0 %v3523_v50 }
  0xd2   : > { %1621 = vmatpush.msra.mxu1 %v3534_v45  ;;  %1516 = vmatpush.msrb.mxu2 %v3478_v36  ;;  %v594_v36 = vadd.f32 %v3543_v51, %v512_v29  ;;  %v2449_v29 = vld [vmem:[%s4322_s3 + $0x600] sm:$0xff] }
  0xd3   : > { %1561 = vmatpush.msrb.mxu3 %v3648_v4  ;;  %1592 = vmatpush.msra.mxu0 %v3534_v45 }
  0xd4   : > { %1454 = vmatmul.f32.gmra.mxu3 %v3022_v22  ;;  %1622 = vmatpush.msra.mxu1 %v3552_v52 }
  0xd5   : > { %1357 = vmatmul.f32.gmra.mxu0 %v3019_v21  ;;  %v747_v14 = vpop.f32.mrf.mxu3  ;;  %1264 = vmatmul.f32.gmra.mxu1 %v3022_v22  ;;  %v2464_v22 = vld [vmem:[%s4322_s3 + $0x678] sm:$0xff] }
  0xd6   : > { %1517 = vmatpush.msrb.mxu2 %v3492_v39  ;;  %v765_v21 = vadd.f32 %v747_v14, %v666_v13  ;;  %1562 = vmatpush.msrb.mxu3 %v3668_v11  ;;  %v668_v39 = vadd.f32 %v3579_v55, %v594_v36  ;;  %v2456_v55 = vld [vmem:[%s4322_s3 + $0x638] sm:$0xff]  ;;  %v2453_v14 = vld [vmem:[%s4322_s3 + $0x620] sm:$0xff] }
  0xd7   : > { %1593 = vmatpush.msra.mxu0 %v3552_v52  ;;  %v3694_v18 = vpop.f32.mrf.mxu2  ;;  %1623 = vmatpush.msra.mxu1 %v3563_v54  ;;  %v3709_v20 = vpop.f32.mrf.mxu0  ;;  %v428_v52 = vld [vmem:[%s3673_s6 + $0x8] sm:$0xff]  ;;  %v2473_v36 = vld [vmem:[%s4322_s3 + $0x6c0] sm:$0xff] }
  0xd8   : > { %1518 = vmatpush.msrb.mxu2 %v3505_v42  ;;  %814 = vst [vmem:[%s3680_s9] sm:$0xff] %v765_v21  ;;  %1563 = vmatpush.msrb.mxu3 %v3689_v16  ;;  %v2458_v42 = vld [vmem:[%s4322_s3 + $0x648] sm:$0xff] }
  0xd9   : > { %1594 = vmatpush.msra.mxu0 %v3563_v54  ;;  %v3711_v23 = vpop.f32.mrf.mxu1  ;;  %1519 = vmatmul.f32.vlgmr.msrb.gmra.mxu2 %v427_v17 }
  0xda   : > { %1624 = vmatpush.msra.mxu1 %v3577_v62  ;;  %1694 = vmatpush.msra.mxu2 %v2464_v22 }
  0xdb   : > { %1564 = vmatpush.msrb.mxu3 %v3704_v19  ;;  %1595 = vmatpush.msra.mxu0 %v3577_v62  ;;  %v595_v62 = vadd.f32 %v3592_v58, %v513_v44  ;;  %v2471_v44 = vld [vmem:[%s4322_s3 + $0x6b0] sm:$0xff] }
  0xdc   : > { %1625 = vmatpush.msra.mxu1 %v3590_v57  ;;  %1695 = vmatpush.msra.mxu2 %v2463_v25 }
  0xdd   : > { %1565 = vmatpush.msrb.mxu3 %v3721_v49  ;;  %v750_v28 = vpop.f32.mrf.mxu3  ;;  %1596 = vmatpush.msra.mxu0 %v3590_v57 }
  0xde   : > { %1457 = vmatmul.f32.gmra.mxu3 %v3065_v35  ;;  %v766_v31 = vadd.f32 %v750_v28, %v667_v26  ;;  %1626 = vmatpush.msra.mxu1 %v3609_v63  ;;  %v2476_v28 = vld [vmem:[%s4322_s3 + $0x6d8] sm:$0xff] }
  0xdf   : > { %1696 = vmatpush.msra.mxu2 %v2462_v27  ;;  %1267 = vmatmul.f32.gmra.mxu1 %v3065_v35  ;;  %v3747_v61 = vpop.f32.mrf.mxu2 }
  0xe0   : > { %1360 = vmatmul.f32.gmra.mxu0 %v3062_v34  ;;  %815 = vst [vmem:[%s3680_s9 + $0x10] sm:$0xff] %v766_v31  ;;  %1566 = vmatpush.msrb.mxu3 %v3738_v30  ;;  %v2475_v31 = vld [vmem:[%s4322_s3 + $0x6d0] sm:$0xff] }
  0xe1   : > { %1597 = vmatpush.msra.mxu0 %v3609_v63  ;;  %v504_v33 = vpop.f32.mrf.mxu0  ;;  %1627 = vmatpush.msra.mxu1 %v3624_v2  ;;  %v586_v34 = vpop.f32.mrf.mxu1  ;;  %v514_v63 = vadd.f32 %v3602_v60, %v3650_v5 }
  0xe2   : > { %1697 = vmatpush.msra.mxu2 %v2461_v0  ;;  %v516_v35 = vadd.f32 %v3602_v60, %v504_v33  ;;  %1743 = vmatpush.msra.mxu3 %v2464_v22  ;;  %v515_v22 = vadd.f32 %v3602_v60, %v3709_v20  ;;  %v2450_v20 = vld [vmem:[%s4322_s3 + $0x608] sm:$0xff]  ;;  %v2601_v33 = vld [vmem:[%s2884_s14 + $0x19] sm:$0xff] }
  0xe3   : > { %1598 = vmatpush.msra.mxu0 %v3624_v2  ;;  %1628 = vmatpush.msra.mxu1 %v3637_v9 }
  0xe4   : > { %1698 = vmatpush.msra.mxu2 %v2460_v32  ;;  %v598_v40 = vadd.f32 %v586_v34, %v516_v35  ;;  %1744 = vmatpush.msra.mxu3 %v2463_v25  ;;  %v3884_v35 = vld [vmem:[%s4322_s3 + $0x770] sm:$0xff] }
  0xe5   : > { %1599 = vmatpush.msra.mxu0 %v3637_v9  ;;  %v753_v41 = vpop.f32.mrf.mxu3  ;;  %1629 = vmatpush.msra.mxu1 %v3648_v4 }
  0xe6   : > { %1699 = vmatpush.msra.mxu2 %v2459_v38  ;;  %v767_v43 = vadd.f32 %v753_v41, %v668_v39  ;;  %v703_v50 = vadd.f32 %v3555_v53, %v598_v40  ;;  %1745 = vmatpush.msra.mxu3 %v2462_v27  ;;  %v3853_v27 = vld [vmem:[%s2884_s14 + $0x39] sm:$0xff]  ;;  %v3893_v39 = vld [vmem:[%s3673_s6 + $0x1] sm:$0xff]  ;;  %v3896_v40 = vld [vmem:[%s2884_s14 + $0x49] sm:$0xff] }
  0xe7   : > { %1600 = vmatpush.msra.mxu0 %v3648_v4  ;;  %1460 = vmatmul.f32.gmra.mxu3 %v3109_v47  ;;  %v3806_v4 = vld [vmem:[%s2884_s14 + $0x31] sm:$0xff] }
  0xe8   : > { %1630 = vmatpush.msra.mxu1 %v3668_v11  ;;  %816 = vst [vmem:[%s3680_s9 + $0x40] sm:$0xff] %v767_v43  ;;  %v796_v45 = vpop.f32.mrf.mxu2  ;;  %1700 = vmatpush.msra.mxu2 %v2458_v42  ;;  %v2472_v41 = vld [vmem:[%s4322_s3 + $0x6b8] sm:$0xff]  ;;  %v3908_v43 = vld [vmem:[%s2937_s12 + $0x1] sm:$0xff] }
  0xe9   : > { %1746 = vmatpush.msra.mxu3 %v2461_v0  ;;  %v802_v51 = vadd.f32 %v796_v45, %v703_v50  ;;  %1270 = vmatmul.f32.gmra.mxu1 %v3109_v47  ;;  %v507_v53 = vpop.f32.mrf.mxu0  ;;  %v2455_v47 = vld [vmem:[%s4322_s3 + $0x630] sm:$0xff]  ;;  %v3922_v45 = vld [vmem:[%s4322_s3 + $0x760] sm:$0xff] }
  0xea   : > { %1363 = vmatmul.f32.gmra.mxu0 %v3105_v46  ;;  %v589_v54 = vpop.f32.mrf.mxu1  ;;  %1631 = vmatpush.msra.mxu1 %v3689_v16  ;;  %v517_v56 = vadd.f32 %v3602_v60, %v507_v53  ;;  %v669_v46 = vadd.f32 %v3628_v3, %v595_v62 }
  0xeb   : > { %1601 = vmatpush.msra.mxu0 %v3668_v11  ;;  %820 = vst [vmem:[%s3680_s9 + $0xc0] sm:$0xff] %v802_v51  ;;  %1701 = vmatpush.msra.mxu2 %v2457_v12  ;;  %v596_v11 = vadd.f32 %v3652_v6, %v514_v63  ;;  %v2452_v6 = vld [vmem:[%s4322_s3 + $0x618] sm:$0xff]  ;;  %v2470_v51 = vld [vmem:[%s4322_s3 + $0x6a8] sm:$0xff] }
  0xec   : > { %1747 = vmatpush.msra.mxu3 %v2460_v32  ;;  %1522 = vmatmul.f32.gmra.mxu2 %v428_v52  ;;  %v599_v57 = vadd.f32 %v589_v54, %v517_v56  ;;  %v3932_v52 = vld [vmem:[%s4322_s3 + $0x758] sm:$0xff]  ;;  %v2469_v54 = vld [vmem:[%s4322_s3 + $0x6a0] sm:$0xff] }
  0xed   : > { %1602 = vmatpush.msra.mxu0 %v3689_v16  ;;  %1632 = vmatpush.msra.mxu1 %v3704_v19  ;;  %v756_v58 = vpop.f32.mrf.mxu3  ;;  %v2479_v16 = vld [vmem:[%s4322_s3 + $0x6f0] sm:$0xff]  ;;  %v670_v21 = vadd.f32 %v3694_v18, %v596_v11 }
  0xee   : > { %1702 = vmatpush.msra.mxu2 %v2456_v55  ;;  %1748 = vmatpush.msra.mxu3 %v2459_v38  ;;  %v768_v2 = vadd.f32 %v756_v58, %v669_v46  ;;  %v704_v3 = vadd.f32 %v3617_v1, %v599_v57  ;;  %v2480_v1 = vld [vmem:[%s4322_s3 + $0x6f8] sm:$0xff]  ;;  %v2451_v18 = vld [vmem:[%s4322_s3 + $0x610] sm:$0xff]  ;;  %v3964_v58 = vld [vmem:[%s4322_s3 + $0x748] sm:$0xff] }
  0xef   : > { %1603 = vmatpush.msra.mxu0 %v3704_v19  ;;  %1633 = vmatpush.msra.mxu1 %v3721_v49  ;;  %v3950_v46 = vld [vmem:[%s3673_s6 + $0x9] sm:$0xff]  ;;  %v3958_v57 = vld [vmem:[%s2884_s14 + $0x51] sm:$0xff] }
  0xf0   : > { %1703 = vmatpush.msra.mxu2 %v2455_v47  ;;  %1749 = vmatpush.msra.mxu3 %v2458_v42  ;;  %817 = vst [vmem:[%s3680_s9 + $0x50] sm:$0xff] %v768_v2  ;;  %v799_v9 = vpop.f32.mrf.mxu2  ;;  %v3905_v42 = vld [vmem:[%s4322_s3 + $0x768] sm:$0xff] }
  0xf1   : > { %1604 = vmatpush.msra.mxu0 %v3721_v49  ;;  %1567 = vmatmul.f32.vlgmr.msrb.gmra.mxu3 %v3806_v4  ;;  %v803_v5 = vadd.f32 %v799_v9, %v704_v3  ;;  %v597_v49 = vadd.f32 %v3711_v23, %v515_v22  ;;  %v3970_v2 = vld [vmem:[%s2937_s12 + $0x9] sm:$0xff]  ;;  %v3983_v9 = vld [vmem:[%s4322_s3 + $0x740] sm:$0xff] }
  0xf2   : > { %1634 = vmatpush.msra.mxu1 %v3738_v30  ;;  %v3813_v7 = vpop.f32.mrf.mxu0  ;;  %v3815_v13 = vpop.f32.mrf.mxu1  ;;  %1704 = vmatpush.msra.mxu2 %v2454_v10  ;;  %v2467_v3 = vld [vmem:[%s4322_s3 + $0x690] sm:$0xff] }
  0xf3   : > { %1750 = vmatpush.msra.mxu3 %v2457_v12  ;;  %1366 = vmatmul.f32.gmra.mxu0 %v3146_v59  ;;  %821 = vst [vmem:[%s3680_s9 + $0xd0] sm:$0xff] %v803_v5  ;;  %v2478_v59 = vld [vmem:[%s4322_s3 + $0x6e8] sm:$0xff]  ;;  %v671_v23 = vadd.f32 %v3747_v61, %v597_v49 }
  0xf4   : > { %1490 = vmatmul.f32.vlgmr.msrb.gmra.mxu1 %v2598_v15  ;;  %1605 = vmatpush.msra.mxu0 %v3738_v30  ;;  %v2600_v30 = vld [vmem:[%s2937_s12 + $0x8] sm:$0xff] }
  0xf5   : > { %1842 = vmatpush.msrb.mxu1 %v2480_v1  ;;  %1705 = vmatpush.msra.mxu2 %v2453_v14  ;;  %v2474_v61 = vld [vmem:[%s4322_s3 + $0x6c8] sm:$0xff] }
  0xf6   : > { %1751 = vmatpush.msra.mxu3 %v2456_v55  ;;  %v759_v17 = vpop.f32.mrf.mxu3  ;;  %1793 = vmatpush.msrb.mxu0 %v2480_v1  ;;  %v2604_v12 = vld [vmem:[%s2884_s14 + $0x21] sm:$0xff]  ;;  %v3946_v55 = vld [vmem:[%s4322_s3 + $0x750] sm:$0xff] }
  0xf7   : > { %1843 = vmatpush.msrb.mxu1 %v2479_v16  ;;  %v769_v19 = vadd.f32 %v759_v17, %v670_v21  ;;  %1706 = vmatpush.msra.mxu2 %v2452_v6  ;;  %v2466_v5 = vld [vmem:[%s4322_s3 + $0x688] sm:$0xff] }
  0xf8   : > { %1752 = vmatpush.msra.mxu3 %v2455_v47  ;;  %1794 = vmatpush.msrb.mxu0 %v2479_v16  ;;  %v2468_v47 = vld [vmem:[%s4322_s3 + $0x698] sm:$0xff]  ;;  %v4008_v16 = vld [vmem:[%s4322_s3 + $0x730] sm:$0xff] }
  0xf9   : > { %1844 = vmatpush.msrb.mxu1 %v2478_v59  ;;  %818 = vst [vmem:[%s3680_s9 + $0x80] sm:$0xff] %v769_v19  ;;  %1707 = vmatpush.msra.mxu2 %v2451_v18  ;;  %v1034_v56 = vpop.f32.mrf.mxu2  ;;  %v2607_v19 = vld [vmem:[%s2884_s14 + $0x1a] sm:$0xff] }
  0xfa   : > { %1753 = vmatpush.msra.mxu3 %v2454_v10  ;;  %v3847_v25 = vpop.f32.mrf.mxu0  ;;  %1795 = vmatpush.msrb.mxu0 %v2478_v59  ;;  %v896_v10 = vadd.f32 %v3602_v60, %v3813_v7  ;;  %v3995_v7 = vld [vmem:[%s4322_s3 + $0x738] sm:$0xff] }
  0xfb   : > { %1845 = vmatpush.msrb.mxu1 %v2477_v24  ;;  %v3850_v26 = vpop.f32.mrf.mxu1  ;;  %1570 = vmatmul.f32.gmra.mxu3 %v3853_v27  ;;  %v897_v17 = vadd.f32 %v3602_v60, %v3847_v25  ;;  %v4041_v25 = vld [vmem:[%s4322_s3 + $0x718] sm:$0xff] }
  0xfc   : > { %1708 = vmatpush.msra.mxu2 %v2450_v20  ;;  %1754 = vmatpush.msra.mxu3 %v2453_v14  ;;  %v2465_v14 = vld [vmem:[%s4322_s3 + $0x680] sm:$0xff]  ;;  %v978_v15 = vadd.f32 %v3815_v13, %v896_v10  ;;  %v4017_v13 = vld [vmem:[%s4322_s3 + $0x728] sm:$0xff] }
  0xfd   : > { %1796 = vmatpush.msrb.mxu0 %v2477_v24  ;;  %1493 = vmatmul.f32.gmra.mxu1 %v2600_v30  ;;  %v4029_v24 = vld [vmem:[%s4322_s3 + $0x720] sm:$0xff]  ;;  %v979_v49 = vadd.f32 %v3850_v26, %v897_v17 }
  0xfe   : > { %1369 = vmatmul.f32.gmra.mxu0 %v3179_v8  ;;  %v762_v0 = vpop.f32.mrf.mxu3  ;;  %1846 = vmatpush.msrb.mxu1 %v2476_v28  ;;  %v3874_v8 = vld [vmem:[%s4322_s3 + $0x778] sm:$0xff] }
  0xff   : > { %1709 = vmatpush.msra.mxu2 %v2449_v29  ;;  %v770_v32 = vadd.f32 %v762_v0, %v671_v23  ;;  %1755 = vmatpush.msra.mxu3 %v2452_v6  ;;  %v1052_v6 = vadd.f32 %v1034_v56, %v978_v15  ;;  %v4063_v23 = vld [vmem:[%s4322_s3 + $0x7f0] sm:$0xff] }
 0x100   : > { %1797 = vmatpush.msrb.mxu0 %v2476_v28  ;;  %1710 = vmatmul.f32.vlgmr.msra.gmra.mxu2 %v2601_v33  ;;  %v4049_v28 = vld [vmem:[%s4322_s3 + $0x7f8] sm:$0xff]  ;;  %v2608_v33 = vld [vmem:[%s2884_s14 + $0x22] sm:$0xff] }
 0x101   : > { %1847 = vmatpush.msrb.mxu1 %v2475_v31  ;;  %819 = vst [vmem:[%s3680_s9 + $0x90] sm:$0xff] %v770_v32  ;;  %1756 = vmatpush.msra.mxu3 %v2451_v18  ;;  %v1037_v21 = vpop.f32.mrf.mxu2 }
 0x102   : > { %1798 = vmatpush.msrb.mxu0 %v2475_v31  ;;  %1958 = vmatpush.msrb.mxu2 %v3874_v8  ;;  %v1053_v26 = vadd.f32 %v1037_v21, %v979_v49  ;;  %v4069_v31 = vld [vmem:[%s4322_s3 + $0x708] sm:$0xff]  ;;  %v4169_v21 = vld [vmem:[%s2884_s14 + $0x3a] sm:$0xff] }
 0x103   : > { %1848 = vmatpush.msrb.mxu1 %v2474_v61  ;;  %v3887_v34 = vpop.f32.mrf.mxu0  ;;  %v3889_v38 = vpop.f32.mrf.mxu1  ;;  %1757 = vmatpush.msra.mxu3 %v2450_v20 }
 0x104   : > { %1799 = vmatpush.msrb.mxu0 %v2474_v61  ;;  %1959 = vmatpush.msrb.mxu2 %v3884_v35  ;;  %v898_v32 = vadd.f32 %v3602_v60, %v3887_v34 }
 0x105   : > { %1849 = vmatpush.msrb.mxu1 %v2473_v36  ;;  %1573 = vmatmul.f32.gmra.mxu3 %v3896_v40 }
 0x106   : > { %1800 = vmatpush.msrb.mxu0 %v2473_v36  ;;  %1758 = vmatpush.msra.mxu3 %v2449_v29  ;;  %v4056_v29 = vld [vmem:[%s4322_s3 + $0x710] sm:$0xff]  ;;  %v4081_v36 = vld [vmem:[%s4322_s3 + $0x700] sm:$0xff]  ;;  %v980_v34 = vadd.f32 %v3889_v38, %v898_v32 }
 0x107   : > { %1606 = vmatmul.f32.vlgmr.msra.gmra.mxu0 %v3908_v43  ;;  %v3911_v50 = vpop.f32.mrf.mxu3  ;;  %1635 = vmatmul.f32.vlgmr.msra.gmra.mxu1 %v3893_v39  ;;  %v4105_v38 = vld [vmem:[%s4322_s3 + $0x7e0] sm:$0xff] }
 0x108   : > { %1890 = vmatpush.msrb.mxu3 %v3874_v8  ;;  %1850 = vmatpush.msrb.mxu1 %v2472_v41 }
 0x109   : > { %1960 = vmatpush.msrb.mxu2 %v3905_v42  ;;  %1801 = vmatpush.msrb.mxu0 %v2472_v41  ;;  %v4096_v41 = vld [vmem:[%s4322_s3 + $0x7e8] sm:$0xff] }
 0x10a   : > { %1713 = vmatmul.f32.gmra.mxu2 %v2604_v12  ;;  %1851 = vmatpush.msrb.mxu1 %v2471_v44  ;;  %v1040_v30 = vpop.f32.mrf.mxu2 }
 0x10b   : > { %1891 = vmatpush.msrb.mxu3 %v3884_v35  ;;  %v3934_v53 = vpop.f32.mrf.mxu0  ;;  %1961 = vmatpush.msrb.mxu2 %v3922_v45 }
 0x10c   : > { %1802 = vmatpush.msrb.mxu0 %v2471_v44  ;;  %v3940_v62 = vpop.f32.mrf.mxu1  ;;  %1852 = vmatpush.msrb.mxu1 %v2470_v51 }
 0x10d   : > { %1892 = vmatpush.msrb.mxu3 %v3905_v42  ;;  %1962 = vmatpush.msrb.mxu2 %v3932_v52 }
 0x10e   : > { %1803 = vmatpush.msrb.mxu0 %v2470_v51  ;;  %1853 = vmatpush.msrb.mxu1 %v2469_v54 }
 0x10f   : > { %1893 = vmatpush.msrb.mxu3 %v3922_v45  ;;  %1963 = vmatpush.msrb.mxu2 %v3946_v55  ;;  %v3966_v63 = vpop.f32.mrf.mxu3 }
 0x110   : > { %1576 = vmatmul.f32.gmra.mxu3 %v3958_v57  ;;  %1804 = vmatpush.msrb.mxu0 %v2469_v54 }
 0x111   : > { %1638 = vmatmul.f32.gmra.mxu1 %v3950_v46  ;;  %1609 = vmatmul.f32.gmra.mxu0 %v3970_v2 }
 0x112   : > { %1854 = vmatpush.msrb.mxu1 %v2468_v47  ;;  %1894 = vmatpush.msrb.mxu3 %v3932_v52  ;;  %v1043_v54 = vpop.f32.mrf.mxu2 }
 0x113   : > { %1964 = vmatpush.msrb.mxu2 %v3964_v58  ;;  %1805 = vmatpush.msrb.mxu0 %v2468_v47 }
 0x114   : > { %v3985_v1 = vpop.f32.mrf.mxu0  ;;  %1716 = vmatmul.f32.gmra.mxu2 %v3806_v4  ;;  %1855 = vmatpush.msrb.mxu1 %v2467_v3 }
 0x115   : > { %1895 = vmatpush.msrb.mxu3 %v3946_v55  ;;  %v3997_v11 = vpop.f32.mrf.mxu1  ;;  %1965 = vmatpush.msrb.mxu2 %v3983_v9 }
 0x116   : > { %1806 = vmatpush.msrb.mxu0 %v2467_v3  ;;  %1856 = vmatpush.msrb.mxu1 %v2466_v5  ;;  %v900_v3 = vadd.f32 %v3602_v60, %v3985_v1 }
 0x117   : > { %1896 = vmatpush.msrb.mxu3 %v3964_v58  ;;  %1966 = vmatpush.msrb.mxu2 %v3995_v7 }
 0x118   : > { %1807 = vmatpush.msrb.mxu0 %v2466_v5  ;;  %1857 = vmatpush.msrb.mxu1 %v2465_v14  ;;  %v4151_v5 = vld [vmem:[%s4322_s3 + $0x7c8] sm:$0xff] }
 0x119   : > { %1897 = vmatpush.msrb.mxu3 %v3983_v9  ;;  %1967 = vmatpush.msrb.mxu2 %v4008_v16 }
 0x11a   : > { %1759 = vmatmul.f32.vlgmr.msra.gmra.mxu3 %v3908_v43  ;;  %v1133_v59 = vpop.f32.mrf.mxu3  ;;  %1808 = vmatpush.msrb.mxu0 %v2465_v14 }
 0x11b   : > { %1929 = vmatpush.msra.mxu1 %v3874_v8  ;;  %v1151_v22 = vadd.f32 %v1133_v59, %v1052_v6  ;;  %1809 = vmatmul.f32.vlgmr.msrb.gmra.mxu0 %v2607_v19 }
 0x11c   : > { %v4022_v18 = vpop.f32.mrf.mxu0  ;;  %1898 = vmatpush.msrb.mxu3 %v3995_v7  ;;  %1968 = vmatpush.msrb.mxu2 %v4017_v13  ;;  %v1046_v15 = vpop.f32.mrf.mxu2 }
 0x11d   : > { %1930 = vmatpush.msra.mxu1 %v3884_v35  ;;  %1200 = vst [vmem:[%s3680_s9 + $0x8] sm:$0xff] %v1151_v22  ;;  %v4034_v20 = vpop.f32.mrf.mxu1  ;;  %1719 = vmatmul.f32.gmra.mxu2 %v3853_v27  ;;  %v901_v22 = vadd.f32 %v3602_v60, %v4022_v18 }
 0x11e   : > { %1899 = vmatpush.msrb.mxu3 %v4008_v16  ;;  %1969 = vmatpush.msrb.mxu2 %v4029_v24 }
 0x11f   : > { %1931 = vmatpush.msra.mxu1 %v3905_v42  ;;  %2006 = vmatpush.msra.mxu0 %v4049_v28  ;;  %v1054_v42 = vadd.f32 %v1040_v30, %v980_v34  ;;  %v2497_v30 = vld [vmem:[%s4322_s3 + $0x780] sm:$0xff] }
 0x120   : > { %1900 = vmatpush.msrb.mxu3 %v4017_v13  ;;  %1970 = vmatpush.msrb.mxu2 %v4041_v25  ;;  %v431_v34 = vld [vmem:[%s3673_s6 + $0x2] sm:$0xff] }
 0x121   : > { %1932 = vmatpush.msra.mxu1 %v3922_v45  ;;  %2007 = vmatpush.msra.mxu0 %v4063_v23  ;;  %v899_v45 = vadd.f32 %v3602_v60, %v3934_v53  ;;  %v4118_v53 = vld [vmem:[%s2884_s14 + $0x32] sm:$0xff] }
 0x122   : > { %1901 = vmatpush.msrb.mxu3 %v4029_v24  ;;  %v1136_v0 = vpop.f32.mrf.mxu3  ;;  %1971 = vmatpush.msrb.mxu2 %v4056_v29 }
 0x123   : > { %1762 = vmatmul.f32.gmra.mxu3 %v3970_v2  ;;  %v1152_v61 = vadd.f32 %v1136_v0, %v1053_v26  ;;  %1933 = vmatpush.msra.mxu1 %v3932_v52  ;;  %v981_v56 = vadd.f32 %v3940_v62, %v899_v45  ;;  %v4137_v62 = vld [vmem:[%s4322_s3 + $0x7d0] sm:$0xff] }
 0x124   : > { %v890_v8 = vpop.f32.mrf.mxu0  ;;  %1812 = vmatmul.f32.gmra.mxu0 %v2608_v33  ;;  %1902 = vmatpush.msrb.mxu3 %v4041_v25  ;;  %v1049_v49 = vpop.f32.mrf.mxu2  ;;  %v432_v45 = vld [vmem:[%s3673_s6 + $0xa] sm:$0xff] }
 0x125   : > { %1972 = vmatpush.msrb.mxu2 %v4069_v31  ;;  %1201 = vst [vmem:[%s3680_s9 + $0x18] sm:$0xff] %v1152_v61  ;;  %1934 = vmatpush.msra.mxu1 %v3946_v55  ;;  %v902_v12 = vadd.f32 %v3602_v60, %v890_v8  ;;  %v1055_v47 = vadd.f32 %v1043_v54, %v981_v56  ;;  %v2613_v61 = vld [vmem:[%s2937_s12 + $0x2] sm:$0xff] }
 0x126   : > { %v972_v35 = vpop.f32.mrf.mxu1  ;;  %1722 = vmatmul.f32.gmra.mxu2 %v3896_v40  ;;  %1903 = vmatpush.msrb.mxu3 %v4056_v29 }
 0x127   : > { %1973 = vmatpush.msrb.mxu2 %v4081_v36  ;;  %1935 = vmatpush.msra.mxu1 %v3964_v58 }
 0x128   : > { %2008 = vmatpush.msra.mxu0 %v4096_v41  ;;  %1904 = vmatpush.msrb.mxu3 %v4069_v31 }
 0x129   : > { %2536 = vmatpush.msra.mxu2 %v4049_v28  ;;  %1936 = vmatpush.msra.mxu1 %v3983_v9 }
 0x12a   : > { %v1139_v44 = vpop.f32.mrf.mxu3  ;;  %1905 = vmatpush.msrb.mxu3 %v4081_v36  ;;  %2009 = vmatpush.msra.mxu0 %v4105_v38 }
 0x12b   : > { %2537 = vmatpush.msra.mxu2 %v4063_v23  ;;  %v1153_v51 = vadd.f32 %v1139_v44, %v1054_v42  ;;  %1858 = vmatmul.f32.vlgmr.msrb.gmra.mxu1 %v3484_v37  ;;  %v4128_v37 = vld [vmem:[%s4322_s3 + $0x7d8] sm:$0xff] }
 0x12c   : > { %v893_v52 = vpop.f32.mrf.mxu0  ;;  %1906 = vmatmul.f32.vlgmr.msrb.gmra.mxu3 %v3806_v4  ;;  %1937 = vmatpush.msra.mxu1 %v3995_v7  ;;  %v984_v4 = vadd.f32 %v972_v35, %v902_v12 }
 0x12d   : > { %2538 = vmatpush.msra.mxu2 %v4096_v41  ;;  %1202 = vst [vmem:[%s3680_s9 + $0x48] sm:$0xff] %v1153_v51  ;;  %1815 = vmatmul.f32.gmra.mxu0 %v4118_v53  ;;  %v903_v1 = vadd.f32 %v3602_v60, %v893_v52  ;;  %v2501_v60 = vld [vmem:[%s4322_s3 + $0x7a0] sm:$0xff] }
 0x12e   : > { %v975_v55 = vpop.f32.mrf.mxu1  ;;  %2045 = vmatpush.msra.mxu3 %v4049_v28  ;;  %1938 = vmatpush.msra.mxu1 %v4008_v16  ;;  %v1089_v9 = vadd.f32 %v3911_v50, %v984_v4  ;;  %v982_v16 = vadd.f32 %v3997_v11, %v900_v3 }
 0x12f   : > { %2539 = vmatpush.msra.mxu2 %v4105_v38  ;;  %2010 = vmatpush.msra.mxu0 %v4128_v37  ;;  %v985_v11 = vadd.f32 %v975_v55, %v903_v1  ;;  %v4266_v55 = vld [vmem:[%s4323_s4] ss:$0 sm:$0xff] }
 0x130   : > { %1725 = vmatmul.f32.gmra.mxu2 %v3958_v57  ;;  %2046 = vmatpush.msra.mxu3 %v4063_v23  ;;  %v1056_v6 = vadd.f32 %v1046_v15, %v982_v16 }
 0x131   : > { %1939 = vmatpush.msra.mxu1 %v4017_v13  ;;  %2540 = vmatpush.msra.mxu2 %v4128_v37  ;;  %v4187_v13 = vld [vmem:[%s4322_s3 + $0x7b0] sm:$0xff]  ;;  %v1090_v19 = vadd.f32 %v3966_v63, %v985_v11  ;;  %v983_v63 = vadd.f32 %v4034_v20, %v901_v22 }
 0x132   : > { %2011 = vmatpush.msra.mxu0 %v4137_v62  ;;  %v1142_v58 = vpop.f32.mrf.mxu3  ;;  %2047 = vmatpush.msra.mxu3 %v4096_v41  ;;  %v2499_v20 = vld [vmem:[%s4322_s3 + $0x790] sm:$0xff] }
 0x133   : > { %1940 = vmatpush.msra.mxu1 %v4029_v24  ;;  %v1154_v10 = vadd.f32 %v1142_v58, %v1055_v47  ;;  %2541 = vmatpush.msra.mxu2 %v4137_v62 }
 0x134   : > { %1861 = vmatmul.f32.gmra.mxu1 %v3539_v48  ;;  %v1182_v7 = vpop.f32.mrf.mxu0  ;;  %2048 = vmatpush.msra.mxu3 %v4105_v38  ;;  %v4164_v48 = vld [vmem:[%s4322_s3 + $0x7c0] sm:$0xff] }
 0x135   : > { %1941 = vmatpush.msra.mxu1 %v4041_v25  ;;  %1203 = vst [vmem:[%s3680_s9 + $0x58] sm:$0xff] %v1154_v10  ;;  %v1188_v50 = vadd.f32 %v1182_v7, %v1089_v9  ;;  %1909 = vmatmul.f32.gmra.mxu3 %v3853_v27  ;;  %v4178_v27 = vld [vmem:[%s4322_s3 + $0x7b8] sm:$0xff] }
 0x136   : > { %v4157_v14 = vpop.f32.mrf.mxu1  ;;  %2012 = vmatpush.msra.mxu0 %v4151_v5  ;;  %2542 = vmatpush.msra.mxu2 %v4151_v5 }
 0x137   : > { %1818 = vmatmul.f32.gmra.mxu0 %v4169_v21  ;;  %1206 = vst [vmem:[%s3680_s9 + $0xc8] sm:$0xff] %v1188_v50  ;;  %2049 = vmatpush.msra.mxu3 %v4128_v37 }
 0x138   : > { %1942 = vmatpush.msra.mxu1 %v4056_v29  ;;  %2543 = vmatpush.msra.mxu2 %v4164_v48  ;;  %v4214_v29 = vld [vmem:[%s2884_s14 + $0x4a] sm:$0xff] }
 0x139   : > { %2013 = vmatpush.msra.mxu0 %v4164_v48  ;;  %1974 = vmatmul.f32.vlgmr.msrb.gmra.mxu2 %v3893_v39  ;;  %v4196_v39 = vld [vmem:[%s4322_s3 + $0x7a8] sm:$0xff] }
 0x13a   : > { %2050 = vmatpush.msra.mxu3 %v4137_v62  ;;  %v1145_v59 = vpop.f32.mrf.mxu3  ;;  %1943 = vmatpush.msra.mxu1 %v4069_v31  ;;  %v2612_v31 = vld [vmem:[%s2884_s14 + $0x52] sm:$0xff] }
 0x13b   : > { %2544 = vmatpush.msra.mxu2 %v4178_v27  ;;  %v1155_v17 = vadd.f32 %v1145_v59, %v1056_v6  ;;  %2014 = vmatpush.msra.mxu0 %v4178_v27 }
 0x13c   : > { %2051 = vmatpush.msra.mxu3 %v4151_v5  ;;  %1944 = vmatpush.msra.mxu1 %v4081_v36 }
 0x13d   : > { %2545 = vmatpush.msra.mxu2 %v4187_v13  ;;  %1204 = vst [vmem:[%s3680_s9 + $0x88] sm:$0xff] %v1155_v17  ;;  %1912 = vmatmul.f32.gmra.mxu3 %v3896_v40  ;;  %v2500_v40 = vld [vmem:[%s4322_s3 + $0x798] sm:$0xff] }
 0x13e   : > { %2052 = vmatpush.msra.mxu3 %v4164_v48  ;;  %2074 = vmatpush.msrb.mxu1 %v4049_v28  ;;  %v1185_v24 = vpop.f32.mrf.mxu0  ;;  %v4211_v25 = vpop.f32.mrf.mxu1  ;;  %v1057_v28 = vadd.f32 %v1049_v49, %v983_v63 }
 0x13f   : > { %2546 = vmatpush.msra.mxu2 %v4196_v39  ;;  %v1189_v18 = vadd.f32 %v1185_v24, %v1090_v19  ;;  %1821 = vmatmul.f32.gmra.mxu0 %v4214_v29  ;;  %v1275_v10 = vadd.f32 %v4266_v55, %v4211_v25 }
 0x140   : > { %2053 = vmatpush.msra.mxu3 %v4178_v27  ;;  %2015 = vmatpush.msra.mxu0 %v4187_v13 }
 0x141   : > { %2075 = vmatpush.msrb.mxu1 %v4063_v23  ;;  %1207 = vst [vmem:[%s3680_s9 + $0xd8] sm:$0xff] %v1189_v18  ;;  %2547 = vmatpush.msra.mxu2 %v2501_v60 }
 0x142   : > { %2054 = vmatpush.msra.mxu3 %v4187_v13  ;;  %1977 = vmatmul.f32.gmra.mxu2 %v3950_v46  ;;  %v1148_v26 = vpop.f32.mrf.mxu3  ;;  %v2498_v46 = vld [vmem:[%s4322_s3 + $0x788] sm:$0xff] }
 0x143   : > { %2076 = vmatpush.msrb.mxu1 %v4096_v41  ;;  %2016 = vmatpush.msra.mxu0 %v4196_v39  ;;  %v1156_v23 = vadd.f32 %v1148_v26, %v1057_v28 }
 0x144   : > { %2548 = vmatpush.msra.mxu2 %v2500_v40  ;;  %2055 = vmatpush.msra.mxu3 %v4196_v39 }
 0x145   : > { %2077 = vmatpush.msrb.mxu1 %v4105_v38  ;;  %2017 = vmatpush.msra.mxu0 %v2501_v60  ;;  %1205 = vst [vmem:[%s3680_s9 + $0x98] sm:$0xff] %v1156_v23 }
 0x146   : > { %2549 = vmatpush.msra.mxu2 %v2499_v20  ;;  %2056 = vmatpush.msra.mxu3 %v2501_v60 }
 0x147   : > { %2078 = vmatpush.msrb.mxu1 %v4128_v37  ;;  %1915 = vmatmul.f32.gmra.mxu3 %v3958_v57  ;;  %v1305_v57 = vpop.f32.mrf.mxu2 }
 0x148   : > { %1945 = vmatmul.f32.vlgmr.msra.gmra.mxu1 %v3908_v43  ;;  %2550 = vmatpush.msra.mxu2 %v2498_v46  ;;  %v4245_v0 = vpop.f32.mrf.mxu1  ;;  %v1355_v32 = vpop.f32.mrf.mxu0 }
 0x149   : > { %1824 = vmatmul.f32.gmra.mxu0 %v2612_v31  ;;  %2057 = vmatpush.msra.mxu3 %v2500_v40  ;;  %v1276_v11 = vadd.f32 %v4266_v55, %v4245_v0 }
 0x14a   : > { %2079 = vmatpush.msrb.mxu1 %v4137_v62  ;;  %2018 = vmatpush.msra.mxu0 %v2500_v40 }
 0x14b   : > { %2551 = vmatpush.msra.mxu2 %v2497_v30  ;;  %2058 = vmatpush.msra.mxu3 %v2499_v20 }
 0x14c   : > { %2031 = vmatmul.f32.vlgmr.msra.gmra.mxu2 %v2612_v31  ;;  %2080 = vmatpush.msrb.mxu1 %v4151_v5 }
 0x14d   : > { %2019 = vmatpush.msra.mxu0 %v2499_v20  ;;  %2059 = vmatpush.msra.mxu3 %v2498_v46  ;;  %v1452_v43 = vpop.f32.mrf.mxu3 }
 0x14e   : > { %2081 = vmatpush.msrb.mxu1 %v4164_v48 }
 0x14f   : > { %2020 = vmatpush.msra.mxu0 %v2498_v46  ;;  %2060 = vmatpush.msra.mxu3 %v2497_v30  ;;  %v1308_v36 = vpop.f32.mrf.mxu2 }
 0x150   : > { %1948 = vmatmul.f32.gmra.mxu1 %v3970_v2  ;;  %2061 = vmatmul.f32.vlgmr.msra.gmra.mxu3 %v2613_v61  ;;  %v2614_v2 = vld [vmem:[%s2937_s12 + $0xa] sm:$0xff] }
 0x151   : > { %2082 = vmatpush.msrb.mxu1 %v4178_v27  ;;  %2021 = vmatpush.msra.mxu0 %v2497_v30 }
 0x152   : > { %2022 = vmatmul.f32.vlgmr.msra.gmra.mxu0 %v4118_v53  ;;  %v4255_v8 = vpop.f32.mrf.mxu1  ;;  %v1358_v33 = vpop.f32.mrf.mxu0  ;;  %v1274_v53 = vadd.f32 %v4266_v55, %v4157_v14  ;;  %v1311_v14 = vadd.f32 %v4266_v55, %v1305_v57 }
 0x153   : > { %2083 = vmatpush.msrb.mxu1 %v4187_v13  ;;  %v1374_v7 = vadd.f32 %v1358_v33, %v1275_v10  ;;  %v1277_v26 = vadd.f32 %v4266_v55, %v4255_v8 }
 0x154   : > { %v1373_v4 = vadd.f32 %v1355_v32, %v1274_v53 }
 0x155   : > { %2084 = vmatpush.msrb.mxu1 %v4196_v39  ;;  %v1312_v39 = vadd.f32 %v4266_v55, %v1308_v36 }
 0x156   : > { %v1464_v47 = vadd.f32 %v1452_v43, %v1373_v4 }
 0x157   : > { %2085 = vmatpush.msrb.mxu1 %v2501_v60  ;;  %v1455_v35 = vpop.f32.mrf.mxu3  ;;  %v1404_v38 = vpop.f32.mrf.mxu2 }
 0x158   : > { %2064 = vmatmul.f32.gmra.mxu3 %v2614_v2  ;;  %v1465_v15 = vadd.f32 %v1455_v35, %v1374_v7  ;;  %v1410_v27 = vadd.f32 %v1404_v38, %v1311_v14 }
 0x159   : > { %2086 = vmatpush.msrb.mxu1 %v2500_v40 }
 0x15a   : > { %2025 = vmatmul.f32.gmra.mxu0 %v4169_v21 }
 0x15b   : > { %2087 = vmatpush.msrb.mxu1 %v2499_v20 }
 0x15c   : > { %v1268_v41 = vpop.f32.mrf.mxu1 }
 0x15d   : > { %2088 = vmatpush.msrb.mxu1 %v2498_v46  ;;  %v1361_v42 = vpop.f32.mrf.mxu0  ;;  %v1278_v50 = vadd.f32 %v4266_v55, %v1268_v41 }
 0x15e   : > { %v1375_v24 = vadd.f32 %v1361_v42, %v1276_v11 }
 0x15f   : > { %2089 = vmatpush.msrb.mxu1 %v2497_v30  ;;  %v1407_v52 = vpop.f32.mrf.mxu2 }
 0x160   : > { %2090 = vmatmul.f32.vlgmr.msrb.gmra.mxu1 %v431_v34  ;;  %v1411_v49 = vadd.f32 %v1407_v52, %v1312_v39 }
 0x161   : > { %v1458_v44 = vpop.f32.mrf.mxu3 }
 0x162   : > { %2028 = vmatmul.f32.gmra.mxu0 %v4214_v29  ;;  %v1466_v18 = vadd.f32 %v1458_v44, %v1375_v24 }
 0x166   : > { %v1271_v12 = vpop.f32.mrf.mxu1 }
 0x167   : > { %v1364_v51 = vpop.f32.mrf.mxu0  ;;  %v1520_v62 = vpop.f32.mrf.mxu2  ;;  %v1279_v25 = vadd.f32 %v4266_v55, %v1271_v12 }
 0x168   : > { %2093 = vmatmul.f32.gmra.mxu1 %v432_v45  ;;  %v1526_v13 = vadd.f32 %v1520_v62, %v1410_v27  ;;  %v1376_v0 = vadd.f32 %v1364_v51, %v1277_v26 }
 0x16a   : > { %v1461_v54 = vpop.f32.mrf.mxu3 }
 0x16b   : > { %v1467_v57 = vadd.f32 %v1461_v54, %v1376_v0 }
 0x16f   : > { %v1523_v1 = vpop.f32.mrf.mxu2 }
 0x170   : > { %v1367_v56 = vpop.f32.mrf.mxu0  ;;  %v1527_v28 = vadd.f32 %v1523_v1, %v1411_v49 }
 0x171   : > { %v1491_v37 = vpop.f32.mrf.mxu1  ;;  %v1377_v48 = vadd.f32 %v1367_v56, %v1278_v50 }
 0x173   : > { %v1497_v6 = vadd.f32 %v1491_v37, %v1377_v48 }
 0x174   : > { %v1568_v58 = vpop.f32.mrf.mxu3 }
 0x175   : > { %v1580_v3 = vadd.f32 %v1568_v58, %v1464_v47 }
 0x177   : > { %2441 = vst [vmem:[%s3680_s9 + $0x20] sm:$0xff] %v1580_v3 }
 0x17a   : > { %v1494_v5 = vpop.f32.mrf.mxu1 }
 0x17b   : > { %v1370_v9 = vpop.f32.mrf.mxu0 }
 0x17c   : > { %v1378_v63 = vadd.f32 %v1370_v9, %v1279_v25 }
 0x17e   : > { %v1571_v16 = vpop.f32.mrf.mxu3  ;;  %v1498_v23 = vadd.f32 %v1494_v5, %v1378_v63 }
 0x17f   : > { %v1581_v21 = vadd.f32 %v1571_v16, %v1465_v15 }
 0x181   : > { %2442 = vst [vmem:[%s3680_s9 + $0x30] sm:$0xff] %v1581_v21 }
 0x183   : > { %v1711_v17 = vpop.f32.mrf.mxu2 }
 0x184   : > { %v1607_v59 = vpop.f32.mrf.mxu0  ;;  %v1636_v19 = vpop.f32.mrf.mxu1  ;;  %v1729_v62 = vadd.f32 %v4266_v55, %v1711_v17 }
 0x185   : > { %v1613_v22 = vadd.f32 %v1607_v59, %v1497_v6  ;;  %v1642_v60 = vadd.f32 %v1636_v19, %v1526_v13 }
 0x187   : > { %2445 = vst [vmem:[%s3680_s9 + $0xa0] sm:$0xff] %v1613_v22 }
 0x188   : > { %2447 = vst [vmem:[%s3680_s9 + $0xe0] sm:$0xff] %v1642_v60  ;;  %v1574_v29 = vpop.f32.mrf.mxu3 }
 0x189   : > { %v1582_v40 = vadd.f32 %v1574_v29, %v1466_v18 }
 0x18b   : > { %2443 = vst [vmem:[%s3680_s9 + $0x60] sm:$0xff] %v1582_v40 }
 0x18d   : > { %v1714_v20 = vpop.f32.mrf.mxu2 }
 0x18e   : > { %v1639_v46 = vpop.f32.mrf.mxu1  ;;  %v1610_v30 = vpop.f32.mrf.mxu0  ;;  %v1730_v15 = vadd.f32 %v4266_v55, %v1714_v20 }
 0x18f   : > { %v1643_v31 = vadd.f32 %v1639_v46, %v1527_v28  ;;  %v1614_v32 = vadd.f32 %v1610_v30, %v1498_v23 }
 0x191   : > { %2448 = vst [vmem:[%s3680_s9 + $0xf0] sm:$0xff] %v1643_v31 }
 0x192   : > { %2446 = vst [vmem:[%s3680_s9 + $0xb0] sm:$0xff] %v1614_v32 }
 0x193   : > { %v1577_v43 = vpop.f32.mrf.mxu3 }
 0x194   : > { %v1583_v61 = vadd.f32 %v1577_v43, %v1467_v57 }
 0x196   : > { %2444 = vst [vmem:[%s3680_s9 + $0x70] sm:$0xff] %v1583_v61 }
 0x197   : > { %v1717_v33 = vpop.f32.mrf.mxu2 }
 0x198   : > { %v1810_v36 = vpop.f32.mrf.mxu0  ;;  %v1731_v24 = vadd.f32 %v4266_v55, %v1717_v33 }
 0x199   : > { %v1828_v9 = vadd.f32 %v1810_v36, %v1729_v62 }
 0x19d   : > { %v1760_v35 = vpop.f32.mrf.mxu3 }
 0x19e   : > { %v1766_v17 = vadd.f32 %v4266_v55, %v1760_v35 }
 0x1a0   : > { %v1720_v2 = vpop.f32.mrf.mxu2 }
 0x1a1   : > { %v1813_v34 = vpop.f32.mrf.mxu0  ;;  %v1732_v37 = vadd.f32 %v4266_v55, %v1720_v2 }
 0x1a2   : > { %v1829_v27 = vadd.f32 %v1813_v34, %v1730_v15 }
 0x1a6   : > { %v1763_v41 = vpop.f32.mrf.mxu3 }
 0x1a7   : > { %v1767_v20 = vadd.f32 %v4266_v55, %v1763_v41 }
 0x1a8   : > { %v1859_v12 = vpop.f32.mrf.mxu1 }
 0x1a9   : > { %v1723_v42 = vpop.f32.mrf.mxu2  ;;  %v1865_v25 = vadd.f32 %v1859_v12, %v1766_v17 }
 0x1aa   : > { %v1816_v8 = vpop.f32.mrf.mxu0  ;;  %v1733_v5 = vadd.f32 %v4266_v55, %v1723_v42 }
 0x1ab   : > { %v1830_v49 = vadd.f32 %v1816_v8, %v1731_v24 }
 0x1af   : > { %v1907_v38 = vpop.f32.mrf.mxu3 }
 0x1b0   : > { %v1919_v1 = vadd.f32 %v1907_v38, %v1828_v9 }
 0x1b1   : > { %v1862_v56 = vpop.f32.mrf.mxu1 }
 0x1b2   : > { %v1866_v0 = vadd.f32 %v1862_v56, %v1767_v20 }
 0x1b3   : > { %v1726_v44 = vpop.f32.mrf.mxu2 }
 0x1b4   : > { %v1819_v45 = vpop.f32.mrf.mxu0  ;;  %v1734_v6 = vadd.f32 %v4266_v55, %v1726_v44 }
 0x1b5   : > { %v1831_v58 = vadd.f32 %v1819_v45, %v1732_v37 }
 0x1b8   : > { %v1910_v51 = vpop.f32.mrf.mxu3 }
 0x1b9   : > { %v1920_v39 = vadd.f32 %v1910_v51, %v1829_v27 }
 0x1bc   : > { %v1822_v52 = vpop.f32.mrf.mxu0  ;;  %v1975_v53 = vpop.f32.mrf.mxu2 }
 0x1bd   : > { %v1832_v48 = vadd.f32 %v1822_v52, %v1733_v5  ;;  %v1981_v29 = vadd.f32 %v1975_v53, %v1865_v25 }
 0x1c0   : > { %v1913_v54 = vpop.f32.mrf.mxu3 }
 0x1c1   : > { %v1921_v26 = vadd.f32 %v1913_v54, %v1830_v49 }
 0x1c5   : > { %v1978_v47 = vpop.f32.mrf.mxu2  ;;  %v1946_v3 = vpop.f32.mrf.mxu1 }
 0x1c6   : > { %v1825_v4 = vpop.f32.mrf.mxu0  ;;  %v1952_v11 = vadd.f32 %v1946_v3, %v1832_v48  ;;  %v1982_v32 = vadd.f32 %v1978_v47, %v1866_v0 }
 0x1c7   : > { %v1833_v60 = vadd.f32 %v1825_v4, %v1734_v6 }
 0x1ca   : > { %v1916_v10 = vpop.f32.mrf.mxu3 }
 0x1cb   : > { %v1922_v7 = vadd.f32 %v1916_v10, %v1831_v58 }
 0x1cd   : > { %v1949_v13 = vpop.f32.mrf.mxu1 }
 0x1ce   : > { %v1953_v63 = vadd.f32 %v1949_v13, %v1833_v60 }
 0x1cf   : > { %v2023_v50 = vpop.f32.mrf.mxu0  ;;  %v2032_v14 = vpop.f32.mrf.mxu2 }
 0x1d0   : > { %v2035_v16 = vadd.f32 %v2023_v50, %v1919_v1  ;;  %v2038_v21 = vadd.f32 %v2032_v14, %v1922_v7 }
 0x1d2   : > { %2513 = vst [vmem:[%s3680_s9 + $0x28] sm:$0xff] %v2035_v16 }
 0x1d3   : > { %2516 = vst [vmem:[%s3680_s9 + $0x78] sm:$0xff] %v2038_v21  ;;  %v2062_v59 = vpop.f32.mrf.mxu3 }
 0x1d4   : > { %v2068_v22 = vadd.f32 %v2062_v59, %v1952_v11 }
 0x1d6   : > { %2517 = vst [vmem:[%s3680_s9 + $0xa8] sm:$0xff] %v2068_v22 }
 0x1d7   : > { %v2026_v19 = vpop.f32.mrf.mxu0 }
 0x1d8   : > { %v2036_v18 = vadd.f32 %v2026_v19, %v1920_v39 }
 0x1da   : > { %2514 = vst [vmem:[%s3680_s9 + $0x38] sm:$0xff] %v2036_v18 }
 0x1db   : > { %v2065_v40 = vpop.f32.mrf.mxu3 }
 0x1dc   : > { %v2069_v23 = vadd.f32 %v2065_v40, %v1953_v63 }
 0x1dd   : > { %v2091_v28 = vpop.f32.mrf.mxu1 }
 0x1de   : > { %v2097_v46 = vadd.f32 %v2091_v28, %v1981_v29  ;;  %2518 = vst [vmem:[%s3680_s9 + $0xb8] sm:$0xff] %v2069_v23 }
 0x1df   : > { %v2029_v30 = vpop.f32.mrf.mxu0 }
 0x1e0   : > { %v2037_v31 = vadd.f32 %v2029_v30, %v1921_v26  ;;  %2519 = vst [vmem:[%s3680_s9 + $0xe8] sm:$0xff] %v2097_v46 }
 0x1e2   : > { %2515 = vst [vmem:[%s3680_s9 + $0x68] sm:$0xff] %v2037_v31 }
 0x1e5   : > { %v2094_v57 = vpop.f32.mrf.mxu1 }
 0x1e6   : > { %v2098_v43 = vadd.f32 %v2094_v57, %v1982_v32 }
 0x1e8   : > { %2520 = vst [vmem:[%s3680_s9 + $0xf8] sm:$0xff] %v2098_v43 }
 0x1e9 PF: > { %s15_s22 = sadd.s32 1, %s2654_s22   ;;  %s4326_s18 = smov %s2646_s20 }
 0x1ea   : > { %p12_p10 = scmp.ge.s32.totalorder %s15_s22, 10   ;;  %s4327_s19 = smov %s2650_s21 }
 0x1eb   : > { %s4328_s20 = smov %s4331_s23  ;;  %s4329_s21 = smov %s4335_s24 }
 0x1ec   :  { %14 = sbr.rel (!%p12_p10) target bundleno = 3 (0x3), region = 92 }

</bundles_post_ra>
